<compile_context>
chip_gen: v5e
topology: v5e:2x2
jax: 0.10.0
libtpu: 0.0.40
codegen_flags: <defaults>
</compile_context>

<pallas_src>
import jax
import jax.numpy as jnp
from jax.experimental import pallas as pl
from jax.experimental.pallas import tpu as pltpu


def _mul_conv1x1_kernel(w_ref, s_ref, x_ref, o_ref):
    # w_ref: (Cout, Cin), s_ref: (1, Cin), x_ref: (Cin, M), o_ref: (Cout, M)
    ws = w_ref[...] * s_ref[...]                      # fold gate into weight (VPU)
    o_ref[...] = jnp.dot(
        ws, x_ref[...], preferred_element_type=jnp.float32
    ).astype(o_ref.dtype)                             # 1x1 conv == matmul (MXU)


def mul_conv1x1(x_nchw, scale_nc11, weight_oi11):
    """x_nchw: (1, Cin, H, W); scale_nc11: (1, Cin, 1, 1);
    weight_oi11: (Cout, Cin, 1, 1).  Returns (1, Cout, H, W).

    conv1x1(x * scale) == (conv_w * scale) @ X on the natural (Cin, H*W)
    view of NCHW -> only pure reshapes in the wrapper, zero transposes.
    """
    n, cin, h, w = x_nchw.shape
    cout = weight_oi11.shape[0]
    assert n == 1 and scale_nc11.shape == (1, cin, 1, 1)

    m = h * w
    x_mat = x_nchw.reshape(cin, m)          # pure view, no data movement
    s_mat = scale_nc11.reshape(1, cin)
    w_mat = weight_oi11.reshape(cout, cin)

    # ~94 MFLOP vs ~2 MB HBM -> memory/overhead bound; single block fits VMEM
    # comfortably on v5e/v6e/v7x, so keep grid=(1,) (each extra grid step costs
    # ~0.35 us of fixed overhead, more than any overlap it could buy here).
    flops = 2 * m * cin * cout
    bytes_accessed = 4 * (cin * m + cout * cin + cin + cout * m)

    out_mat = pl.pallas_call(
        _mul_conv1x1_kernel,
        out_shape=jax.ShapeDtypeStruct((cout, m), x_mat.dtype),
        grid_spec=pltpu.PrefetchScalarGridSpec(
            num_scalar_prefetch=0,
            grid=(1,),
            in_specs=[
                pl.BlockSpec((cout, cin), lambda i: (0, 0)),
                pl.BlockSpec((1, cin), lambda i: (0, 0)),
                pl.BlockSpec((cin, m), lambda i: (0, 0)),
            ],
            out_specs=pl.BlockSpec((cout, m), lambda i: (0, 0)),
        ),
        compiler_params=pltpu.CompilerParams(
            dimension_semantics=("arbitrary",),
        ),
        cost_estimate=pl.CostEstimate(
            flops=flops, bytes_accessed=bytes_accessed, transcendentals=0
        ),
    )(w_mat, s_mat, x_mat)

    # (Cout, H*W) -> (1, Cout, H, W): pure reshape, already NCHW order.
    return out_mat.reshape(n, cout, h, w)


if __name__ == "__main__":
    key = jax.random.PRNGKey(0)
    k1, k2, k3 = jax.random.split(key, 3)

    N, CIN, H, W = 1, 1200, 14, 14
    COUT = 200

    x374 = jax.random.normal(k1, (N, CIN, H, W), dtype=jnp.float32)   # feature map
    x379 = jax.random.normal(k2, (N, CIN, 1, 1), dtype=jnp.float32)   # per-channel gate
    # Conv2d(1200, 200, kernel_size=1, bias=False) weight, deterministic init
    conv_w = (jax.random.normal(k3, (COUT, CIN, 1, 1), dtype=jnp.float32)
              * (1.0 / jnp.sqrt(CIN)))

    out = mul_conv1x1(x374, x379, conv_w)
    out = jax.block_until_ready(out)

    # reference check (plain JAX)
    ref = jnp.einsum(
        "nchw,oc->nohw",
        x374 * x379,
        conv_w.reshape(COUT, CIN),
    )
    assert out.shape == (N, COUT, H, W), out.shape
    assert jnp.allclose(out, ref, atol=1e-3, rtol=1e-3)

    print("KERNEL_OK")
</pallas_src>

<mosaic_0001>
module attributes {stable_mosaic.version = 11 : i64} {
  func.func @_mul_conv1x1_kernel(%arg0: i32, %arg1: memref<200x1200xf32, #tpu.memory_space<vmem>>, %arg2: memref<1x1200xf32, #tpu.memory_space<vmem>>, %arg3: memref<1200x196xf32, #tpu.memory_space<vmem>>, %arg4: memref<200x196xf32, #tpu.memory_space<vmem>>) attributes {dimension_semantics = [#tpu.dimension_semantics<arbitrary>], iteration_bounds = array<i64: 1>, scalar_prefetch = 0 : i64, scratch_operands = 0 : i64, tpu.core_type = #tpu.core_type<tc>, window_params = [{pipeline_mode = #tpu.pipeline_mode<synchronous>, transform_indices = @transform_0, window_bounds = array<i64: 200, 1200>}, {pipeline_mode = #tpu.pipeline_mode<synchronous>, transform_indices = @transform_1, window_bounds = array<i64: 1, 1200>}, {pipeline_mode = #tpu.pipeline_mode<synchronous>, transform_indices = @transform_2, window_bounds = array<i64: 1200, 196>}, {pipeline_mode = #tpu.pipeline_mode<synchronous>, transform_indices = @transform_3, window_bounds = array<i64: 200, 196>}]} {
    %c0 = arith.constant 0 : index
    %c0_0 = arith.constant 0 : index
    %0 = vector.load %arg1[%c0, %c0_0] : memref<200x1200xf32, #tpu.memory_space<vmem>>, vector<200x1200xf32>
    %c0_1 = arith.constant 0 : index
    %c0_2 = arith.constant 0 : index
    %1 = vector.load %arg2[%c0_1, %c0_2] : memref<1x1200xf32, #tpu.memory_space<vmem>>, vector<1x1200xf32>
    %2 = vector.broadcast %1 : vector<1x1200xf32> to vector<200x1200xf32>
    %3 = arith.mulf %0, %2 : vector<200x1200xf32>
    %c0_3 = arith.constant 0 : index
    %c0_4 = arith.constant 0 : index
    %4 = vector.load %arg3[%c0_3, %c0_4] : memref<1200x196xf32, #tpu.memory_space<vmem>>, vector<1200x196xf32>
    %cst = arith.constant dense<0.000000e+00> : vector<200x196xf32>
    %5 = tpu.matmul %3, %4, %cst {dimension_numbers = #tpu.dot_dimension_numbers<[1], [0], [0], [1], [0, 0, 1, 1], [], []>} : vector<200x1200xf32>, vector<1200x196xf32>, vector<200x196xf32> -> vector<200x196xf32>
    %c0_5 = arith.constant 0 : index
    %c0_6 = arith.constant 0 : index
    %6 = vector.load %arg4[%c0_5, %c0_6] : memref<200x196xf32, #tpu.memory_space<vmem>>, vector<200x196xf32>
    tpu.vector_store %arg4[%c0_5, %c0_6], %5 {strides = array<i32>} : memref<200x196xf32, #tpu.memory_space<vmem>>, vector<200x196xf32>,
    return
  }
  func.func @transform_0(%arg0: i32) -> (i32, i32) {
    %c0_i32 = arith.constant 0 : i32
    %c0_i32_0 = arith.constant 0 : i32
    %c0_i32_1 = arith.constant 0 : i32
    return %c0_i32, %c0_i32_0 : i32, i32
  }
  func.func @transform_1(%arg0: i32) -> (i32, i32) {
    %c0_i32 = arith.constant 0 : i32
    %c0_i32_0 = arith.constant 0 : i32
    %c0_i32_1 = arith.constant 0 : i32
    return %c0_i32, %c0_i32_0 : i32, i32
  }
  func.func @transform_2(%arg0: i32) -> (i32, i32) {
    %c0_i32 = arith.constant 0 : i32
    %c0_i32_0 = arith.constant 0 : i32
    %c0_i32_1 = arith.constant 0 : i32
    return %c0_i32, %c0_i32_0 : i32, i32
  }
  func.func @transform_3(%arg0: i32) -> (i32, i32) {
    %c0_i32 = arith.constant 0 : i32
    %c0_i32_0 = arith.constant 0 : i32
    %c0_i32_1 = arith.constant 0 : i32
    return %c0_i32, %c0_i32_0 : i32, i32
  }
}

</mosaic_0001>

<bundles_post_ra>
// kernel: tpu_custom_call.1
= control target key start
LH: loop header
LB: loop body
LE: loop exit
PB: predicated region body
PF: predicated region fallthrough
CT: control target
= control target key end

     0   :  { %s6234_s0 = inlined_call_operand.vmem [shape: f32[200,1200], index: 0, kind: input, shape index: {}]   ;;  %s6235_s1 = inlined_call_operand.vmem [shape: f32[1,1200], index: 1, kind: input, shape index: {}]   ;;  %s6236_s2 = inlined_call_operand.vmem [shape: f32[1200,196], index: 2, kind: input, shape index: {}]   ;;  %s6237_s3 = inlined_call_operand.hbm [shape: f32[200,196], index: 3, kind: output, shape index: {}]  }
   0x1   :  { %v569_v0 = vld [vmem:[%s6236_s2 + $0xf0] sm:$0xff]  ;;  %v567_v3 = vld [vmem:[%s6236_s2 + $0xe0] sm:$0xff] }
   0x2   :  { %v633_v1 = vld [vmem:[%s6236_s2 + $0x2f0] sm:$0xff]  ;;  %915 = vmatpush.msra.mxu0 %v569_v0  ;;  %v631_v5 = vld [vmem:[%s6236_s2 + $0x2e0] sm:$0xff]  ;;  %v18_v0 = vld [vmem:[%s6234_s0 + $0x18] sm:$0xff] }
   0x3   :  { %v665_v2 = vld [vmem:[%s6236_s2 + $0x3f0] sm:$0xff]  ;;  %1099 = vmatpush.msra.mxu2 %v633_v1  ;;  %v663_v6 = vld [vmem:[%s6236_s2 + $0x3e0] sm:$0xff] }
   0x4   :  { %v601_v4 = vld [vmem:[%s6236_s2 + $0x1f0] sm:$0xff]  ;;  %1191 = vmatpush.msra.mxu3 %v665_v2  ;;  %v599_v8 = vld [vmem:[%s6236_s2 + $0x1e0] sm:$0xff]  ;;  %916 = vmatpush.msra.mxu0 %v567_v3 }
   0x5   :  { %1007 = vmatpush.msra.mxu1 %v601_v4  ;;  %v565_v7 = vld [vmem:[%s6236_s2 + $0xd0] sm:$0xff]  ;;  %1100 = vmatpush.msra.mxu2 %v631_v5  ;;  %v563_v11 = vld [vmem:[%s6236_s2 + $0xc0] sm:$0xff] }
   0x6   :  { %v629_v9 = vld [vmem:[%s6236_s2 + $0x2d0] sm:$0xff]  ;;  %1192 = vmatpush.msra.mxu3 %v663_v6  ;;  %v627_v13 = vld [vmem:[%s6236_s2 + $0x2c0] sm:$0xff]  ;;  %917 = vmatpush.msra.mxu0 %v565_v7  ;;  %v16_v7 = vld [vmem:[%s6234_s0 + $0x8] sm:$0xff] }
   0x7   :  { %v661_v10 = vld [vmem:[%s6236_s2 + $0x3d0] sm:$0xff]  ;;  %1008 = vmatpush.msra.mxu1 %v599_v8  ;;  %1101 = vmatpush.msra.mxu2 %v629_v9  ;;  %v659_v14 = vld [vmem:[%s6236_s2 + $0x3c0] sm:$0xff] }
   0x8   :  { %v597_v12 = vld [vmem:[%s6236_s2 + $0x1d0] sm:$0xff]  ;;  %v595_v15 = vld [vmem:[%s6236_s2 + $0x1c0] sm:$0xff]  ;;  %1193 = vmatpush.msra.mxu3 %v661_v10  ;;  %918 = vmatpush.msra.mxu0 %v563_v11 }
   0x9   :  { %1009 = vmatpush.msra.mxu1 %v597_v12  ;;  %v561_v16 = vld [vmem:[%s6236_s2 + $0xb0] sm:$0xff]  ;;  %1102 = vmatpush.msra.mxu2 %v627_v13  ;;  %v559_v20 = vld [vmem:[%s6236_s2 + $0xa0] sm:$0xff] }
   0xa   :  { %v625_v17 = vld [vmem:[%s6236_s2 + $0x2b0] sm:$0xff]  ;;  %1194 = vmatpush.msra.mxu3 %v659_v14  ;;  %v623_v21 = vld [vmem:[%s6236_s2 + $0x2a0] sm:$0xff]  ;;  %919 = vmatpush.msra.mxu0 %v561_v16 }
   0xb   :  { %v657_v18 = vld [vmem:[%s6236_s2 + $0x3b0] sm:$0xff]  ;;  %1010 = vmatpush.msra.mxu1 %v595_v15  ;;  %1103 = vmatpush.msra.mxu2 %v625_v17  ;;  %v655_v22 = vld [vmem:[%s6236_s2 + $0x3a0] sm:$0xff] }
   0xc   :  { %v593_v19 = vld [vmem:[%s6236_s2 + $0x1b0] sm:$0xff]  ;;  %v591_v23 = vld [vmem:[%s6236_s2 + $0x1a0] sm:$0xff]  ;;  %1195 = vmatpush.msra.mxu3 %v657_v18  ;;  %920 = vmatpush.msra.mxu0 %v559_v20 }
   0xd   :  { %1011 = vmatpush.msra.mxu1 %v593_v19  ;;  %v557_v24 = vld [vmem:[%s6236_s2 + $0x90] sm:$0xff]  ;;  %1104 = vmatpush.msra.mxu2 %v623_v21  ;;  %v555_v28 = vld [vmem:[%s6236_s2 + $0x80] sm:$0xff] }
   0xe   :  { %v621_v25 = vld [vmem:[%s6236_s2 + $0x290] sm:$0xff]  ;;  %1196 = vmatpush.msra.mxu3 %v655_v22  ;;  %v619_v29 = vld [vmem:[%s6236_s2 + $0x280] sm:$0xff]  ;;  %921 = vmatpush.msra.mxu0 %v557_v24 }
   0xf   :  { %v653_v26 = vld [vmem:[%s6236_s2 + $0x390] sm:$0xff]  ;;  %1012 = vmatpush.msra.mxu1 %v591_v23  ;;  %1105 = vmatpush.msra.mxu2 %v621_v25  ;;  %v651_v30 = vld [vmem:[%s6236_s2 + $0x380] sm:$0xff] }
  0x10   :  { %v589_v27 = vld [vmem:[%s6236_s2 + $0x190] sm:$0xff]  ;;  %v587_v31 = vld [vmem:[%s6236_s2 + $0x180] sm:$0xff]  ;;  %1197 = vmatpush.msra.mxu3 %v653_v26  ;;  %922 = vmatpush.msra.mxu0 %v555_v28 }
  0x11   :  { %1013 = vmatpush.msra.mxu1 %v589_v27  ;;  %v553_v32 = vld [vmem:[%s6236_s2 + $0x70] sm:$0xff]  ;;  %1106 = vmatpush.msra.mxu2 %v619_v29  ;;  %v551_v36 = vld [vmem:[%s6236_s2 + $0x60] sm:$0xff] }
  0x12   :  { %v617_v33 = vld [vmem:[%s6236_s2 + $0x270] sm:$0xff]  ;;  %1198 = vmatpush.msra.mxu3 %v651_v30  ;;  %v615_v37 = vld [vmem:[%s6236_s2 + $0x260] sm:$0xff]  ;;  %923 = vmatpush.msra.mxu0 %v553_v32 }
  0x13   :  { %v649_v34 = vld [vmem:[%s6236_s2 + $0x370] sm:$0xff]  ;;  %1014 = vmatpush.msra.mxu1 %v587_v31  ;;  %1107 = vmatpush.msra.mxu2 %v617_v33  ;;  %v647_v38 = vld [vmem:[%s6236_s2 + $0x360] sm:$0xff] }
  0x14   :  { %v585_v35 = vld [vmem:[%s6236_s2 + $0x170] sm:$0xff]  ;;  %v583_v39 = vld [vmem:[%s6236_s2 + $0x160] sm:$0xff]  ;;  %1199 = vmatpush.msra.mxu3 %v649_v34  ;;  %924 = vmatpush.msra.mxu0 %v551_v36 }
  0x15   :  { %1015 = vmatpush.msra.mxu1 %v585_v35  ;;  %v549_v40 = vld [vmem:[%s6236_s2 + $0x50] sm:$0xff]  ;;  %1108 = vmatpush.msra.mxu2 %v615_v37  ;;  %v547_v44 = vld [vmem:[%s6236_s2 + $0x40] sm:$0xff] }
  0x16   :  { %v613_v41 = vld [vmem:[%s6236_s2 + $0x250] sm:$0xff]  ;;  %1200 = vmatpush.msra.mxu3 %v647_v38  ;;  %v611_v45 = vld [vmem:[%s6236_s2 + $0x240] sm:$0xff]  ;;  %925 = vmatpush.msra.mxu0 %v549_v40 }
  0x17   :  { %v645_v42 = vld [vmem:[%s6236_s2 + $0x350] sm:$0xff]  ;;  %1016 = vmatpush.msra.mxu1 %v583_v39  ;;  %1109 = vmatpush.msra.mxu2 %v613_v41  ;;  %v643_v46 = vld [vmem:[%s6236_s2 + $0x340] sm:$0xff] }
  0x18   :  { %v581_v43 = vld [vmem:[%s6236_s2 + $0x150] sm:$0xff]  ;;  %v579_v47 = vld [vmem:[%s6236_s2 + $0x140] sm:$0xff]  ;;  %1201 = vmatpush.msra.mxu3 %v645_v42  ;;  %926 = vmatpush.msra.mxu0 %v547_v44 }
  0x19   :  { %v265_v48 = vld [vmem:[%s6235_s1] sm:$0xff]  ;;  %1017 = vmatpush.msra.mxu1 %v581_v43  ;;  %v545_v49 = vld [vmem:[%s6236_s2 + $0x30] sm:$0xff]  ;;  %1110 = vmatpush.msra.mxu2 %v611_v45 }
  0x1a   :  { %v609_v50 = vld [vmem:[%s6236_s2 + $0x230] sm:$0xff]  ;;  %1202 = vmatpush.msra.mxu3 %v643_v46  ;;  %v543_v53 = vld [vmem:[%s6236_s2 + $0x20] sm:$0xff]  ;;  %v3095_v56 = vperm.slane %v265_v48, 0  ;;  %927 = vmatpush.msra.mxu0 %v545_v49  ;;  %v3106_v60 = vperm.slane %v265_v48, 2  ;;  %v3108_v61 = vperm.slane %v265_v48, 3  ;;  %v3125_v3 = vperm.slane %v265_v48, 1 }
  0x1b   :  { %v641_v51 = vld [vmem:[%s6236_s2 + $0x330] sm:$0xff]  ;;  %1018 = vmatpush.msra.mxu1 %v579_v47  ;;  %v607_v54 = vld [vmem:[%s6236_s2 + $0x220] sm:$0xff]  ;;  %1111 = vmatpush.msra.mxu2 %v609_v50 }
  0x1c   :  { %v577_v52 = vld [vmem:[%s6236_s2 + $0x130] sm:$0xff]  ;;  %v639_v55 = vld [vmem:[%s6236_s2 + $0x320] sm:$0xff]  ;;  %1203 = vmatpush.msra.mxu3 %v641_v51  ;;  %928 = vmatpush.msra.mxu0 %v543_v53  ;;  %v3146_v10 = vmul.f32 %v3108_v61, %v18_v0  ;;  %v3155_v13 = vmul.f32 %v3125_v3, %v16_v7 }
  0x1d   :  { %v541_v57 = vld [vmem:[%s6236_s2 + $0x10] sm:$0xff]  ;;  %v575_v58 = vld [vmem:[%s6236_s2 + $0x120] sm:$0xff]  ;;  %1019 = vmatpush.msra.mxu1 %v577_v52  ;;  %1112 = vmatpush.msra.mxu2 %v607_v54 }
  0x1e   :  { %v15_v59 = vld [vmem:[%s6234_s0] sm:$0xff]  ;;  %v605_v62 = vld [vmem:[%s6236_s2 + $0x210] sm:$0xff]  ;;  %1204 = vmatpush.msra.mxu3 %v639_v55  ;;  %929 = vmatpush.msra.mxu0 %v541_v57  ;;  %6443 = vst [vmem:[#allocation6_spill] sm:$0xff] %v3146_v10 }
  0x1f   :  { %v17_v63 = vld [vmem:[%s6234_s0 + $0x10] sm:$0xff]  ;;  %1020 = vmatpush.msra.mxu1 %v575_v58  ;;  %v539_v4 = vld [vmem:[%s6236_s2] sm:$0xff]  ;;  %v3134_v6 = vmul.f32 %v3095_v56, %v15_v59  ;;  %1113 = vmatpush.msra.mxu2 %v605_v62 }
  0x20   :  { %v637_v1 = vld [vmem:[%s6236_s2 + $0x310] sm:$0xff]  ;;  %v603_v5 = vld [vmem:[%s6236_s2 + $0x200] sm:$0xff]  ;;  %v3143_v9 = vmul.f32 %v3106_v60, %v17_v63  ;;  %930 = vmatpush.msra.mxu0 %v539_v4 }
  0x21   :  { %v573_v2 = vld [vmem:[%s6236_s2 + $0x110] sm:$0xff]  ;;  %v635_v8 = vld [vmem:[%s6236_s2 + $0x300] sm:$0xff]  ;;  %1205 = vmatpush.msra.mxu3 %v637_v1  ;;  %1114 = vmatpush.msra.mxu2 %v603_v5 }
  0x22   :  { %6442 = vst [vmem:[#allocation5_spill] sm:$0xff] %v3143_v9  ;;  %1021 = vmatpush.msra.mxu1 %v573_v2  ;;  %v761_v11 = vld [vmem:[%s6236_s2 + $0x6f0] sm:$0xff]  ;;  %v571_v12 = vld [vmem:[%s6236_s2 + $0x100] sm:$0xff]  ;;  %931 = vmatmul.f32.vlgmr.msra.gmra.mxu0 %v3134_v6 }
  0x23   :  { %1206 = vmatpush.msra.mxu3 %v635_v8  ;;  %v697_v14 = vld [vmem:[%s6236_s2 + $0x4f0] sm:$0xff] }
  0x24   :  { %v793_v15 = vld [vmem:[%s6236_s2 + $0x7f0] sm:$0xff] }
  0x25   :  { %8 = vsyncpa [#allocation3], 0  ;;  %1115 = vmatmul.f32.vlgmr.msra.gmra.mxu2 %v3143_v9  ;;  %1207 = vmatmul.f32.vlgmr.msra.gmra.mxu3 %v3146_v10  ;;  %v729_v16 = vld [vmem:[%s6236_s2 + $0x5f0] sm:$0xff]  ;;  %v27_v18 = vld [vmem:[%s6234_s0 + $0x60] sm:$0xff]  ;;  %vm839_vm0 = vcmask 392192   ;;  %vm2756_vm1 = vcmask 556032  }
  0x26   :  { %v25_v17 = vld [vmem:[%s6234_s0 + $0x50] sm:$0xff]  ;;  %1467 = vmatpush.msrb.mxu2 %v761_v11  ;;  %1022 = vmatpush.msra.mxu1 %v571_v12  ;;  %v28_v19 = vld [vmem:[%s6234_s0 + $0x68] sm:$0xff]  ;;  %v759_v20 = vld [vmem:[%s6236_s2 + $0x6e0] sm:$0xff]  ;;  %v3204_v28 = vmul.f32 %v3106_v60, %v27_v18  ;;  %s2812_s25 = sshll.u32 %s6237_s3, 4  ;;  %s2905_s26 = smov 256   ;;  %s2813_s25 = int_to_ptr.hbm [resolvable:$true] %s2812_s25 }
  0x27   :  { %v695_v21 = vld [vmem:[%s6236_s2 + $0x4e0] sm:$0xff]  ;;  %1023 = vmatmul.f32.vlgmr.msra.gmra.mxu1 %v3155_v13  ;;  %1283 = vmatpush.msrb.mxu0 %v697_v14  ;;  %v3192_v24 = vmul.f32 %v3095_v56, %v25_v17  ;;  %v26_v25 = vld [vmem:[%s6234_s0 + $0x58] sm:$0xff]  ;;  %v757_v26 = vld [vmem:[%s6236_s2 + $0x6d0] sm:$0xff]  ;;  %v3207_v29 = vmul.f32 %v3108_v61, %v28_v19  ;;  %s2906_s27 = smov 16  }
  0x28   :  { %v791_v22 = vld [vmem:[%s6236_s2 + $0x7e0] sm:$0xff]  ;;  %1559 = vmatpush.msrb.mxu3 %v793_v15  ;;  %1375 = vmatpush.msrb.mxu1 %v729_v16  ;;  %v693_v27 = vld [vmem:[%s6236_s2 + $0x4d0] sm:$0xff]  ;;  %6444 = vst [vmem:[#allocation7_spill] sm:$0xff] %v3204_v28  ;;  %v3213_v31 = vmul.f32 %v3125_v3, %v26_v25  ;;  %v38_v38 = vld [vmem:[%s6234_s0 + $0xb8] sm:$0xff] }
  0x29   :  { %v727_v23 = vld [vmem:[%s6236_s2 + $0x5e0] sm:$0xff]  ;;  %6445 = vst [vmem:[#allocation8_spill] sm:$0xff] %v3207_v29  ;;  %1468 = vmatpush.msrb.mxu2 %v759_v20  ;;  %1284 = vmatpush.msrb.mxu0 %v695_v21  ;;  %v789_v30 = vld [vmem:[%s6236_s2 + $0x7d0] sm:$0xff]  ;;  %v36_v41 = vld [vmem:[%s6234_s0 + $0xa8] sm:$0xff]  ;;  %v3253_v43 = vmul.f32 %v3108_v61, %v38_v38 }
  0x2a   :  { %1560 = vmatpush.msrb.mxu3 %v791_v22  ;;  %1376 = vmatpush.msrb.mxu1 %v727_v23  ;;  %v725_v32 = vld [vmem:[%s6236_s2 + $0x5d0] sm:$0xff]  ;;  %v755_v33 = vld [vmem:[%s6236_s2 + $0x6c0] sm:$0xff]  ;;  %v3256_v44 = vmul.f32 %v3125_v3, %v36_v41  ;;  %v48_v47 = vld [vmem:[%s6234_s0 + $0x108] sm:$0xff] }
  0x2b   :  { %1469 = vmatpush.msrb.mxu2 %v757_v26  ;;  %1285 = vmatpush.msrb.mxu0 %v693_v27  ;;  %v35_v34 = vld [vmem:[%s6234_s0 + $0xa0] sm:$0xff]  ;;  %v37_v37 = vld [vmem:[%s6234_s0 + $0xb0] sm:$0xff]  ;;  %6447 = vst [vmem:[#allocation10_spill] sm:$0xff] %v3253_v43  ;;  %v46_v52 = vld [vmem:[%s6234_s0 + $0xf8] sm:$0xff]  ;;  %v3293_v55 = vmul.f32 %v3108_v61, %v48_v47 }
  0x2c   :  { %934 = vmatmul.f32.gmra.mxu0 %v3192_v24  ;;  %1561 = vmatpush.msrb.mxu3 %v789_v30  ;;  %v691_v35 = vld [vmem:[%s6236_s2 + $0x4c0] sm:$0xff]  ;;  %v3244_v40 = vmul.f32 %v3095_v56, %v35_v34  ;;  %v3250_v42 = vmul.f32 %v3106_v60, %v37_v37  ;;  %v45_v45 = vld [vmem:[%s6234_s0 + $0xf0] sm:$0xff]  ;;  %v3296_v57 = vmul.f32 %v3125_v3, %v46_v52  ;;  %v58_v62 = vld [vmem:[%s6234_s0 + $0x158] sm:$0xff] }
  0x2d   :  { %1118 = vmatmul.f32.gmra.mxu2 %v3204_v28  ;;  %1210 = vmatmul.f32.gmra.mxu3 %v3207_v29  ;;  %v787_v36 = vld [vmem:[%s6236_s2 + $0x7c0] sm:$0xff]  ;;  %v753_v48 = vld [vmem:[%s6236_s2 + $0x6b0] sm:$0xff]  ;;  %v3281_v51 = vmul.f32 %v3095_v56, %v45_v45  ;;  %6449 = vst [vmem:[#allocation12_spill] sm:$0xff] %v3293_v55  ;;  %v56_v1 = vld [vmem:[%s6234_s0 + $0x148] sm:$0xff]  ;;  %v3324_v4 = vmul.f32 %v3108_v61, %v58_v62 }
  0x2e   :  { %1377 = vmatpush.msrb.mxu1 %v725_v32  ;;  %1470 = vmatpush.msrb.mxu2 %v755_v33  ;;  %v723_v39 = vld [vmem:[%s6236_s2 + $0x5c0] sm:$0xff]  ;;  %6446 = vst [vmem:[#allocation9_spill] sm:$0xff] %v3250_v42  ;;  %v689_v49 = vld [vmem:[%s6236_s2 + $0x4b0] sm:$0xff]  ;;  %v3327_v5 = vmul.f32 %v3125_v3, %v56_v1  ;;  %v68_v14 = vld [vmem:[%s6234_s0 + $0x1a8] sm:$0xff] }
  0x2f   :  { %1026 = vmatmul.f32.gmra.mxu1 %v3213_v31  ;;  %1286 = vmatpush.msrb.mxu0 %v691_v35  ;;  %v47_v46 = vld [vmem:[%s6234_s0 + $0x100] sm:$0xff]  ;;  %v785_v50 = vld [vmem:[%s6236_s2 + $0x7b0] sm:$0xff]  ;;  %6451 = vst [vmem:[#allocation14_spill] sm:$0xff] %v3324_v4  ;;  %v66_v17 = vld [vmem:[%s6234_s0 + $0x198] sm:$0xff]  ;;  %v3361_v19 = vmul.f32 %v3108_v61, %v68_v14 }
  0x30   :  { %1562 = vmatpush.msrb.mxu3 %v787_v36  ;;  %1378 = vmatpush.msrb.mxu1 %v723_v39  ;;  %v721_v53 = vld [vmem:[%s6236_s2 + $0x5b0] sm:$0xff]  ;;  %v3290_v54 = vmul.f32 %v3106_v60, %v47_v46  ;;  %v55_v58 = vld [vmem:[%s6234_s0 + $0x140] sm:$0xff]  ;;  %v3364_v20 = vmul.f32 %v3125_v3, %v66_v17  ;;  %v78_v23 = vld [vmem:[%s6234_s0 + $0x1f8] sm:$0xff] }
  0x31   :  { %1471 = vmatpush.msrb.mxu2 %v753_v48  ;;  %1287 = vmatpush.msrb.mxu0 %v689_v49  ;;  %v57_v59 = vld [vmem:[%s6234_s0 + $0x150] sm:$0xff]  ;;  %v751_v63 = vld [vmem:[%s6236_s2 + $0x6a0] sm:$0xff]  ;;  %v3315_v0 = vmul.f32 %v3095_v56, %v55_v58  ;;  %6453 = vst [vmem:[#allocation16_spill] sm:$0xff] %v3361_v19  ;;  %v76_v32 = vld [vmem:[%s6234_s0 + $0x1e8] sm:$0xff]  ;;  %v3401_v35 = vmul.f32 %v3108_v61, %v78_v23 }
  0x32   :  { %6448 = vst [vmem:[#allocation11_spill] sm:$0xff] %v3290_v54  ;;  %1563 = vmatpush.msrb.mxu3 %v785_v50  ;;  %1379 = vmatpush.msrb.mxu1 %v721_v53  ;;  %v3321_v2 = vmul.f32 %v3106_v60, %v57_v59  ;;  %v65_v7 = vld [vmem:[%s6234_s0 + $0x190] sm:$0xff]  ;;  %v687_v8 = vld [vmem:[%s6236_s2 + $0x4a0] sm:$0xff]  ;;  %v3404_v36 = vmul.f32 %v3125_v3, %v76_v32  ;;  %v88_v39 = vld [vmem:[%s6234_s0 + $0x248] sm:$0xff] }
  0x33   :  { %1472 = vmatpush.msrb.mxu2 %v751_v63  ;;  %v783_v11 = vld [vmem:[%s6236_s2 + $0x7a0] sm:$0xff]  ;;  %1288 = vmatpush.msrb.mxu0 %v687_v8  ;;  %v3352_v16 = vmul.f32 %v3095_v56, %v65_v7  ;;  %v77_v22 = vld [vmem:[%s6234_s0 + $0x1f0] sm:$0xff]  ;;  %6455 = vst [vmem:[#allocation18_spill] sm:$0xff] %v3401_v35  ;;  %v86_v45 = vld [vmem:[%s6234_s0 + $0x238] sm:$0xff]  ;;  %v3429_v47 = vmul.f32 %v3108_v61, %v88_v39 }
  0x34   :  { %937 = vmatmul.f32.gmra.mxu0 %v3244_v40  ;;  %6450 = vst [vmem:[#allocation13_spill] sm:$0xff] %v3321_v2  ;;  %v67_v12 = vld [vmem:[%s6234_s0 + $0x1a0] sm:$0xff]  ;;  %1564 = vmatpush.msrb.mxu3 %v783_v11  ;;  %v749_v25 = vld [vmem:[%s6236_s2 + $0x690] sm:$0xff]  ;;  %v3398_v34 = vmul.f32 %v3106_v60, %v77_v22  ;;  %v3432_v48 = vmul.f32 %v3125_v3, %v86_v45  ;;  %v98_v53 = vld [vmem:[%s6234_s0 + $0x298] sm:$0xff] }
  0x35   :  { %1121 = vmatmul.f32.gmra.mxu2 %v3250_v42  ;;  %1213 = vmatmul.f32.gmra.mxu3 %v3253_v43  ;;  %v719_v15 = vld [vmem:[%s6236_s2 + $0x5a0] sm:$0xff]  ;;  %v3358_v18 = vmul.f32 %v3106_v60, %v67_v12  ;;  %v685_v26 = vld [vmem:[%s6236_s2 + $0x490] sm:$0xff]  ;;  %6457 = vst [vmem:[#allocation20_spill] sm:$0xff] %v3429_v47  ;;  %v96_v1 = vld [vmem:[%s6234_s0 + $0x288] sm:$0xff]  ;;  %v3469_v8 = vmul.f32 %v3108_v61, %v98_v53 }
  0x36   :  { %1380 = vmatpush.msrb.mxu1 %v719_v15  ;;  %v75_v21 = vld [vmem:[%s6234_s0 + $0x1e0] sm:$0xff]  ;;  %v781_v27 = vld [vmem:[%s6236_s2 + $0x790] sm:$0xff]  ;;  %1473 = vmatpush.msrb.mxu2 %v749_v25  ;;  %6454 = vst [vmem:[#allocation17_spill] sm:$0xff] %v3398_v34  ;;  %v3472_v11 = vmul.f32 %v3125_v3, %v96_v1  ;;  %v108_v15 = vld [vmem:[%s6234_s0 + $0x2e8] sm:$0xff] }
  0x37   :  { %1029 = vmatmul.f32.gmra.mxu1 %v3256_v44  ;;  %6452 = vst [vmem:[#allocation15_spill] sm:$0xff] %v3358_v18  ;;  %v3389_v30 = vmul.f32 %v3095_v56, %v75_v21  ;;  %1289 = vmatpush.msrb.mxu0 %v685_v26  ;;  %v717_v33 = vld [vmem:[%s6236_s2 + $0x590] sm:$0xff]  ;;  %v87_v38 = vld [vmem:[%s6234_s0 + $0x240] sm:$0xff]  ;;  %v106_v25 = vld [vmem:[%s6234_s0 + $0x2d8] sm:$0xff] }
  0x38   :  { %1565 = vmatpush.msrb.mxu3 %v781_v27  ;;  %1381 = vmatpush.msrb.mxu1 %v717_v33  ;;  %v85_v37 = vld [vmem:[%s6234_s0 + $0x230] sm:$0xff]  ;;  %v3426_v46 = vmul.f32 %v3106_v60, %v87_v38  ;;  %v95_v49 = vld [vmem:[%s6234_s0 + $0x280] sm:$0xff]  ;;  %6459 = vst [vmem:[#allocation22_spill] sm:$0xff] %v3469_v8  ;;  %v3506_v27 = vmul.f32 %v3108_v61, %v108_v15  ;;  %v118_v39 = vld [vmem:[%s6234_s0 + $0x338] sm:$0xff] }
  0x39   :  { %v3420_v41 = vmul.f32 %v3095_v56, %v85_v37  ;;  %v747_v50 = vld [vmem:[%s6236_s2 + $0x680] sm:$0xff]  ;;  %v97_v52 = vld [vmem:[%s6234_s0 + $0x290] sm:$0xff]  ;;  %v3460_v63 = vmul.f32 %v3095_v56, %v95_v49  ;;  %v3509_v32 = vmul.f32 %v3125_v3, %v106_v25  ;;  %v116_v49 = vld [vmem:[%s6234_s0 + $0x328] sm:$0xff] }
  0x3a   :  { %6456 = vst [vmem:[#allocation19_spill] sm:$0xff] %v3426_v46  ;;  %1474 = vmatpush.msrb.mxu2 %v747_v50  ;;  %v683_v58 = vld [vmem:[%s6236_s2 + $0x480] sm:$0xff]  ;;  %v3466_v7 = vmul.f32 %v3106_v60, %v97_v52  ;;  %v105_v12 = vld [vmem:[%s6234_s0 + $0x2d0] sm:$0xff]  ;;  %v3537_v52 = vmul.f32 %v3108_v61, %v118_v39  ;;  %v3540_v53 = vmul.f32 %v3125_v3, %v116_v49  ;;  %v128_v1 = vld [vmem:[%s6234_s0 + $0x388] sm:$0xff] }
  0x3b   :  { %v779_v59 = vld [vmem:[%s6236_s2 + $0x780] sm:$0xff]  ;;  %1290 = vmatpush.msrb.mxu0 %v683_v58  ;;  %v745_v17 = vld [vmem:[%s6236_s2 + $0x670] sm:$0xff]  ;;  %v3497_v23 = vmul.f32 %v3095_v56, %v105_v12  ;;  %6461 = vst [vmem:[#allocation24_spill] sm:$0xff] %v3506_v27  ;;  %v3577_v25 = vmul.f32 %v3108_v61, %v128_v1  ;;  %v138_v39 = vld [vmem:[%s6234_s0 + $0x3d8] sm:$0xff] }
  0x3c   :  { %940 = vmatmul.f32.gmra.mxu0 %v3281_v51  ;;  %v715_v62 = vld [vmem:[%s6236_s2 + $0x580] sm:$0xff]  ;;  %1566 = vmatpush.msrb.mxu3 %v779_v59  ;;  %6458 = vst [vmem:[#allocation21_spill] sm:$0xff] %v3466_v7  ;;  %v681_v21 = vld [vmem:[%s6236_s2 + $0x470] sm:$0xff]  ;;  %v226_v10 = vld [vmem:[%s6234_s0 + $0x698] sm:$0xff] }
  0x3d   :  { %1124 = vmatmul.f32.gmra.mxu2 %v3290_v54  ;;  %1216 = vmatmul.f32.gmra.mxu3 %v3293_v55  ;;  %v107_v14 = vld [vmem:[%s6234_s0 + $0x2e0] sm:$0xff]  ;;  %v777_v22 = vld [vmem:[%s6236_s2 + $0x770] sm:$0xff]  ;;  %6463 = vst [vmem:[#allocation26_spill] sm:$0xff] %v3537_v52 }
  0x3e   :  { %1382 = vmatpush.msrb.mxu1 %v715_v62  ;;  %1475 = vmatpush.msrb.mxu2 %v745_v17  ;;  %v3503_v26 = vmul.f32 %v3106_v60, %v107_v14  ;;  %v115_v33 = vld [vmem:[%s6234_s0 + $0x320] sm:$0xff]  ;;  %v713_v37 = vld [vmem:[%s6236_s2 + $0x570] sm:$0xff]  ;;  %6465 = vst [vmem:[#allocation28_spill] sm:$0xff] %v3577_v25 }
  0x3f   :  { %1032 = vmatmul.f32.gmra.mxu1 %v3296_v57  ;;  %1291 = vmatpush.msrb.mxu0 %v681_v21  ;;  %v117_v38 = vld [vmem:[%s6234_s0 + $0x330] sm:$0xff]  ;;  %v3528_v45 = vmul.f32 %v3095_v56, %v115_v33  ;;  %v743_v59 = vld [vmem:[%s6236_s2 + $0x660] sm:$0xff]  ;;  %v126_v21 = vld [vmem:[%s6234_s0 + $0x378] sm:$0xff] }
  0x40   :  { %6460 = vst [vmem:[#allocation23_spill] sm:$0xff] %v3503_v26  ;;  %1567 = vmatpush.msrb.mxu3 %v777_v22  ;;  %1383 = vmatpush.msrb.mxu1 %v713_v37  ;;  %v3534_v50 = vmul.f32 %v3106_v60, %v117_v38  ;;  %v125_v58 = vld [vmem:[%s6234_s0 + $0x370] sm:$0xff]  ;;  %v127_v62 = vld [vmem:[%s6234_s0 + $0x380] sm:$0xff]  ;;  %v3580_v33 = vmul.f32 %v3125_v3, %v126_v21 }
  0x41   :  { %1476 = vmatpush.msrb.mxu2 %v743_v59  ;;  %v679_v12 = vld [vmem:[%s6236_s2 + $0x460] sm:$0xff]  ;;  %v3568_v17 = vmul.f32 %v3095_v56, %v125_v58  ;;  %v3574_v22 = vmul.f32 %v3106_v60, %v127_v62  ;;  %v137_v38 = vld [vmem:[%s6234_s0 + $0x3d0] sm:$0xff]  ;;  %v136_v58 = vld [vmem:[%s6234_s0 + $0x3c8] sm:$0xff]  ;;  %v3605_v62 = vmul.f32 %v3108_v61, %v138_v39 }
  0x42   :  { %6462 = vst [vmem:[#allocation25_spill] sm:$0xff] %v3534_v50  ;;  %v775_v14 = vld [vmem:[%s6236_s2 + $0x760] sm:$0xff]  ;;  %1292 = vmatpush.msrb.mxu0 %v679_v12  ;;  %v3602_v59 = vmul.f32 %v3106_v60, %v137_v38  ;;  %v741_v1 = vld [vmem:[%s6236_s2 + $0x650] sm:$0xff]  ;;  %v3611_v12 = vmul.f32 %v3125_v3, %v136_v58  ;;  %v148_v39 = vld [vmem:[%s6234_s0 + $0x428] sm:$0xff] }
  0x43   :  { %v711_v15 = vld [vmem:[%s6236_s2 + $0x560] sm:$0xff]  ;;  %1568 = vmatpush.msrb.mxu3 %v775_v14  ;;  %6464 = vst [vmem:[#allocation27_spill] sm:$0xff] %v3574_v22  ;;  %1477 = vmatpush.msrb.mxu2 %v741_v1  ;;  %v145_v14 = vld [vmem:[%s6234_s0 + $0x410] sm:$0xff]  ;;  %v146_v1 = vld [vmem:[%s6234_s0 + $0x418] sm:$0xff] }
  0x44   :  { %943 = vmatmul.f32.gmra.mxu0 %v3315_v0  ;;  %1384 = vmatpush.msrb.mxu1 %v711_v15  ;;  %6466 = vst [vmem:[#allocation29_spill] sm:$0xff] %v3580_v33  ;;  %v135_v37 = vld [vmem:[%s6234_s0 + $0x3c0] sm:$0xff]  ;;  %v677_v15 = vld [vmem:[%s6236_s2 + $0x450] sm:$0xff]  ;;  %v3636_v58 = vmul.f32 %v3095_v56, %v145_v14 }
  0x45   :  { %1127 = vmatmul.f32.gmra.mxu2 %v3321_v2  ;;  %1219 = vmatmul.f32.gmra.mxu3 %v3324_v4  ;;  %v3596_v49 = vmul.f32 %v3095_v56, %v135_v37  ;;  %6468 = vst [vmem:[#allocation31_spill] sm:$0xff] %v3602_v59  ;;  %v773_v21 = vld [vmem:[%s6236_s2 + $0x750] sm:$0xff]  ;;  %v147_v38 = vld [vmem:[%s6234_s0 + $0x420] sm:$0xff] }
  0x46   :  { %6469 = vst [vmem:[#allocation32_spill] sm:$0xff] %v3605_v62  ;;  %v709_v37 = vld [vmem:[%s6236_s2 + $0x550] sm:$0xff]  ;;  %1293 = vmatpush.msrb.mxu0 %v677_v15  ;;  %1569 = vmatpush.msrb.mxu3 %v773_v21  ;;  %v155_v14 = vld [vmem:[%s6234_s0 + $0x460] sm:$0xff]  ;;  %v158_v21 = vld [vmem:[%s6234_s0 + $0x478] sm:$0xff] }
  0x47   :  { %1035 = vmatmul.f32.gmra.mxu1 %v3327_v5  ;;  %6467 = vst [vmem:[#allocation30_spill] sm:$0xff] %v3596_v49  ;;  %v157_v15 = vld [vmem:[%s6234_s0 + $0x470] sm:$0xff] }
  0x48   :  { %6470 = vst [vmem:[#allocation33_spill] sm:$0xff] %v3611_v12  ;;  %1385 = vmatpush.msrb.mxu1 %v709_v37  ;;  %v739_v37 = vld [vmem:[%s6236_s2 + $0x640] sm:$0xff] }
  0x49   :  { %6471 = vst [vmem:[#allocation34_spill] sm:$0xff] %v3636_v58  ;;  %1478 = vmatpush.msrb.mxu2 %v739_v37  ;;  %v707_v37 = vld [vmem:[%s6236_s2 + $0x540] sm:$0xff] }
  0x4a   :  { %1386 = vmatpush.msrb.mxu1 %v707_v37  ;;  %v175_v37 = vld [vmem:[%s6234_s0 + $0x500] sm:$0xff] }
  0x4c   :  { %946 = vmatmul.f32.gmra.mxu0 %v3352_v16 }
  0x4d   :  { %1130 = vmatmul.f32.gmra.mxu2 %v3358_v18  ;;  %1222 = vmatmul.f32.gmra.mxu3 %v3361_v19  ;;  %v196_v18 = vld [vmem:[%s6234_s0 + $0x5a8] sm:$0xff] }
  0x4f   :  { %1038 = vmatmul.f32.gmra.mxu1 %v3364_v20 }
  0x54   :  { %949 = vmatmul.f32.gmra.mxu0 %v3389_v30 }
  0x55   :  { %1133 = vmatmul.f32.gmra.mxu2 %v3398_v34  ;;  %1225 = vmatmul.f32.gmra.mxu3 %v3401_v35 }
  0x57   :  { %1041 = vmatmul.f32.gmra.mxu1 %v3404_v36 }
  0x5c   :  { %952 = vmatmul.f32.gmra.mxu0 %v3420_v41 }
  0x5d   :  { %1136 = vmatmul.f32.gmra.mxu2 %v3426_v46  ;;  %1228 = vmatmul.f32.gmra.mxu3 %v3429_v47 }
  0x5f   :  { %1044 = vmatmul.f32.gmra.mxu1 %v3432_v48 }
  0x64   :  { %955 = vmatmul.f32.gmra.mxu0 %v3460_v63 }
  0x65   :  { %1139 = vmatmul.f32.gmra.mxu2 %v3466_v7  ;;  %1231 = vmatmul.f32.gmra.mxu3 %v3469_v8 }
  0x67   :  { %1047 = vmatmul.f32.gmra.mxu1 %v3472_v11 }
  0x6c   :  { %958 = vmatmul.f32.gmra.mxu0 %v3497_v23 }
  0x6d   :  { %1142 = vmatmul.f32.gmra.mxu2 %v3503_v26  ;;  %1234 = vmatmul.f32.gmra.mxu3 %v3506_v27 }
  0x6f   :  { %1050 = vmatmul.f32.gmra.mxu1 %v3509_v32 }
  0x74   :  { %961 = vmatmul.f32.gmra.mxu0 %v3528_v45 }
  0x75   :  { %1145 = vmatmul.f32.gmra.mxu2 %v3534_v50  ;;  %1237 = vmatmul.f32.gmra.mxu3 %v3537_v52 }
  0x77   :  { %1053 = vmatmul.f32.gmra.mxu1 %v3540_v53 }
  0x7c   :  { %964 = vmatmul.f32.gmra.mxu0 %v3568_v17 }
  0x7d   :  { %1148 = vmatmul.f32.gmra.mxu2 %v3574_v22  ;;  %1240 = vmatmul.f32.gmra.mxu3 %v3577_v25  ;;  %v3648_v25 = vmul.f32 %v3125_v3, %v146_v1  ;;  %v3673_v1 = vmul.f32 %v3106_v60, %v157_v15  ;;  %v675_v22 = vld [vmem:[%s6236_s2 + $0x440] sm:$0xff]  ;;  %v165_v15 = vld [vmem:[%s6234_s0 + $0x4b0] sm:$0xff] }
  0x7e   :  { %1294 = vmatpush.msrb.mxu0 %v675_v22  ;;  %v737_v22 = vld [vmem:[%s6236_s2 + $0x630] sm:$0xff] }
  0x7f   :  { %1056 = vmatmul.f32.gmra.mxu1 %v3580_v33  ;;  %6474 = vst [vmem:[#allocation37_spill] sm:$0xff] %v3648_v25  ;;  %1479 = vmatpush.msrb.mxu2 %v737_v22  ;;  %v705_v22 = vld [vmem:[%s6236_s2 + $0x530] sm:$0xff] }
  0x80   :  { %6476 = vst [vmem:[#allocation39_spill] sm:$0xff] %v3673_v1  ;;  %1387 = vmatpush.msrb.mxu1 %v705_v22 }
  0x84   :  { %967 = vmatmul.f32.gmra.mxu0 %v3596_v49 }
  0x85   :  { %1151 = vmatmul.f32.gmra.mxu2 %v3602_v59  ;;  %1243 = vmatmul.f32.gmra.mxu3 %v3605_v62  ;;  %v3642_v62 = vmul.f32 %v3106_v60, %v147_v38  ;;  %v3645_v59 = vmul.f32 %v3108_v61, %v148_v39  ;;  %v3667_v38 = vmul.f32 %v3095_v56, %v155_v14  ;;  %v156_v39 = vld [vmem:[%s6234_s0 + $0x468] sm:$0xff]  ;;  %v771_v14 = vld [vmem:[%s6236_s2 + $0x740] sm:$0xff] }
  0x86   :  { %1570 = vmatpush.msrb.mxu3 %v771_v14  ;;  %v3704_v14 = vmul.f32 %v3095_v56, %v165_v15  ;;  %v769_v15 = vld [vmem:[%s6236_s2 + $0x730] sm:$0xff] }
  0x87   :  { %1059 = vmatmul.f32.gmra.mxu1 %v3611_v12  ;;  %6472 = vst [vmem:[#allocation35_spill] sm:$0xff] %v3642_v62 }
  0x88   :  { %6473 = vst [vmem:[#allocation36_spill] sm:$0xff] %v3645_v59  ;;  %1571 = vmatpush.msrb.mxu3 %v769_v15 }
  0x89   :  { %6475 = vst [vmem:[#allocation38_spill] sm:$0xff] %v3667_v38 }
  0x8a   :  { %6479 = vst [vmem:[#allocation42_spill] sm:$0xff] %v3704_v14 }
  0x8c   :  { %970 = vmatmul.f32.gmra.mxu0 %v3636_v58 }
  0x8d   :  { %1154 = vmatmul.f32.gmra.mxu2 %v3642_v62  ;;  %1246 = vmatmul.f32.gmra.mxu3 %v3645_v59  ;;  %v3676_v59 = vmul.f32 %v3108_v61, %v158_v21  ;;  %v3679_v62 = vmul.f32 %v3125_v3, %v156_v39  ;;  %v167_v21 = vld [vmem:[%s6234_s0 + $0x4c0] sm:$0xff]  ;;  %v168_v39 = vld [vmem:[%s6234_s0 + $0x4c8] sm:$0xff] }
  0x8e   :  { %v3713_v52 = vmul.f32 %v3108_v61, %v168_v39  ;;  %v178_v39 = vld [vmem:[%s6234_s0 + $0x518] sm:$0xff] }
  0x8f   :  { %1062 = vmatmul.f32.gmra.mxu1 %v3648_v25  ;;  %6477 = vst [vmem:[#allocation40_spill] sm:$0xff] %v3676_v59 }
  0x90   :  { %6478 = vst [vmem:[#allocation41_spill] sm:$0xff] %v3679_v62 }
  0x91   :  { %6481 = vst [vmem:[#allocation44_spill] sm:$0xff] %v3713_v52 }
  0x94   :  { %973 = vmatmul.f32.gmra.mxu0 %v3667_v38 }
  0x95   :  { %1157 = vmatmul.f32.gmra.mxu2 %v3673_v1  ;;  %1249 = vmatmul.f32.gmra.mxu3 %v3676_v59  ;;  %v166_v59 = vld [vmem:[%s6234_s0 + $0x4b8] sm:$0xff]  ;;  %v3710_v1 = vmul.f32 %v3106_v60, %v167_v21  ;;  %v177_v21 = vld [vmem:[%s6234_s0 + $0x510] sm:$0xff] }
  0x96   :  { %v3716_v50 = vmul.f32 %v3125_v3, %v166_v59  ;;  %v673_v59 = vld [vmem:[%s6236_s2 + $0x430] sm:$0xff]  ;;  %v3750_v26 = vmul.f32 %v3106_v60, %v177_v21  ;;  %v187_v21 = vld [vmem:[%s6234_s0 + $0x560] sm:$0xff] }
  0x97   :  { %1065 = vmatmul.f32.gmra.mxu1 %v3679_v62  ;;  %6480 = vst [vmem:[#allocation43_spill] sm:$0xff] %v3710_v1  ;;  %1295 = vmatpush.msrb.mxu0 %v673_v59  ;;  %v3753_v59 = vmul.f32 %v3108_v61, %v178_v39  ;;  %v3778_v35 = vmul.f32 %v3106_v60, %v187_v21  ;;  %v767_v21 = vld [vmem:[%s6236_s2 + $0x720] sm:$0xff] }
  0x98   :  { %6482 = vst [vmem:[#allocation45_spill] sm:$0xff] %v3716_v50  ;;  %1572 = vmatpush.msrb.mxu3 %v767_v21  ;;  %v3828_v21 = vmul.f32 %v3125_v3, %v196_v18  ;;  %v765_v18 = vld [vmem:[%s6236_s2 + $0x710] sm:$0xff] }
  0x99   :  { %6484 = vst [vmem:[#allocation47_spill] sm:$0xff] %v3750_v26 }
  0x9a   :  { %6485 = vst [vmem:[#allocation48_spill] sm:$0xff] %v3753_v59  ;;  %1573 = vmatpush.msrb.mxu3 %v765_v18  ;;  %v218_v18 = vld [vmem:[%s6234_s0 + $0x658] sm:$0xff] }
  0x9b   :  { %6488 = vst [vmem:[#allocation51_spill] sm:$0xff] %v3778_v35  ;;  %v3895_v29 = vmul.f32 %v3108_v61, %v218_v18  ;;  %v225_v18 = vld [vmem:[%s6234_s0 + $0x690] sm:$0xff] }
  0x9c   :  { %976 = vmatmul.f32.gmra.mxu0 %v3704_v14  ;;  %6494 = vst [vmem:[#allocation57_spill] sm:$0xff] %v3828_v21  ;;  %v3928_v28 = vmul.f32 %v3095_v56, %v225_v18  ;;  %v570_v18 = vld [vmem:[%s6236_s2 + $0xf8] sm:$0xff] }
  0x9d   :  { %1160 = vmatmul.f32.gmra.mxu2 %v3710_v1  ;;  %1252 = vmatmul.f32.gmra.mxu3 %v3713_v52  ;;  %v3744_v52 = vmul.f32 %v3095_v56, %v175_v37  ;;  %v176_v1 = vld [vmem:[%s6234_s0 + $0x508] sm:$0xff]  ;;  %v185_v37 = vld [vmem:[%s6234_s0 + $0x550] sm:$0xff]  ;;  %6501 = vst [vmem:[#allocation64_spill] sm:$0xff] %v3895_v29 }
  0x9e   :  { %v3756_v15 = vmul.f32 %v3125_v3, %v176_v1  ;;  %v188_v1 = vld [vmem:[%s6234_s0 + $0x568] sm:$0xff]  ;;  %6503 = vst [vmem:[#allocation66_spill] sm:$0xff] %v3928_v28 }
  0x9f   :  { %1068 = vmatmul.f32.gmra.mxu1 %v3716_v50  ;;  %6483 = vst [vmem:[#allocation46_spill] sm:$0xff] %v3744_v52  ;;  %v932_v27 = vpop.f32.mrf.mxu0  ;;  %v3781_v34 = vmul.f32 %v3108_v61, %v188_v1  ;;  %v198_v1 = vld [vmem:[%s6234_s0 + $0x5b8] sm:$0xff] }
  0xa0   :  { %6486 = vst [vmem:[#allocation49_spill] sm:$0xff] %v3756_v15 }
  0xa1   :  { %6489 = vst [vmem:[#allocation52_spill] sm:$0xff] %v3781_v34 }
  0xa4   :  { %v1024_v8 = vpop.f32.mrf.mxu1  ;;  %979 = vmatmul.f32.gmra.mxu0 %v3744_v52 }
  0xa5   :  { %1163 = vmatmul.f32.gmra.mxu2 %v3750_v26  ;;  %1255 = vmatmul.f32.gmra.mxu3 %v3753_v59  ;;  %v1025_v39 = vadd.f32 %v1024_v8, %v932_v27  ;;  %v3772_v26 = vmul.f32 %v3095_v56, %v185_v37  ;;  %v186_v59 = vld [vmem:[%s6234_s0 + $0x558] sm:$0xff]  ;;  %v735_v37 = vld [vmem:[%s6236_s2 + $0x620] sm:$0xff] }
  0xa6   :  { %v3786_v27 = vmul.f32 %v3125_v3, %v186_v59  ;;  %1480 = vmatpush.msrb.mxu2 %v735_v37  ;;  %v197_v59 = vld [vmem:[%s6234_s0 + $0x5b0] sm:$0xff] }
  0xa7   :  { %1071 = vmatmul.f32.gmra.mxu1 %v3756_v15  ;;  %6487 = vst [vmem:[#allocation50_spill] sm:$0xff] %v3772_v26  ;;  %v3820_v55 = vmul.f32 %v3106_v60, %v197_v59 }
  0xa8   :  { %v1116_v22 = vpop.f32.mrf.mxu2  ;;  %v1208_v7 = vpop.f32.mrf.mxu3  ;;  %6490 = vst [vmem:[#allocation53_spill] sm:$0xff] %v3786_v27 }
  0xa9   :  { %v1117_v47 = vadd.f32 %v1116_v22, %v1025_v39  ;;  %v935_v46 = vpop.f32.mrf.mxu0  ;;  %v671_v39 = vld [vmem:[%s6236_s2 + $0x420] sm:$0xff]  ;;  %6492 = vst [vmem:[#allocation55_spill] sm:$0xff] %v3820_v55 }
  0xaa   :  { %1296 = vmatpush.msrb.mxu0 %v671_v39  ;;  %v3823_v39 = vmul.f32 %v3108_v61, %v198_v1 }
  0xab   :  { %v3783_v8 = vadd.f32 %v1208_v7, %v1117_v47  ;;  %v195_v47 = vld [vmem:[%s6234_s0 + $0x5a0] sm:$0xff] }
  0xac   :  { %v1027_v22 = vpop.f32.mrf.mxu1  ;;  %982 = vmatmul.f32.gmra.mxu0 %v3772_v26  ;;  %v703_v7 = vld [vmem:[%s6236_s2 + $0x520] sm:$0xff]  ;;  %v3814_v19 = vmul.f32 %v3095_v56, %v195_v47  ;;  %6493 = vst [vmem:[#allocation56_spill] sm:$0xff] %v3823_v39  ;;  %v205_v47 = vld [vmem:[%s6234_s0 + $0x5f0] sm:$0xff] }
  0xad   :  { %1166 = vmatmul.f32.gmra.mxu2 %v3778_v35  ;;  %1258 = vmatmul.f32.gmra.mxu3 %v3781_v34  ;;  %v1028_v37 = vadd.f32 %v1027_v22, %v935_v46 }
  0xae   :  { %6491 = vst [vmem:[#allocation54_spill] sm:$0xff] %v3814_v19  ;;  %1388 = vmatpush.msrb.mxu1 %v703_v7  ;;  %v208_v7 = vld [vmem:[%s6234_s0 + $0x608] sm:$0xff] }
  0xaf   :  { %1074 = vmatmul.f32.gmra.mxu1 %v3786_v27 }
  0xb0   :  { %v1119_v34 = vpop.f32.mrf.mxu2  ;;  %v1211_v35 = vpop.f32.mrf.mxu3 }
  0xb1   :  { %v1120_v4 = vadd.f32 %v1119_v34, %v1028_v37  ;;  %v938_v2 = vpop.f32.mrf.mxu0  ;;  %v733_v34 = vld [vmem:[%s6236_s2 + $0x610] sm:$0xff] }
  0xb2   :  { %1481 = vmatpush.msrb.mxu2 %v733_v34  ;;  %v3862_v34 = vmul.f32 %v3108_v61, %v208_v7 }
  0xb3   :  { %v3825_v46 = vadd.f32 %v1211_v35, %v1120_v4  ;;  %v669_v4 = vld [vmem:[%s6236_s2 + $0x410] sm:$0xff]  ;;  %v207_v35 = vld [vmem:[%s6234_s0 + $0x600] sm:$0xff] }
  0xb4   :  { %v1030_v22 = vpop.f32.mrf.mxu1  ;;  %985 = vmatmul.f32.gmra.mxu0 %v3814_v19  ;;  %v3859_v42 = vmul.f32 %v3106_v60, %v207_v35  ;;  %6497 = vst [vmem:[#allocation60_spill] sm:$0xff] %v3862_v34 }
  0xb5   :  { %1169 = vmatmul.f32.gmra.mxu2 %v3820_v55  ;;  %1261 = vmatmul.f32.gmra.mxu3 %v3823_v39  ;;  %v1031_v59 = vadd.f32 %v1030_v22, %v938_v2  ;;  %v3853_v39 = vmul.f32 %v3095_v56, %v205_v47  ;;  %v206_v55 = vld [vmem:[%s6234_s0 + $0x5f8] sm:$0xff]  ;;  %v701_v47 = vld [vmem:[%s6236_s2 + $0x510] sm:$0xff] }
  0xb6   :  { %1297 = vmatpush.msrb.mxu0 %v669_v4  ;;  %6496 = vst [vmem:[#allocation59_spill] sm:$0xff] %v3859_v42  ;;  %v3867_v22 = vmul.f32 %v3125_v3, %v206_v55  ;;  %1389 = vmatpush.msrb.mxu1 %v701_v47  ;;  %v217_v55 = vld [vmem:[%s6234_s0 + $0x650] sm:$0xff] }
  0xb7   :  { %1077 = vmatmul.f32.gmra.mxu1 %v3828_v21  ;;  %6495 = vst [vmem:[#allocation58_spill] sm:$0xff] %v3853_v39 }
  0xb8   :  { %v1122_v1 = vpop.f32.mrf.mxu2  ;;  %v1214_v37 = vpop.f32.mrf.mxu3  ;;  %6498 = vst [vmem:[#allocation61_spill] sm:$0xff] %v3867_v22 }
  0xb9   :  { %v1123_v54 = vadd.f32 %v1122_v1, %v1031_v59  ;;  %v941_v43 = vpop.f32.mrf.mxu0 }
  0xbb   :  { %v3864_v2 = vadd.f32 %v1214_v37, %v1123_v54  ;;  %v215_v54 = vld [vmem:[%s6234_s0 + $0x640] sm:$0xff]  ;;  %v216_v37 = vld [vmem:[%s6234_s0 + $0x648] sm:$0xff] }
  0xbc   :  { %v1033_v4 = vpop.f32.mrf.mxu1  ;;  %988 = vmatmul.f32.gmra.mxu0 %v3853_v39  ;;  %v3886_v1 = vmul.f32 %v3095_v56, %v215_v54  ;;  %v731_v54 = vld [vmem:[%s6236_s2 + $0x600] sm:$0xff] }
  0xbd   :  { %1172 = vmatmul.f32.gmra.mxu2 %v3859_v42  ;;  %1264 = vmatmul.f32.gmra.mxu3 %v3862_v34  ;;  %v1034_v35 = vadd.f32 %v1033_v4, %v941_v43  ;;  %v3892_v42 = vmul.f32 %v3106_v60, %v217_v55  ;;  %v3900_v4 = vmul.f32 %v3125_v3, %v216_v37  ;;  %v763_v55 = vld [vmem:[%s6236_s2 + $0x700] sm:$0xff] }
  0xbe   :  { %6499 = vst [vmem:[#allocation62_spill] sm:$0xff] %v3886_v1  ;;  %1482 = vmatpush.msrb.mxu2 %v731_v54  ;;  %v227_v37 = vld [vmem:[%s6234_s0 + $0x6a0] sm:$0xff]  ;;  %1574 = vmatpush.msrb.mxu3 %v763_v55  ;;  %v3942_v55 = vmul.f32 %v3125_v3, %v226_v10  ;;  %v238_v10 = vld [vmem:[%s6234_s0 + $0x6f8] sm:$0xff] }
  0xbf   :  { %1080 = vmatmul.f32.gmra.mxu1 %v3867_v22  ;;  %6500 = vst [vmem:[#allocation63_spill] sm:$0xff] %v3892_v42  ;;  %v3934_v22 = vmul.f32 %v3106_v60, %v227_v37  ;;  %v602_v37 = vld [vmem:[%s6236_s2 + $0x1f8] sm:$0xff] }
  0xc0   :  { %v1125_v7 = vpop.f32.mrf.mxu2  ;;  %v1217_v59 = vpop.f32.mrf.mxu3  ;;  %6502 = vst [vmem:[#allocation65_spill] sm:$0xff] %v3900_v4  ;;  %1835 = vmatpush.msra.mxu2 %v570_v18  ;;  %v236_v18 = vld [vmem:[%s6234_s0 + $0x6e8] sm:$0xff]  ;;  %1927 = vmatpush.msra.mxu3 %v602_v37 }
  0xc1   :  { %v1126_v47 = vadd.f32 %v1125_v7, %v1034_v35  ;;  %v944_v34 = vpop.f32.mrf.mxu0  ;;  %v667_v35 = vld [vmem:[%s6236_s2 + $0x400] sm:$0xff]  ;;  %6504 = vst [vmem:[#allocation67_spill] sm:$0xff] %v3934_v22 }
  0xc2   :  { %1298 = vmatpush.msrb.mxu0 %v667_v35  ;;  %6506 = vst [vmem:[#allocation69_spill] sm:$0xff] %v3942_v55 }
  0xc3   :  { %v3897_v43 = vadd.f32 %v1217_v59, %v1126_v47  ;;  %v699_v59 = vld [vmem:[%s6236_s2 + $0x500] sm:$0xff]  ;;  %v228_v47 = vld [vmem:[%s6234_s0 + $0x6a8] sm:$0xff] }
  0xc4   :  { %v1036_v7 = vpop.f32.mrf.mxu1  ;;  %991 = vmatmul.f32.gmra.mxu0 %v3886_v1  ;;  %1390 = vmatpush.msrb.mxu1 %v699_v59  ;;  %v3937_v35 = vmul.f32 %v3108_v61, %v228_v47  ;;  %v825_v59 = vld [vmem:[%s6236_s2 + $0x8f0] sm:$0xff] }
  0xc5   :  { %1175 = vmatmul.f32.gmra.mxu2 %v3892_v42  ;;  %1267 = vmatmul.f32.gmra.mxu3 %v3895_v29  ;;  %v1037_v54 = vadd.f32 %v1036_v7, %v944_v34 }
  0xc6   :  { %6505 = vst [vmem:[#allocation68_spill] sm:$0xff] %v3937_v35  ;;  %1651 = vmatpush.msra.mxu0 %v825_v59 }
  0xc7   :  { %1083 = vmatmul.f32.gmra.mxu1 %v3900_v4  ;;  %v3981_v4 = vmul.f32 %v3125_v3, %v236_v18  ;;  %v246_v18 = vld [vmem:[%s6234_s0 + $0x738] sm:$0xff] }
  0xc8   :  { %v1128_v29 = vpop.f32.mrf.mxu2  ;;  %v1220_v42 = vpop.f32.mrf.mxu3 }
  0xc9   :  { %v1129_v9 = vadd.f32 %v1128_v29, %v1037_v54  ;;  %v947_v1 = vpop.f32.mrf.mxu0  ;;  %v235_v29 = vld [vmem:[%s6234_s0 + $0x6e0] sm:$0xff]  ;;  %6510 = vst [vmem:[#allocation73_spill] sm:$0xff] %v3981_v4 }
  0xcb   :  { %v3939_v34 = vadd.f32 %v1220_v42, %v1129_v9  ;;  %v237_v9 = vld [vmem:[%s6234_s0 + $0x6f0] sm:$0xff] }
  0xcc   :  { %v1039_v7 = vpop.f32.mrf.mxu1  ;;  %994 = vmatmul.f32.gmra.mxu0 %v3928_v28 }
  0xcd   :  { %1178 = vmatmul.f32.gmra.mxu2 %v3934_v22  ;;  %1270 = vmatmul.f32.gmra.mxu3 %v3937_v35  ;;  %v1040_v42 = vadd.f32 %v1039_v7, %v947_v1  ;;  %v3967_v35 = vmul.f32 %v3095_v56, %v235_v29  ;;  %v3973_v22 = vmul.f32 %v3106_v60, %v237_v9  ;;  %v837_v29 = vld [vmem:[%s6236_s2 + $0x950] sm:$0xff] }
  0xce   :  { %1753 = vmatpush.msra.mxu1 %v837_v29  ;;  %v245_v9 = vld [vmem:[%s6234_s0 + $0x730] sm:$0xff] }
  0xcf   :  { %1086 = vmatmul.f32.gmra.mxu1 %v3942_v55  ;;  %6507 = vst [vmem:[#allocation70_spill] sm:$0xff] %v3967_v35  ;;  %v3976_v55 = vmul.f32 %v3108_v61, %v238_v10  ;;  %v247_v10 = vld [vmem:[%s6234_s0 + $0x740] sm:$0xff] }
  0xd0   :  { %v1131_v47 = vpop.f32.mrf.mxu2  ;;  %v1223_v54 = vpop.f32.mrf.mxu3  ;;  %6508 = vst [vmem:[#allocation71_spill] sm:$0xff] %v3973_v22 }
  0xd1   :  { %v1132_v1 = vadd.f32 %v1131_v47, %v1040_v42  ;;  %v950_v7 = vpop.f32.mrf.mxu0  ;;  %6509 = vst [vmem:[#allocation72_spill] sm:$0xff] %v3976_v55  ;;  %v248_v42 = vld [vmem:[%s6234_s0 + $0x748] sm:$0xff] }
  0xd3   :  { %v3978_v28 = vadd.f32 %v1223_v54, %v1132_v1  ;;  %v4000_v54 = vmul.f32 %v3095_v56, %v245_v9  ;;  %v568_v9 = vld [vmem:[%s6236_s2 + $0xe8] sm:$0xff] }
  0xd4   :  { %v1042_v39 = vpop.f32.mrf.mxu1  ;;  %997 = vmatmul.f32.gmra.mxu0 %v3967_v35  ;;  %1836 = vmatpush.msra.mxu2 %v568_v9 }
  0xd5   :  { %1181 = vmatmul.f32.gmra.mxu2 %v3973_v22  ;;  %1273 = vmatmul.f32.gmra.mxu3 %v3976_v55  ;;  %v1043_v59 = vadd.f32 %v1042_v39, %v950_v7  ;;  %6511 = vst [vmem:[#allocation74_spill] sm:$0xff] %v4000_v54  ;;  %v4006_v55 = vmul.f32 %v3106_v60, %v247_v10  ;;  %v255_v10 = vld [vmem:[%s6234_s0 + $0x780] sm:$0xff] }
  0xd6   :  { %v4009_v22 = vmul.f32 %v3108_v61, %v248_v42  ;;  %v4014_v7 = vmul.f32 %v3125_v3, %v246_v18  ;;  %v823_v42 = vld [vmem:[%s6236_s2 + $0x8e0] sm:$0xff] }
  0xd7   :  { %1089 = vmatmul.f32.gmra.mxu1 %v3981_v4  ;;  %6512 = vst [vmem:[#allocation75_spill] sm:$0xff] %v4006_v55  ;;  %1652 = vmatpush.msra.mxu0 %v823_v42 }
  0xd8   :  { %v1134_v37 = vpop.f32.mrf.mxu2  ;;  %v1226_v47 = vpop.f32.mrf.mxu3  ;;  %6513 = vst [vmem:[#allocation76_spill] sm:$0xff] %v4009_v22 }
  0xd9   :  { %v1135_v1 = vadd.f32 %v1134_v37, %v1043_v59  ;;  %v953_v29 = vpop.f32.mrf.mxu0  ;;  %6514 = vst [vmem:[#allocation77_spill] sm:$0xff] %v4014_v7  ;;  %v600_v59 = vld [vmem:[%s6236_s2 + $0x1e8] sm:$0xff]  ;;  %v257_v37 = vld [vmem:[%s6234_s0 + $0x790] sm:$0xff] }
  0xda   :  { %1928 = vmatpush.msra.mxu3 %v600_v59  ;;  %v4045_v21 = vmul.f32 %v3106_v60, %v257_v37  ;;  %v19_v60 = vld [vmem:[%s6234_s0 + $0x20] sm:$0xff]  ;;  %v22_v37 = vld [vmem:[%s6234_s0 + $0x38] sm:$0xff] }
  0xdb   :  { %v4011_v39 = vadd.f32 %v1226_v47, %v1135_v1  ;;  %v258_v47 = vld [vmem:[%s6234_s0 + $0x798] sm:$0xff] }
  0xdc   :  { %v1045_v4 = vpop.f32.mrf.mxu1  ;;  %1000 = vmatmul.f32.gmra.mxu0 %v4000_v54  ;;  %6516 = vst [vmem:[#allocation79_spill] sm:$0xff] %v4045_v21  ;;  %v4048_v42 = vmul.f32 %v3108_v61, %v258_v47 }
  0xdd   :  { %1184 = vmatmul.f32.gmra.mxu2 %v4006_v55  ;;  %1276 = vmatmul.f32.gmra.mxu3 %v4009_v22  ;;  %v1046_v18 = vadd.f32 %v1045_v4, %v953_v29  ;;  %v4039_v22 = vmul.f32 %v3095_v56, %v255_v10  ;;  %v256_v55 = vld [vmem:[%s6234_s0 + $0x788] sm:$0xff]  ;;  %v2877_v56 = vld [vmem:[%s6235_s1] sm:$0xff] }
  0xde   :  { %6517 = vst [vmem:[#allocation80_spill] sm:$0xff] %v4048_v42  ;;  %v4053_v29 = vmul.f32 %v3125_v3, %v256_v55  ;;  %v4059_v10 = vperm.slane %v2877_v56, 4  ;;  %v4066_v61 = vperm.slane %v2877_v56, 6  ;;  %v4068_v3 = vperm.slane %v2877_v56, 7  ;;  %v566_v55 = vld [vmem:[%s6236_s2 + $0xd8] sm:$0xff] }
  0xdf   :  { %1092 = vmatmul.f32.gmra.mxu1 %v4014_v7  ;;  %6515 = vst [vmem:[#allocation78_spill] sm:$0xff] %v4039_v22  ;;  %1837 = vmatpush.msra.mxu2 %v566_v55  ;;  %v598_v55 = vld [vmem:[%s6236_s2 + $0x1d8] sm:$0xff] }
  0xe0   :  { %v1137_v1 = vpop.f32.mrf.mxu2  ;;  %v1229_v9 = vpop.f32.mrf.mxu3  ;;  %6518 = vst [vmem:[#allocation81_spill] sm:$0xff] %v4053_v29  ;;  %1929 = vmatpush.msra.mxu3 %v598_v55 }
  0xe1   :  { %v1138_v54 = vadd.f32 %v1137_v1, %v1046_v18  ;;  %v956_v35 = vpop.f32.mrf.mxu0  ;;  %v4080_v18 = vperm.slane %v2877_v56, 5 }
  0xe3   :  { %v4050_v4 = vadd.f32 %v1229_v9, %v1138_v54  ;;  %v21_v54 = vld [vmem:[%s6234_s0 + $0x30] sm:$0xff] }
  0xe4   :  { %v1048_v59 = vpop.f32.mrf.mxu1  ;;  %1003 = vmatmul.f32.gmra.mxu0 %v4039_v22  ;;  %v4089_v19 = vmul.f32 %v4066_v61, %v21_v54  ;;  %v32_v54 = vld [vmem:[%s6234_s0 + $0x88] sm:$0xff] }
  0xe5   :  { %1187 = vmatmul.f32.gmra.mxu2 %v4045_v21  ;;  %1279 = vmatmul.f32.gmra.mxu3 %v4048_v42  ;;  %v1049_v47 = vadd.f32 %v1048_v59, %v956_v35  ;;  %v4083_v42 = vmul.f32 %v4059_v10, %v19_v60  ;;  %v20_v21 = vld [vmem:[%s6234_s0 + $0x28] sm:$0xff]  ;;  %v4092_v35 = vmul.f32 %v4068_v3, %v22_v37  ;;  %v821_v60 = vld [vmem:[%s6236_s2 + $0x8d0] sm:$0xff] }
  0xe6   :  { %6520 = vst [vmem:[#allocation83_spill] sm:$0xff] %v4089_v19  ;;  %v4097_v56 = vmul.f32 %v4080_v18, %v20_v21  ;;  %v29_v21 = vld [vmem:[%s6234_s0 + $0x70] sm:$0xff]  ;;  %1653 = vmatpush.msra.mxu0 %v821_v60  ;;  %v4128_v27 = vmul.f32 %v4068_v3, %v32_v54 }
  0xe7   :  { %1095 = vmatmul.f32.gmra.mxu1 %v4053_v29  ;;  %6519 = vst [vmem:[#allocation82_spill] sm:$0xff] %v4083_v42  ;;  %v4119_v55 = vmul.f32 %v4059_v10, %v29_v21  ;;  %v564_v21 = vld [vmem:[%s6236_s2 + $0xc8] sm:$0xff]  ;;  %v41_v54 = vld [vmem:[%s6234_s0 + $0xd0] sm:$0xff] }
  0xe8   :  { %v1140_v1 = vpop.f32.mrf.mxu2  ;;  %v1232_v9 = vpop.f32.mrf.mxu3  ;;  %6521 = vst [vmem:[#allocation84_spill] sm:$0xff] %v4092_v35  ;;  %1838 = vmatpush.msra.mxu2 %v564_v21  ;;  %v4167_v15 = vmul.f32 %v4066_v61, %v41_v54 }
  0xe9   :  { %v1141_v22 = vadd.f32 %v1140_v1, %v1049_v47  ;;  %v959_v7 = vpop.f32.mrf.mxu0  ;;  %6522 = vst [vmem:[#allocation85_spill] sm:$0xff] %v4097_v56 }
  0xea   :  { %6523 = vst [vmem:[#allocation86_spill] sm:$0xff] %v4119_v55 }
  0xeb   :  { %v4094_v59 = vadd.f32 %v1232_v9, %v1141_v22  ;;  %v31_v22 = vld [vmem:[%s6234_s0 + $0x80] sm:$0xff]  ;;  %6525 = vst [vmem:[#allocation88_spill] sm:$0xff] %v4128_v27 }
  0xec   :  { %v1051_v47 = vpop.f32.mrf.mxu1  ;;  %1299 = vmatmul.f32.vlgmr.msrb.gmra.mxu0 %v4083_v42  ;;  %v4125_v29 = vmul.f32 %v4066_v61, %v31_v22  ;;  %v596_v22 = vld [vmem:[%s6236_s2 + $0x1c8] sm:$0xff]  ;;  %6528 = vst [vmem:[#allocation91_spill] sm:$0xff] %v4167_v15 }
  0xed   :  { %1483 = vmatmul.f32.vlgmr.msrb.gmra.mxu2 %v4089_v19  ;;  %1575 = vmatmul.f32.vlgmr.msrb.gmra.mxu3 %v4092_v35  ;;  %v1052_v37 = vadd.f32 %v1051_v47, %v959_v7  ;;  %v30_v35 = vld [vmem:[%s6234_s0 + $0x78] sm:$0xff]  ;;  %v835_v47 = vld [vmem:[%s6236_s2 + $0x940] sm:$0xff] }
  0xee   :  { %6524 = vst [vmem:[#allocation87_spill] sm:$0xff] %v4125_v29  ;;  %v4133_v60 = vmul.f32 %v4080_v18, %v30_v35  ;;  %1754 = vmatpush.msra.mxu1 %v835_v47  ;;  %v819_v35 = vld [vmem:[%s6236_s2 + $0x8c0] sm:$0xff]  ;;  %1930 = vmatpush.msra.mxu3 %v596_v22 }
  0xef   :  { %1391 = vmatmul.f32.vlgmr.msrb.gmra.mxu1 %v4097_v56  ;;  %1654 = vmatpush.msra.mxu0 %v819_v35  ;;  %v51_v22 = vld [vmem:[%s6234_s0 + $0x120] sm:$0xff] }
  0xf0   :  { %v1143_v1 = vpop.f32.mrf.mxu2  ;;  %v1235_v9 = vpop.f32.mrf.mxu3  ;;  %6526 = vst [vmem:[#allocation89_spill] sm:$0xff] %v4133_v60 }
  0xf1   :  { %v1144_v19 = vadd.f32 %v1143_v1, %v1052_v37  ;;  %v962_v42 = vpop.f32.mrf.mxu0  ;;  %v42_v1 = vld [vmem:[%s6234_s0 + $0xd8] sm:$0xff] }
  0xf2   :  { %v4170_v21 = vmul.f32 %v4068_v3, %v42_v1 }
  0xf3   :  { %v4130_v7 = vadd.f32 %v1235_v9, %v1144_v19  ;;  %v39_v19 = vld [vmem:[%s6234_s0 + $0xc0] sm:$0xff] }
  0xf4   :  { %v1054_v37 = vpop.f32.mrf.mxu1  ;;  %1302 = vmatmul.f32.gmra.mxu0 %v4119_v55  ;;  %v40_v55 = vld [vmem:[%s6234_s0 + $0xc8] sm:$0xff]  ;;  %6529 = vst [vmem:[#allocation92_spill] sm:$0xff] %v4170_v21 }
  0xf5   :  { %1486 = vmatmul.f32.gmra.mxu2 %v4125_v29  ;;  %1578 = vmatmul.f32.gmra.mxu3 %v4128_v27  ;;  %v1055_v9 = vadd.f32 %v1054_v37, %v962_v42  ;;  %v4161_v29 = vmul.f32 %v4059_v10, %v39_v19  ;;  %v4175_v37 = vmul.f32 %v4080_v18, %v40_v55  ;;  %v49_v19 = vld [vmem:[%s6234_s0 + $0x110] sm:$0xff]  ;;  %v562_v55 = vld [vmem:[%s6236_s2 + $0xb8] sm:$0xff] }
  0xf6   :  { %1839 = vmatpush.msra.mxu2 %v562_v55 }
  0xf7   :  { %1394 = vmatmul.f32.gmra.mxu1 %v4133_v60  ;;  %6527 = vst [vmem:[#allocation90_spill] sm:$0xff] %v4161_v29 }
  0xf8   :  { %v1146_v47 = vpop.f32.mrf.mxu2  ;;  %v1238_v27 = vpop.f32.mrf.mxu3  ;;  %6530 = vst [vmem:[#allocation93_spill] sm:$0xff] %v4175_v37 }
  0xf9   :  { %v1147_v56 = vadd.f32 %v1146_v47, %v1055_v9  ;;  %v965_v26 = vpop.f32.mrf.mxu0  ;;  %v4194_v9 = vmul.f32 %v4059_v10, %v49_v19  ;;  %v50_v47 = vld [vmem:[%s6234_s0 + $0x118] sm:$0xff]  ;;  %v817_v19 = vld [vmem:[%s6236_s2 + $0x8b0] sm:$0xff] }
  0xfa   :  { %1655 = vmatpush.msra.mxu0 %v817_v19 }
  0xfb   :  { %v4172_v42 = vadd.f32 %v1238_v27, %v1147_v56  ;;  %v52_v27 = vld [vmem:[%s6234_s0 + $0x128] sm:$0xff]  ;;  %6531 = vst [vmem:[#allocation94_spill] sm:$0xff] %v4194_v9 }
  0xfc   :  { %v1057_v35 = vpop.f32.mrf.mxu1  ;;  %1305 = vmatmul.f32.gmra.mxu0 %v4161_v29  ;;  %v4208_v29 = vmul.f32 %v4080_v18, %v50_v47 }
  0xfd   :  { %1489 = vmatmul.f32.gmra.mxu2 %v4167_v15  ;;  %1581 = vmatmul.f32.gmra.mxu3 %v4170_v21  ;;  %v1058_v56 = vadd.f32 %v1057_v35, %v965_v26  ;;  %v4200_v26 = vmul.f32 %v4066_v61, %v51_v22  ;;  %v4203_v35 = vmul.f32 %v4068_v3, %v52_v27  ;;  %v61_v22 = vld [vmem:[%s6234_s0 + $0x170] sm:$0xff]  ;;  %v62_v27 = vld [vmem:[%s6234_s0 + $0x178] sm:$0xff] }
  0xfe   :  { %6534 = vst [vmem:[#allocation97_spill] sm:$0xff] %v4208_v29  ;;  %v4236_v60 = vmul.f32 %v4066_v61, %v61_v22  ;;  %v4239_v52 = vmul.f32 %v4068_v3, %v62_v27  ;;  %v560_v22 = vld [vmem:[%s6236_s2 + $0xa8] sm:$0xff]  ;;  %v71_v27 = vld [vmem:[%s6234_s0 + $0x1c0] sm:$0xff] }
  0xff   :  { %1397 = vmatmul.f32.gmra.mxu1 %v4175_v37  ;;  %6532 = vst [vmem:[#allocation95_spill] sm:$0xff] %v4200_v26  ;;  %1840 = vmatpush.msra.mxu2 %v560_v22  ;;  %v4275_v14 = vmul.f32 %v4066_v61, %v71_v27 }
 0x100   :  { %v1149_v54 = vpop.f32.mrf.mxu2  ;;  %v1241_v1 = vpop.f32.mrf.mxu3  ;;  %6533 = vst [vmem:[#allocation96_spill] sm:$0xff] %v4203_v35 }
 0x101   :  { %v1150_v21 = vadd.f32 %v1149_v54, %v1058_v56  ;;  %v968_v15 = vpop.f32.mrf.mxu0  ;;  %v594_v56 = vld [vmem:[%s6236_s2 + $0x1b8] sm:$0xff]  ;;  %6536 = vst [vmem:[#allocation99_spill] sm:$0xff] %v4236_v60 }
 0x102   :  { %1931 = vmatpush.msra.mxu3 %v594_v56  ;;  %6537 = vst [vmem:[#allocation100_spill] sm:$0xff] %v4239_v52 }
 0x103   :  { %v4205_v37 = vadd.f32 %v1241_v1, %v1150_v21  ;;  %v59_v21 = vld [vmem:[%s6234_s0 + $0x160] sm:$0xff]  ;;  %6540 = vst [vmem:[#allocation103_spill] sm:$0xff] %v4275_v14 }
 0x104   :  { %v1060_v55 = vpop.f32.mrf.mxu1  ;;  %1308 = vmatmul.f32.gmra.mxu0 %v4194_v9  ;;  %v4230_v56 = vmul.f32 %v4059_v10, %v59_v21  ;;  %v69_v21 = vld [vmem:[%s6234_s0 + $0x1b0] sm:$0xff] }
 0x105   :  { %1492 = vmatmul.f32.gmra.mxu2 %v4200_v26  ;;  %1584 = vmatmul.f32.gmra.mxu3 %v4203_v35  ;;  %v1061_v54 = vadd.f32 %v1060_v55, %v968_v15  ;;  %v60_v35 = vld [vmem:[%s6234_s0 + $0x168] sm:$0xff] }
 0x106   :  { %6535 = vst [vmem:[#allocation98_spill] sm:$0xff] %v4230_v56  ;;  %v4244_v19 = vmul.f32 %v4080_v18, %v60_v35  ;;  %v592_v35 = vld [vmem:[%s6236_s2 + $0x1a8] sm:$0xff] }
 0x107   :  { %1400 = vmatmul.f32.gmra.mxu1 %v4208_v29  ;;  %1932 = vmatpush.msra.mxu3 %v592_v35  ;;  %v833_v35 = vld [vmem:[%s6236_s2 + $0x930] sm:$0xff] }
 0x108   :  { %v1152_v1 = vpop.f32.mrf.mxu2  ;;  %v1244_v47 = vpop.f32.mrf.mxu3  ;;  %6538 = vst [vmem:[#allocation101_spill] sm:$0xff] %v4244_v19  ;;  %1755 = vmatpush.msra.mxu1 %v833_v35  ;;  %v813_v35 = vld [vmem:[%s6236_s2 + $0x890] sm:$0xff] }
 0x109   :  { %v1153_v26 = vadd.f32 %v1152_v1, %v1061_v54  ;;  %v971_v9 = vpop.f32.mrf.mxu0  ;;  %v72_v54 = vld [vmem:[%s6234_s0 + $0x1c8] sm:$0xff] }
 0x10a   :  { %v4278_v22 = vmul.f32 %v4068_v3, %v72_v54 }
 0x10b   :  { %v4241_v15 = vadd.f32 %v1244_v47, %v1153_v26  ;;  %v815_v26 = vld [vmem:[%s6236_s2 + $0x8a0] sm:$0xff] }
 0x10c   :  { %v1063_v55 = vpop.f32.mrf.mxu1  ;;  %1311 = vmatmul.f32.gmra.mxu0 %v4230_v56  ;;  %v70_v56 = vld [vmem:[%s6234_s0 + $0x1b8] sm:$0xff]  ;;  %6541 = vst [vmem:[#allocation104_spill] sm:$0xff] %v4278_v22 }
 0x10d   :  { %1495 = vmatmul.f32.gmra.mxu2 %v4236_v60  ;;  %1587 = vmatmul.f32.gmra.mxu3 %v4239_v52  ;;  %v1064_v1 = vadd.f32 %v1063_v55, %v971_v9  ;;  %v4269_v60 = vmul.f32 %v4059_v10, %v69_v21  ;;  %v4283_v55 = vmul.f32 %v4080_v18, %v70_v56  ;;  %v79_v21 = vld [vmem:[%s6234_s0 + $0x200] sm:$0xff] }
 0x10e   :  { %1656 = vmatpush.msra.mxu0 %v815_v26 }
 0x10f   :  { %1403 = vmatmul.f32.gmra.mxu1 %v4244_v19  ;;  %6539 = vst [vmem:[#allocation102_spill] sm:$0xff] %v4269_v60 }
 0x110   :  { %v1155_v47 = vpop.f32.mrf.mxu2  ;;  %v1247_v52 = vpop.f32.mrf.mxu3  ;;  %6542 = vst [vmem:[#allocation105_spill] sm:$0xff] %v4283_v55  ;;  %1657 = vmatpush.msra.mxu0 %v813_v35 }
 0x111   :  { %v1156_v29 = vadd.f32 %v1155_v47, %v1064_v1  ;;  %v974_v50 = vpop.f32.mrf.mxu0  ;;  %v4302_v1 = vmul.f32 %v4059_v10, %v79_v21  ;;  %v80_v47 = vld [vmem:[%s6234_s0 + $0x208] sm:$0xff]  ;;  %v558_v21 = vld [vmem:[%s6236_s2 + $0x98] sm:$0xff] }
 0x112   :  { %1841 = vmatpush.msra.mxu2 %v558_v21 }
 0x113   :  { %v4280_v9 = vadd.f32 %v1247_v52, %v1156_v29  ;;  %v81_v52 = vld [vmem:[%s6234_s0 + $0x210] sm:$0xff]  ;;  %v82_v29 = vld [vmem:[%s6234_s0 + $0x218] sm:$0xff]  ;;  %6543 = vst [vmem:[#allocation106_spill] sm:$0xff] %v4302_v1 }
 0x114   :  { %v1066_v26 = vpop.f32.mrf.mxu1  ;;  %1314 = vmatmul.f32.gmra.mxu0 %v4269_v60  ;;  %v4308_v60 = vmul.f32 %v4066_v61, %v81_v52  ;;  %v4311_v19 = vmul.f32 %v4068_v3, %v82_v29  ;;  %v590_v52 = vld [vmem:[%s6236_s2 + $0x198] sm:$0xff]  ;;  %v91_v29 = vld [vmem:[%s6234_s0 + $0x260] sm:$0xff] }
 0x115   :  { %1498 = vmatmul.f32.gmra.mxu2 %v4275_v14  ;;  %1590 = vmatmul.f32.gmra.mxu3 %v4278_v22  ;;  %v1067_v56 = vadd.f32 %v1066_v26, %v974_v50  ;;  %v4316_v26 = vmul.f32 %v4080_v18, %v80_v47  ;;  %v4347_v62 = vmul.f32 %v4066_v61, %v91_v29  ;;  %v556_v29 = vld [vmem:[%s6236_s2 + $0x88] sm:$0xff] }
 0x116   :  { %6544 = vst [vmem:[#allocation107_spill] sm:$0xff] %v4308_v60  ;;  %1933 = vmatpush.msra.mxu3 %v590_v52  ;;  %1842 = vmatpush.msra.mxu2 %v556_v29  ;;  %v100_v29 = vld [vmem:[%s6234_s0 + $0x2a8] sm:$0xff] }
 0x117   :  { %1406 = vmatmul.f32.gmra.mxu1 %v4283_v55  ;;  %6545 = vst [vmem:[#allocation108_spill] sm:$0xff] %v4311_v19  ;;  %v4394_v38 = vmul.f32 %v4080_v18, %v100_v29  ;;  %v110_v29 = vld [vmem:[%s6234_s0 + $0x2f8] sm:$0xff] }
 0x118   :  { %v1158_v27 = vpop.f32.mrf.mxu2  ;;  %v1250_v54 = vpop.f32.mrf.mxu3  ;;  %6546 = vst [vmem:[#allocation109_spill] sm:$0xff] %v4316_v26 }
 0x119   :  { %v1159_v22 = vadd.f32 %v1158_v27, %v1067_v56  ;;  %v977_v14 = vpop.f32.mrf.mxu0  ;;  %v92_v27 = vld [vmem:[%s6234_s0 + $0x268] sm:$0xff]  ;;  %6548 = vst [vmem:[#allocation111_spill] sm:$0xff] %v4347_v62 }
 0x11a   :  { %v4350_v35 = vmul.f32 %v4068_v3, %v92_v27  ;;  %6554 = vst [vmem:[#allocation117_spill] sm:$0xff] %v4394_v38 }
 0x11b   :  { %v4313_v50 = vadd.f32 %v1250_v54, %v1159_v22  ;;  %v89_v22 = vld [vmem:[%s6234_s0 + $0x250] sm:$0xff] }
 0x11c   :  { %v1069_v56 = vpop.f32.mrf.mxu1  ;;  %1317 = vmatmul.f32.gmra.mxu0 %v4302_v1  ;;  %6549 = vst [vmem:[#allocation112_spill] sm:$0xff] %v4350_v35 }
 0x11d   :  { %1501 = vmatmul.f32.gmra.mxu2 %v4308_v60  ;;  %1593 = vmatmul.f32.gmra.mxu3 %v4311_v19  ;;  %v1070_v54 = vadd.f32 %v1069_v56, %v977_v14  ;;  %v4341_v19 = vmul.f32 %v4059_v10, %v89_v22  ;;  %v90_v60 = vld [vmem:[%s6234_s0 + $0x258] sm:$0xff]  ;;  %v99_v22 = vld [vmem:[%s6234_s0 + $0x2a0] sm:$0xff] }
 0x11e   :  { %v4355_v52 = vmul.f32 %v4080_v18, %v90_v60  ;;  %v101_v60 = vld [vmem:[%s6234_s0 + $0x2b0] sm:$0xff] }
 0x11f   :  { %1409 = vmatmul.f32.gmra.mxu1 %v4316_v26  ;;  %6547 = vst [vmem:[#allocation110_spill] sm:$0xff] %v4341_v19 }
 0x120   :  { %v1161_v47 = vpop.f32.mrf.mxu2  ;;  %v1253_v21 = vpop.f32.mrf.mxu3  ;;  %6550 = vst [vmem:[#allocation113_spill] sm:$0xff] %v4355_v52 }
 0x121   :  { %v1162_v1 = vadd.f32 %v1161_v47, %v1070_v54  ;;  %v980_v55 = vpop.f32.mrf.mxu0  ;;  %v811_v54 = vld [vmem:[%s6236_s2 + $0x880] sm:$0xff]  ;;  %v588_v47 = vld [vmem:[%s6236_s2 + $0x188] sm:$0xff] }
 0x122   :  { %1658 = vmatpush.msra.mxu0 %v811_v54  ;;  %1934 = vmatpush.msra.mxu3 %v588_v47 }
 0x123   :  { %v4352_v14 = vadd.f32 %v1253_v21, %v1162_v1  ;;  %v102_v1 = vld [vmem:[%s6234_s0 + $0x2b8] sm:$0xff] }
 0x124   :  { %v1072_v56 = vpop.f32.mrf.mxu1  ;;  %1320 = vmatmul.f32.gmra.mxu0 %v4341_v19  ;;  %v4389_v19 = vmul.f32 %v4068_v3, %v102_v1  ;;  %v111_v1 = vld [vmem:[%s6234_s0 + $0x300] sm:$0xff] }
 0x125   :  { %1504 = vmatmul.f32.gmra.mxu2 %v4347_v62  ;;  %1596 = vmatmul.f32.gmra.mxu3 %v4350_v35  ;;  %v1073_v27 = vadd.f32 %v1072_v56, %v980_v55  ;;  %v4380_v62 = vmul.f32 %v4059_v10, %v99_v22 }
 0x126   :  { %6553 = vst [vmem:[#allocation116_spill] sm:$0xff] %v4389_v19 }
 0x127   :  { %1412 = vmatmul.f32.gmra.mxu1 %v4355_v52  ;;  %6551 = vst [vmem:[#allocation114_spill] sm:$0xff] %v4380_v62  ;;  %v4386_v52 = vmul.f32 %v4066_v61, %v101_v60  ;;  %v109_v60 = vld [vmem:[%s6234_s0 + $0x2f0] sm:$0xff] }
 0x128   :  { %v1164_v21 = vpop.f32.mrf.mxu2  ;;  %v1256_v35 = vpop.f32.mrf.mxu3 }
 0x129   :  { %v1165_v55 = vadd.f32 %v1164_v21, %v1073_v27  ;;  %v983_v56 = vpop.f32.mrf.mxu0  ;;  %6552 = vst [vmem:[#allocation115_spill] sm:$0xff] %v4386_v52  ;;  %v4410_v21 = vmul.f32 %v4059_v10, %v109_v60  ;;  %v554_v60 = vld [vmem:[%s6236_s2 + $0x78] sm:$0xff] }
 0x12a   :  { %1843 = vmatpush.msra.mxu2 %v554_v60 }
 0x12b   :  { %v4391_v26 = vadd.f32 %v1256_v35, %v1165_v55  ;;  %v112_v35 = vld [vmem:[%s6234_s0 + $0x308] sm:$0xff]  ;;  %6555 = vst [vmem:[#allocation118_spill] sm:$0xff] %v4410_v21 }
 0x12c   :  { %v1075_v22 = vpop.f32.mrf.mxu1  ;;  %1323 = vmatmul.f32.gmra.mxu0 %v4380_v62  ;;  %v4419_v62 = vmul.f32 %v4068_v3, %v112_v35  ;;  %v119_v35 = vld [vmem:[%s6234_s0 + $0x340] sm:$0xff] }
 0x12d   :  { %1507 = vmatmul.f32.gmra.mxu2 %v4386_v52  ;;  %1599 = vmatmul.f32.gmra.mxu3 %v4389_v19  ;;  %v1076_v27 = vadd.f32 %v1075_v22, %v983_v56  ;;  %v4416_v52 = vmul.f32 %v4066_v61, %v111_v1  ;;  %v4424_v22 = vmul.f32 %v4080_v18, %v110_v29  ;;  %v586_v1 = vld [vmem:[%s6236_s2 + $0x178] sm:$0xff]  ;;  %v121_v29 = vld [vmem:[%s6234_s0 + $0x350] sm:$0xff] }
 0x12e   :  { %6557 = vst [vmem:[#allocation120_spill] sm:$0xff] %v4419_v62  ;;  %1935 = vmatpush.msra.mxu3 %v586_v1  ;;  %v4458_v12 = vmul.f32 %v4066_v61, %v121_v29 }
 0x12f   :  { %1415 = vmatmul.f32.gmra.mxu1 %v4394_v38  ;;  %6556 = vst [vmem:[#allocation119_spill] sm:$0xff] %v4416_v52  ;;  %v120_v38 = vld [vmem:[%s6234_s0 + $0x348] sm:$0xff] }
 0x130   :  { %v1167_v54 = vpop.f32.mrf.mxu2  ;;  %v1259_v47 = vpop.f32.mrf.mxu3  ;;  %6558 = vst [vmem:[#allocation121_spill] sm:$0xff] %v4424_v22  ;;  %v4466_v1 = vmul.f32 %v4080_v18, %v120_v38  ;;  %v132_v38 = vld [vmem:[%s6234_s0 + $0x3a8] sm:$0xff] }
 0x131   :  { %v1168_v55 = vadd.f32 %v1167_v54, %v1076_v27  ;;  %v986_v19 = vpop.f32.mrf.mxu0  ;;  %v809_v27 = vld [vmem:[%s6236_s2 + $0x870] sm:$0xff]  ;;  %6560 = vst [vmem:[#allocation123_spill] sm:$0xff] %v4458_v12 }
 0x132   :  { %1659 = vmatpush.msra.mxu0 %v809_v27  ;;  %6562 = vst [vmem:[#allocation125_spill] sm:$0xff] %v4466_v1 }
 0x133   :  { %v4421_v56 = vadd.f32 %v1259_v47, %v1168_v55  ;;  %v831_v47 = vld [vmem:[%s6236_s2 + $0x920] sm:$0xff]  ;;  %v122_v55 = vld [vmem:[%s6234_s0 + $0x358] sm:$0xff] }
 0x134   :  { %v1078_v54 = vpop.f32.mrf.mxu1  ;;  %1326 = vmatmul.f32.gmra.mxu0 %v4410_v21  ;;  %v4452_v21 = vmul.f32 %v4059_v10, %v119_v35  ;;  %1756 = vmatpush.msra.mxu1 %v831_v47  ;;  %v4461_v27 = vmul.f32 %v4068_v3, %v122_v55  ;;  %v552_v35 = vld [vmem:[%s6236_s2 + $0x68] sm:$0xff] }
 0x135   :  { %1510 = vmatmul.f32.gmra.mxu2 %v4416_v52  ;;  %1602 = vmatmul.f32.gmra.mxu3 %v4419_v62  ;;  %v1079_v60 = vadd.f32 %v1078_v54, %v986_v19 }
 0x136   :  { %6559 = vst [vmem:[#allocation122_spill] sm:$0xff] %v4452_v21  ;;  %1844 = vmatpush.msra.mxu2 %v552_v35  ;;  %v584_v35 = vld [vmem:[%s6236_s2 + $0x168] sm:$0xff] }
 0x137   :  { %1418 = vmatmul.f32.gmra.mxu1 %v4424_v22  ;;  %6561 = vst [vmem:[#allocation124_spill] sm:$0xff] %v4461_v27  ;;  %v4494_v22 = vmul.f32 %v4068_v3, %v132_v38  ;;  %1936 = vmatpush.msra.mxu3 %v584_v35  ;;  %v142_v38 = vld [vmem:[%s6234_s0 + $0x3f8] sm:$0xff] }
 0x138   :  { %v1170_v62 = vpop.f32.mrf.mxu2  ;;  %v1262_v52 = vpop.f32.mrf.mxu3  ;;  %v4530_v49 = vmul.f32 %v4068_v3, %v142_v38  ;;  %v151_v38 = vld [vmem:[%s6234_s0 + $0x440] sm:$0xff] }
 0x139   :  { %v1171_v25 = vadd.f32 %v1170_v62, %v1079_v60  ;;  %v989_v58 = vpop.f32.mrf.mxu0  ;;  %v129_v62 = vld [vmem:[%s6234_s0 + $0x390] sm:$0xff]  ;;  %v130_v60 = vld [vmem:[%s6234_s0 + $0x398] sm:$0xff]  ;;  %6565 = vst [vmem:[#allocation128_spill] sm:$0xff] %v4494_v22  ;;  %v4566_v33 = vmul.f32 %v4066_v61, %v151_v38 }
 0x13a   :  { %v4485_v55 = vmul.f32 %v4059_v10, %v129_v62  ;;  %v807_v62 = vld [vmem:[%s6236_s2 + $0x860] sm:$0xff]  ;;  %6569 = vst [vmem:[#allocation132_spill] sm:$0xff] %v4530_v49  ;;  %v161_v38 = vld [vmem:[%s6234_s0 + $0x490] sm:$0xff] }
 0x13b   :  { %v4463_v19 = vadd.f32 %v1262_v52, %v1171_v25  ;;  %v131_v25 = vld [vmem:[%s6234_s0 + $0x3a0] sm:$0xff]  ;;  %1660 = vmatpush.msra.mxu0 %v807_v62  ;;  %6572 = vst [vmem:[#allocation135_spill] sm:$0xff] %v4566_v33 }
 0x13c   :  { %v1081_v54 = vpop.f32.mrf.mxu1  ;;  %1329 = vmatmul.f32.gmra.mxu0 %v4452_v21  ;;  %6563 = vst [vmem:[#allocation126_spill] sm:$0xff] %v4485_v55  ;;  %v4491_v21 = vmul.f32 %v4066_v61, %v131_v25  ;;  %v141_v25 = vld [vmem:[%s6234_s0 + $0x3f0] sm:$0xff] }
 0x13d   :  { %1513 = vmatmul.f32.gmra.mxu2 %v4458_v12  ;;  %1605 = vmatmul.f32.gmra.mxu3 %v4461_v27  ;;  %v1082_v52 = vadd.f32 %v1081_v54, %v989_v58  ;;  %v4499_v54 = vmul.f32 %v4080_v18, %v130_v60 }
 0x13e   :  { %6564 = vst [vmem:[#allocation127_spill] sm:$0xff] %v4491_v21 }
 0x13f   :  { %1421 = vmatmul.f32.gmra.mxu1 %v4466_v1  ;;  %6566 = vst [vmem:[#allocation129_spill] sm:$0xff] %v4499_v54  ;;  %v4527_v1 = vmul.f32 %v4066_v61, %v141_v25  ;;  %v582_v25 = vld [vmem:[%s6236_s2 + $0x158] sm:$0xff] }
 0x140   :  { %v1173_v47 = vpop.f32.mrf.mxu2  ;;  %v1265_v29 = vpop.f32.mrf.mxu3  ;;  %1937 = vmatpush.msra.mxu3 %v582_v25 }
 0x141   :  { %v1174_v27 = vadd.f32 %v1173_v47, %v1082_v52  ;;  %v992_v12 = vpop.f32.mrf.mxu0  ;;  %6568 = vst [vmem:[#allocation131_spill] sm:$0xff] %v4527_v1 }
 0x143   :  { %v4496_v58 = vadd.f32 %v1265_v29, %v1174_v27  ;;  %v139_v27 = vld [vmem:[%s6234_s0 + $0x3e0] sm:$0xff] }
 0x144   :  { %v1084_v52 = vpop.f32.mrf.mxu1  ;;  %1332 = vmatmul.f32.gmra.mxu0 %v4485_v55  ;;  %v4521_v35 = vmul.f32 %v4059_v10, %v139_v27 }
 0x145   :  { %1516 = vmatmul.f32.gmra.mxu2 %v4491_v21  ;;  %1608 = vmatmul.f32.gmra.mxu3 %v4494_v22  ;;  %v1085_v47 = vadd.f32 %v1084_v52, %v992_v12  ;;  %v140_v22 = vld [vmem:[%s6234_s0 + $0x3e8] sm:$0xff]  ;;  %v550_v52 = vld [vmem:[%s6236_s2 + $0x58] sm:$0xff] }
 0x146   :  { %6567 = vst [vmem:[#allocation130_spill] sm:$0xff] %v4521_v35  ;;  %v4535_v62 = vmul.f32 %v4080_v18, %v140_v22  ;;  %1845 = vmatpush.msra.mxu2 %v550_v52  ;;  %v805_v22 = vld [vmem:[%s6236_s2 + $0x850] sm:$0xff] }
 0x147   :  { %1424 = vmatmul.f32.gmra.mxu1 %v4499_v54  ;;  %1661 = vmatpush.msra.mxu0 %v805_v22 }
 0x148   :  { %v1176_v29 = vpop.f32.mrf.mxu2  ;;  %v1268_v60 = vpop.f32.mrf.mxu3  ;;  %6570 = vst [vmem:[#allocation133_spill] sm:$0xff] %v4535_v62 }
 0x149   :  { %v1177_v21 = vadd.f32 %v1176_v29, %v1085_v47  ;;  %v995_v55 = vpop.f32.mrf.mxu0  ;;  %v152_v47 = vld [vmem:[%s6234_s0 + $0x448] sm:$0xff] }
 0x14a   :  { %v4569_v22 = vmul.f32 %v4068_v3, %v152_v47  ;;  %v829_v47 = vld [vmem:[%s6236_s2 + $0x910] sm:$0xff] }
 0x14b   :  { %v4532_v12 = vadd.f32 %v1268_v60, %v1177_v21  ;;  %v149_v21 = vld [vmem:[%s6234_s0 + $0x430] sm:$0xff]  ;;  %1757 = vmatpush.msra.mxu1 %v829_v47 }
 0x14c   :  { %v1087_v27 = vpop.f32.mrf.mxu1  ;;  %1335 = vmatmul.f32.gmra.mxu0 %v4521_v35  ;;  %6573 = vst [vmem:[#allocation136_spill] sm:$0xff] %v4569_v22 }
 0x14d   :  { %1519 = vmatmul.f32.gmra.mxu2 %v4527_v1  ;;  %1611 = vmatmul.f32.gmra.mxu3 %v4530_v49  ;;  %v1088_v29 = vadd.f32 %v1087_v27, %v995_v55  ;;  %v4560_v49 = vmul.f32 %v4059_v10, %v149_v21  ;;  %v150_v1 = vld [vmem:[%s6234_s0 + $0x438] sm:$0xff]  ;;  %v159_v21 = vld [vmem:[%s6234_s0 + $0x480] sm:$0xff] }
 0x14e   :  { %v4574_v27 = vmul.f32 %v4080_v18, %v150_v1  ;;  %v162_v1 = vld [vmem:[%s6234_s0 + $0x498] sm:$0xff] }
 0x14f   :  { %1427 = vmatmul.f32.gmra.mxu1 %v4535_v62  ;;  %6571 = vst [vmem:[#allocation134_spill] sm:$0xff] %v4560_v49 }
 0x150   :  { %v1179_v60 = vpop.f32.mrf.mxu2  ;;  %v1271_v52 = vpop.f32.mrf.mxu3  ;;  %6575 = vst [vmem:[#allocation138_spill] sm:$0xff] %v4574_v27 }
 0x151   :  { %v1180_v35 = vadd.f32 %v1179_v60, %v1088_v29  ;;  %v998_v54 = vpop.f32.mrf.mxu0  ;;  %v548_v29 = vld [vmem:[%s6236_s2 + $0x48] sm:$0xff] }
 0x152   :  { %1846 = vmatpush.msra.mxu2 %v548_v29 }
 0x153   :  { %v4571_v55 = vadd.f32 %v1271_v52, %v1180_v35 }
 0x154   :  { %v1090_v25 = vpop.f32.mrf.mxu1  ;;  %1338 = vmatmul.f32.gmra.mxu0 %v4560_v49  ;;  %v4605_v49 = vmul.f32 %v4068_v3, %v162_v1  ;;  %v172_v1 = vld [vmem:[%s6234_s0 + $0x4e8] sm:$0xff] }
 0x155   :  { %6574 = vst [vmem:[#allocation137_spill] sm:$0xff] %v4571_v55  ;;  %1522 = vmatmul.f32.gmra.mxu2 %v4566_v33  ;;  %1614 = vmatmul.f32.gmra.mxu3 %v4569_v22  ;;  %v1091_v35 = vadd.f32 %v1090_v25, %v998_v54  ;;  %v4596_v22 = vmul.f32 %v4059_v10, %v159_v21  ;;  %v160_v33 = vld [vmem:[%s6234_s0 + $0x488] sm:$0xff]  ;;  %v803_v21 = vld [vmem:[%s6236_s2 + $0x840] sm:$0xff] }
 0x156   :  { %6578 = vst [vmem:[#allocation141_spill] sm:$0xff] %v4605_v49  ;;  %v4610_v55 = vmul.f32 %v4080_v18, %v160_v33  ;;  %v169_v33 = vld [vmem:[%s6234_s0 + $0x4d0] sm:$0xff]  ;;  %1662 = vmatpush.msra.mxu0 %v803_v21 }
 0x157   :  { %1430 = vmatmul.f32.gmra.mxu1 %v4574_v27  ;;  %6576 = vst [vmem:[#allocation139_spill] sm:$0xff] %v4596_v22  ;;  %v4602_v27 = vmul.f32 %v4066_v61, %v161_v38  ;;  %v171_v38 = vld [vmem:[%s6234_s0 + $0x4e0] sm:$0xff] }
 0x158   :  { %v1182_v60 = vpop.f32.mrf.mxu2  ;;  %v1274_v52 = vpop.f32.mrf.mxu3  ;;  %6580 = vst [vmem:[#allocation143_spill] sm:$0xff] %v4610_v55 }
 0x159   :  { %v1183_v54 = vadd.f32 %v1182_v60, %v1091_v35  ;;  %v1001_v25 = vpop.f32.mrf.mxu0  ;;  %6577 = vst [vmem:[#allocation140_spill] sm:$0xff] %v4602_v27  ;;  %v580_v35 = vld [vmem:[%s6236_s2 + $0x148] sm:$0xff] }
 0x15a   :  { %1938 = vmatpush.msra.mxu3 %v580_v35  ;;  %v170_v35 = vld [vmem:[%s6234_s0 + $0x4d8] sm:$0xff] }
 0x15b   :  { %v4607_v62 = vadd.f32 %v1274_v52, %v1183_v54  ;;  %v4632_v54 = vmul.f32 %v4059_v10, %v169_v33  ;;  %v4646_v21 = vmul.f32 %v4080_v18, %v170_v35 }
 0x15c   :  { %v1093_v47 = vpop.f32.mrf.mxu1  ;;  %1341 = vmatmul.f32.gmra.mxu0 %v4596_v22  ;;  %v4638_v22 = vmul.f32 %v4066_v61, %v171_v38  ;;  %v801_v38 = vld [vmem:[%s6236_s2 + $0x830] sm:$0xff] }
 0x15d   :  { %6579 = vst [vmem:[#allocation142_spill] sm:$0xff] %v4607_v62  ;;  %1525 = vmatmul.f32.gmra.mxu2 %v4602_v27  ;;  %1617 = vmatmul.f32.gmra.mxu3 %v4605_v49  ;;  %v1094_v29 = vadd.f32 %v1093_v47, %v1001_v25  ;;  %v4641_v62 = vmul.f32 %v4068_v3, %v172_v1  ;;  %v546_v47 = vld [vmem:[%s6236_s2 + $0x38] sm:$0xff] }
 0x15e   :  { %6581 = vst [vmem:[#allocation144_spill] sm:$0xff] %v4632_v54  ;;  %1847 = vmatpush.msra.mxu2 %v546_v47  ;;  %v578_v1 = vld [vmem:[%s6236_s2 + $0x138] sm:$0xff]  ;;  %1663 = vmatpush.msra.mxu0 %v801_v38 }
 0x15f   :  { %1433 = vmatmul.f32.gmra.mxu1 %v4610_v55  ;;  %6582 = vst [vmem:[#allocation145_spill] sm:$0xff] %v4638_v22  ;;  %1939 = vmatpush.msra.mxu3 %v578_v1 }
 0x160   :  { %v1185_v60 = vpop.f32.mrf.mxu2  ;;  %v1277_v52 = vpop.f32.mrf.mxu3  ;;  %6583 = vst [vmem:[#allocation146_spill] sm:$0xff] %v4641_v62 }
 0x161   :  { %v1186_v49 = vadd.f32 %v1185_v60, %v1094_v29  ;;  %v1004_v27 = vpop.f32.mrf.mxu0  ;;  %6585 = vst [vmem:[#allocation148_spill] sm:$0xff] %v4646_v21  ;;  %v181_v29 = vld [vmem:[%s6234_s0 + $0x530] sm:$0xff]  ;;  %v182_v60 = vld [vmem:[%s6234_s0 + $0x538] sm:$0xff] }
 0x162   :  { %v4680_v38 = vmul.f32 %v4068_v3, %v182_v60 }
 0x163   :  { %v4643_v25 = vadd.f32 %v1277_v52, %v1186_v49  ;;  %v179_v49 = vld [vmem:[%s6234_s0 + $0x520] sm:$0xff] }
 0x164   :  { %v1096_v33 = vpop.f32.mrf.mxu1  ;;  %1344 = vmatmul.f32.gmra.mxu0 %v4632_v54  ;;  %6588 = vst [vmem:[#allocation151_spill] sm:$0xff] %v4680_v38 }
 0x165   :  { %6584 = vst [vmem:[#allocation147_spill] sm:$0xff] %v4643_v25  ;;  %1528 = vmatmul.f32.gmra.mxu2 %v4638_v22  ;;  %1620 = vmatmul.f32.gmra.mxu3 %v4641_v62  ;;  %v1097_v52 = vadd.f32 %v1096_v33, %v1004_v27  ;;  %v4671_v62 = vmul.f32 %v4059_v10, %v179_v49  ;;  %v180_v22 = vld [vmem:[%s6234_s0 + $0x528] sm:$0xff] }
 0x166   :  { %v4677_v25 = vmul.f32 %v4066_v61, %v181_v29  ;;  %v4686_v1 = vmul.f32 %v4080_v18, %v180_v22  ;;  %v189_v29 = vld [vmem:[%s6234_s0 + $0x570] sm:$0xff] }
 0x167   :  { %1436 = vmatmul.f32.gmra.mxu1 %v4646_v21  ;;  %6586 = vst [vmem:[#allocation149_spill] sm:$0xff] %v4671_v62 }
 0x168   :  { %v1188_v35 = vpop.f32.mrf.mxu2  ;;  %v1280_v47 = vpop.f32.mrf.mxu3  ;;  %6587 = vst [vmem:[#allocation150_spill] sm:$0xff] %v4677_v25 }
 0x169   :  { %v1189_v54 = vadd.f32 %v1188_v35, %v1097_v52  ;;  %v1300_v55 = vpop.f32.mrf.mxu0  ;;  %6589 = vst [vmem:[#allocation152_spill] sm:$0xff] %v4686_v1  ;;  %v4702_v52 = vmul.f32 %v4059_v10, %v189_v29  ;;  %v190_v35 = vld [vmem:[%s6234_s0 + $0x578] sm:$0xff]  ;;  %v544_v29 = vld [vmem:[%s6236_s2 + $0x28] sm:$0xff] }
 0x16a   :  { %v1301_v33 = vadd.f32 %v1300_v55, %v3783_v8  ;;  %v192_v8 = vld [vmem:[%s6234_s0 + $0x588] sm:$0xff]  ;;  %1848 = vmatpush.msra.mxu2 %v544_v29 }
 0x16b   :  { %v4682_v27 = vadd.f32 %v1280_v47, %v1189_v54  ;;  %v191_v54 = vld [vmem:[%s6234_s0 + $0x580] sm:$0xff]  ;;  %6590 = vst [vmem:[#allocation153_spill] sm:$0xff] %v4702_v52 }
 0x16c   :  { %v1392_v49 = vpop.f32.mrf.mxu1  ;;  %1347 = vmatmul.f32.gmra.mxu0 %v4671_v62  ;;  %v4711_v62 = vmul.f32 %v4068_v3, %v192_v8 }
 0x16d   :  { %1531 = vmatmul.f32.gmra.mxu2 %v4677_v25  ;;  %1623 = vmatmul.f32.gmra.mxu3 %v4680_v38  ;;  %v1393_v22 = vadd.f32 %v1392_v49, %v1301_v33  ;;  %v4708_v25 = vmul.f32 %v4066_v61, %v191_v54  ;;  %v576_v54 = vld [vmem:[%s6236_s2 + $0x128] sm:$0xff] }
 0x16e   :  { %6592 = vst [vmem:[#allocation155_spill] sm:$0xff] %v4711_v62  ;;  %1940 = vmatpush.msra.mxu3 %v576_v54 }
 0x16f   :  { %1439 = vmatmul.f32.gmra.mxu1 %v4686_v1  ;;  %6591 = vst [vmem:[#allocation154_spill] sm:$0xff] %v4708_v25  ;;  %v4717_v1 = vmul.f32 %v4080_v18, %v190_v35 }
 0x170   :  { %v1484_v55 = vpop.f32.mrf.mxu2  ;;  %v1576_v60 = vpop.f32.mrf.mxu3 }
 0x171   :  { %v1485_v47 = vadd.f32 %v1484_v55, %v1393_v22  ;;  %v1303_v38 = vpop.f32.mrf.mxu0  ;;  %6593 = vst [vmem:[#allocation156_spill] sm:$0xff] %v4717_v1  ;;  %v799_v22 = vld [vmem:[%s6236_s2 + $0x820] sm:$0xff]  ;;  %v202_v55 = vld [vmem:[%s6234_s0 + $0x5d8] sm:$0xff] }
 0x172   :  { %v1304_v49 = vadd.f32 %v1303_v38, %v3825_v46  ;;  %v199_v46 = vld [vmem:[%s6234_s0 + $0x5c0] sm:$0xff]  ;;  %v201_v38 = vld [vmem:[%s6234_s0 + $0x5d0] sm:$0xff]  ;;  %1664 = vmatpush.msra.mxu0 %v799_v22  ;;  %v4751_v22 = vmul.f32 %v4068_v3, %v202_v55  ;;  %v212_v55 = vld [vmem:[%s6234_s0 + $0x628] sm:$0xff] }
 0x173   :  { %v4713_v33 = vadd.f32 %v1576_v60, %v1485_v47  ;;  %v4742_v29 = vmul.f32 %v4059_v10, %v199_v46  ;;  %v4748_v21 = vmul.f32 %v4066_v61, %v201_v38  ;;  %v827_v46 = vld [vmem:[%s6236_s2 + $0x900] sm:$0xff]  ;;  %v209_v38 = vld [vmem:[%s6234_s0 + $0x610] sm:$0xff] }
 0x174   :  { %v1395_v8 = vpop.f32.mrf.mxu1  ;;  %1350 = vmatmul.f32.gmra.mxu0 %v4702_v52  ;;  %6596 = vst [vmem:[#allocation159_spill] sm:$0xff] %v4751_v22  ;;  %1758 = vmatpush.msra.mxu1 %v827_v46  ;;  %v4785_v46 = vmul.f32 %v4059_v10, %v209_v38 }
 0x175   :  { %1534 = vmatmul.f32.gmra.mxu2 %v4708_v25  ;;  %1626 = vmatmul.f32.gmra.mxu3 %v4711_v62  ;;  %v1396_v60 = vadd.f32 %v1395_v8, %v1304_v49  ;;  %6594 = vst [vmem:[#allocation157_spill] sm:$0xff] %v4742_v29  ;;  %v200_v62 = vld [vmem:[%s6234_s0 + $0x5c8] sm:$0xff] }
 0x176   :  { %6595 = vst [vmem:[#allocation158_spill] sm:$0xff] %v4748_v21  ;;  %v4757_v8 = vmul.f32 %v4080_v18, %v200_v62  ;;  %v797_v62 = vld [vmem:[%s6236_s2 + $0x810] sm:$0xff] }
 0x177   :  { %1442 = vmatmul.f32.gmra.mxu1 %v4717_v1  ;;  %1665 = vmatpush.msra.mxu0 %v797_v62  ;;  %6599 = vst [vmem:[#allocation162_spill] sm:$0xff] %v4785_v46 }
 0x178   :  { %v1487_v35 = vpop.f32.mrf.mxu2  ;;  %v1579_v47 = vpop.f32.mrf.mxu3  ;;  %6598 = vst [vmem:[#allocation161_spill] sm:$0xff] %v4757_v8 }
 0x179   :  { %v1488_v25 = vadd.f32 %v1487_v35, %v1396_v60  ;;  %v1306_v52 = vpop.f32.mrf.mxu0 }
 0x17a   :  { %v1307_v54 = vadd.f32 %v1306_v52, %v3864_v2  ;;  %v542_v2 = vld [vmem:[%s6236_s2 + $0x18] sm:$0xff]  ;;  %v211_v52 = vld [vmem:[%s6234_s0 + $0x620] sm:$0xff] }
 0x17b   :  { %v4753_v49 = vadd.f32 %v1579_v47, %v1488_v25  ;;  %v574_v25 = vld [vmem:[%s6236_s2 + $0x118] sm:$0xff]  ;;  %1849 = vmatpush.msra.mxu2 %v542_v2  ;;  %v4794_v2 = vmul.f32 %v4068_v3, %v212_v55 }
 0x17c   :  { %v1398_v1 = vpop.f32.mrf.mxu1  ;;  %1353 = vmatmul.f32.gmra.mxu0 %v4742_v29  ;;  %1941 = vmatpush.msra.mxu3 %v574_v25  ;;  %v219_v25 = vld [vmem:[%s6234_s0 + $0x660] sm:$0xff] }
 0x17d   :  { %6597 = vst [vmem:[#allocation160_spill] sm:$0xff] %v4753_v49  ;;  %1537 = vmatmul.f32.gmra.mxu2 %v4748_v21  ;;  %1629 = vmatmul.f32.gmra.mxu3 %v4751_v22  ;;  %v1399_v60 = vadd.f32 %v1398_v1, %v1307_v54  ;;  %v210_v22 = vld [vmem:[%s6234_s0 + $0x618] sm:$0xff]  ;;  %v4791_v49 = vmul.f32 %v4066_v61, %v211_v52 }
 0x17e   :  { %6601 = vst [vmem:[#allocation164_spill] sm:$0xff] %v4794_v2  ;;  %v4800_v62 = vmul.f32 %v4080_v18, %v210_v22  ;;  %v4816_v55 = vmul.f32 %v4059_v10, %v219_v25  ;;  %v540_v25 = vld [vmem:[%s6236_s2 + $0x8] sm:$0xff] }
 0x17f   :  { %1445 = vmatmul.f32.gmra.mxu1 %v4757_v8  ;;  %6600 = vst [vmem:[#allocation163_spill] sm:$0xff] %v4791_v49  ;;  %1850 = vmatpush.msra.mxu2 %v540_v25 }
 0x180   :  { %v1490_v35 = vpop.f32.mrf.mxu2  ;;  %v1582_v47 = vpop.f32.mrf.mxu3  ;;  %6602 = vst [vmem:[#allocation165_spill] sm:$0xff] %v4800_v62 }
 0x181   :  { %v1491_v21 = vadd.f32 %v1490_v35, %v1399_v60  ;;  %v1309_v29 = vpop.f32.mrf.mxu0  ;;  %6603 = vst [vmem:[#allocation166_spill] sm:$0xff] %v4816_v55  ;;  %v220_v60 = vld [vmem:[%s6234_s0 + $0x668] sm:$0xff] }
 0x182   :  { %v1310_v54 = vadd.f32 %v1309_v29, %v3897_v43  ;;  %v222_v43 = vld [vmem:[%s6234_s0 + $0x678] sm:$0xff] }
 0x183   :  { %v4796_v1 = vadd.f32 %v1582_v47, %v1491_v21  ;;  %v221_v21 = vld [vmem:[%s6234_s0 + $0x670] sm:$0xff] }
 0x184   :  { %v1401_v38 = vpop.f32.mrf.mxu1  ;;  %1356 = vmatmul.f32.gmra.mxu0 %v4785_v46 }
 0x185   :  { %1540 = vmatmul.f32.gmra.mxu2 %v4791_v49  ;;  %1632 = vmatmul.f32.gmra.mxu3 %v4794_v2  ;;  %v1402_v29 = vadd.f32 %v1401_v38, %v1310_v54  ;;  %v4822_v2 = vmul.f32 %v4066_v61, %v221_v21  ;;  %v4825_v49 = vmul.f32 %v4068_v3, %v222_v43  ;;  %v572_v21 = vld [vmem:[%s6236_s2 + $0x108] sm:$0xff] }
 0x186   :  { %1942 = vmatpush.msra.mxu3 %v572_v21 }
 0x187   :  { %1448 = vmatmul.f32.gmra.mxu1 %v4800_v62  ;;  %6604 = vst [vmem:[#allocation167_spill] sm:$0xff] %v4822_v2  ;;  %v4831_v62 = vmul.f32 %v4080_v18, %v220_v60 }
 0x188   :  { %v1493_v22 = vpop.f32.mrf.mxu2  ;;  %v1585_v52 = vpop.f32.mrf.mxu3  ;;  %6605 = vst [vmem:[#allocation168_spill] sm:$0xff] %v4825_v49 }
 0x189   :  { %v1494_v35 = vadd.f32 %v1493_v22, %v1402_v29  ;;  %v1312_v47 = vpop.f32.mrf.mxu0  ;;  %6606 = vst [vmem:[#allocation169_spill] sm:$0xff] %v4831_v62  ;;  %v795_v29 = vld [vmem:[%s6236_s2 + $0x800] sm:$0xff] }
 0x18a   :  { %v1313_v38 = vadd.f32 %v1312_v47, %v3939_v34  ;;  %v229_v34 = vld [vmem:[%s6234_s0 + $0x6b0] sm:$0xff]  ;;  %v231_v22 = vld [vmem:[%s6234_s0 + $0x6c0] sm:$0xff]  ;;  %1666 = vmatpush.msra.mxu0 %v795_v29 }
 0x18b   :  { %v4827_v54 = vadd.f32 %v1585_v52, %v1494_v35  ;;  %v232_v52 = vld [vmem:[%s6234_s0 + $0x6c8] sm:$0xff]  ;;  %v4856_v25 = vmul.f32 %v4059_v10, %v229_v34  ;;  %v4862_v46 = vmul.f32 %v4066_v61, %v231_v22  ;;  %v239_v22 = vld [vmem:[%s6234_s0 + $0x700] sm:$0xff] }
 0x18c   :  { %v1404_v43 = vpop.f32.mrf.mxu1  ;;  %1359 = vmatmul.f32.gmra.mxu0 %v4816_v55  ;;  %v4865_v29 = vmul.f32 %v4068_v3, %v232_v52  ;;  %v634_v52 = vld [vmem:[%s6236_s2 + $0x2f8] sm:$0xff] }
 0x18d   :  { %1543 = vmatmul.f32.gmra.mxu2 %v4822_v2  ;;  %1635 = vmatmul.f32.gmra.mxu3 %v4825_v49  ;;  %v1405_v60 = vadd.f32 %v1404_v43, %v1313_v38  ;;  %6607 = vst [vmem:[#allocation170_spill] sm:$0xff] %v4856_v25  ;;  %v230_v49 = vld [vmem:[%s6234_s0 + $0x6b8] sm:$0xff] }
 0x18e   :  { %6608 = vst [vmem:[#allocation171_spill] sm:$0xff] %v4862_v46  ;;  %v4871_v43 = vmul.f32 %v4080_v18, %v230_v49  ;;  %v242_v49 = vld [vmem:[%s6234_s0 + $0x718] sm:$0xff]  ;;  %2019 = vmatpush.msrb.mxu0 %v634_v52 }
 0x18f   :  { %1451 = vmatmul.f32.gmra.mxu1 %v4831_v62  ;;  %6609 = vst [vmem:[#allocation172_spill] sm:$0xff] %v4865_v29  ;;  %v666_v52 = vld [vmem:[%s6236_s2 + $0x3f8] sm:$0xff] }
 0x190   :  { %v1496_v35 = vpop.f32.mrf.mxu2  ;;  %v1588_v47 = vpop.f32.mrf.mxu3  ;;  %6610 = vst [vmem:[#allocation173_spill] sm:$0xff] %v4871_v43  ;;  %2111 = vmatpush.msrb.mxu1 %v666_v52 }
 0x191   :  { %v1497_v2 = vadd.f32 %v1496_v35, %v1405_v60  ;;  %v1315_v55 = vpop.f32.mrf.mxu0  ;;  %v730_v60 = vld [vmem:[%s6236_s2 + $0x5f8] sm:$0xff] }
 0x192   :  { %v1316_v21 = vadd.f32 %v1315_v55, %v3978_v28  ;;  %v241_v28 = vld [vmem:[%s6234_s0 + $0x710] sm:$0xff]  ;;  %2295 = vmatpush.msrb.mxu3 %v730_v60 }
 0x193   :  { %v4867_v38 = vadd.f32 %v1588_v47, %v1497_v2  ;;  %v698_v2 = vld [vmem:[%s6236_s2 + $0x4f8] sm:$0xff] }
 0x194   :  { %v1407_v34 = vpop.f32.mrf.mxu1  ;;  %1362 = vmatmul.f32.gmra.mxu0 %v4856_v25  ;;  %2203 = vmatpush.msrb.mxu2 %v698_v2  ;;  %v240_v2 = vld [vmem:[%s6234_s0 + $0x708] sm:$0xff] }
 0x195   :  { %1546 = vmatmul.f32.gmra.mxu2 %v4862_v46  ;;  %1638 = vmatmul.f32.gmra.mxu3 %v4865_v29  ;;  %v1408_v55 = vadd.f32 %v1407_v34, %v1316_v21  ;;  %v4896_v29 = vmul.f32 %v4059_v10, %v239_v22  ;;  %v4902_v46 = vmul.f32 %v4066_v61, %v241_v28  ;;  %v249_v28 = vld [vmem:[%s6234_s0 + $0x750] sm:$0xff] }
 0x196   :  { %v4911_v22 = vmul.f32 %v4080_v18, %v240_v2  ;;  %v4930_v2 = vmul.f32 %v4059_v10, %v249_v28  ;;  %v696_v28 = vld [vmem:[%s6236_s2 + $0x4e8] sm:$0xff] }
 0x197   :  { %1454 = vmatmul.f32.gmra.mxu1 %v4871_v43  ;;  %6611 = vst [vmem:[#allocation174_spill] sm:$0xff] %v4896_v29  ;;  %v4905_v43 = vmul.f32 %v4068_v3, %v242_v49  ;;  %v252_v49 = vld [vmem:[%s6234_s0 + $0x768] sm:$0xff]  ;;  %2204 = vmatpush.msrb.mxu2 %v696_v28 }
 0x198   :  { %v1499_v35 = vpop.f32.mrf.mxu2  ;;  %v1591_v47 = vpop.f32.mrf.mxu3  ;;  %6612 = vst [vmem:[#allocation175_spill] sm:$0xff] %v4902_v46 }
 0x199   :  { %v1500_v21 = vadd.f32 %v1499_v35, %v1408_v55  ;;  %v1318_v34 = vpop.f32.mrf.mxu0  ;;  %6613 = vst [vmem:[#allocation176_spill] sm:$0xff] %v4905_v43 }
 0x19a   :  { %v1319_v62 = vadd.f32 %v1318_v34, %v4011_v39  ;;  %6614 = vst [vmem:[#allocation177_spill] sm:$0xff] %v4911_v22  ;;  %v251_v39 = vld [vmem:[%s6234_s0 + $0x760] sm:$0xff] }
 0x19b   :  { %v4907_v25 = vadd.f32 %v1591_v47, %v1500_v21  ;;  %6615 = vst [vmem:[#allocation178_spill] sm:$0xff] %v4930_v2  ;;  %v250_v21 = vld [vmem:[%s6234_s0 + $0x758] sm:$0xff] }
 0x19c   :  { %v1410_v60 = vpop.f32.mrf.mxu1  ;;  %1365 = vmatmul.f32.gmra.mxu0 %v4896_v29 }
 0x19d   :  { %1549 = vmatmul.f32.gmra.mxu2 %v4902_v46  ;;  %1641 = vmatmul.f32.gmra.mxu3 %v4905_v43  ;;  %v1411_v55 = vadd.f32 %v1410_v60, %v1319_v62  ;;  %v4936_v43 = vmul.f32 %v4066_v61, %v251_v39  ;;  %v4939_v46 = vmul.f32 %v4068_v3, %v252_v49  ;;  %v259_v39 = vld [vmem:[%s6234_s0 + $0x7a0] sm:$0xff]  ;;  %v728_v49 = vld [vmem:[%s6236_s2 + $0x5e8] sm:$0xff] }
 0x19e   :  { %2296 = vmatpush.msrb.mxu3 %v728_v49  ;;  %v4973_v28 = vmul.f32 %v4059_v10, %v259_v39 }
 0x19f   :  { %1457 = vmatmul.f32.gmra.mxu1 %v4911_v22  ;;  %6616 = vst [vmem:[#allocation179_spill] sm:$0xff] %v4936_v43  ;;  %v4945_v22 = vmul.f32 %v4080_v18, %v250_v21 }
 0x1a0   :  { %v1502_v35 = vpop.f32.mrf.mxu2  ;;  %v1594_v47 = vpop.f32.mrf.mxu3  ;;  %6617 = vst [vmem:[#allocation180_spill] sm:$0xff] %v4939_v46 }
 0x1a1   :  { %v1503_v34 = vadd.f32 %v1502_v35, %v1411_v55  ;;  %v1321_v52 = vpop.f32.mrf.mxu0  ;;  %v664_v55 = vld [vmem:[%s6236_s2 + $0x3e8] sm:$0xff]  ;;  %v261_v35 = vld [vmem:[%s6234_s0 + $0x7b0] sm:$0xff] }
 0x1a2   :  { %v1322_v60 = vadd.f32 %v1321_v52, %v4050_v4  ;;  %v632_v4 = vld [vmem:[%s6236_s2 + $0x2e8] sm:$0xff]  ;;  %2112 = vmatpush.msrb.mxu1 %v664_v55  ;;  %v4979_v8 = vmul.f32 %v4066_v61, %v261_v35  ;;  %v23_v61 = vld [vmem:[%s6234_s0 + $0x40] sm:$0xff] }
 0x1a3   :  { %v4941_v62 = vadd.f32 %v1594_v47, %v1503_v34  ;;  %v262_v47 = vld [vmem:[%s6234_s0 + $0x7b8] sm:$0xff]  ;;  %2020 = vmatpush.msrb.mxu0 %v632_v4  ;;  %v24_v35 = vld [vmem:[%s6234_s0 + $0x48] sm:$0xff] }
 0x1a4   :  { %v1413_v29 = vpop.f32.mrf.mxu1  ;;  %1368 = vmatmul.f32.gmra.mxu0 %v4930_v2  ;;  %6618 = vst [vmem:[#allocation181_spill] sm:$0xff] %v4979_v8  ;;  %v4982_v4 = vmul.f32 %v4068_v3, %v262_v47  ;;  %v694_v3 = vld [vmem:[%s6236_s2 + $0x4d8] sm:$0xff] }
 0x1a5   :  { %1552 = vmatmul.f32.gmra.mxu2 %v4936_v43  ;;  %1644 = vmatmul.f32.gmra.mxu3 %v4939_v46  ;;  %v1414_v21 = vadd.f32 %v1413_v29, %v1322_v60  ;;  %v260_v46 = vld [vmem:[%s6234_s0 + $0x7a8] sm:$0xff] }
 0x1a6   :  { %6619 = vst [vmem:[#allocation182_spill] sm:$0xff] %v4982_v4  ;;  %v266_v29 = vld [vmem:[%s6235_s1 + $0x8] sm:$0x3]  ;;  %v4991_v39 = vmul.f32 %v4080_v18, %v260_v46  ;;  %2205 = vmatpush.msrb.mxu2 %v694_v3 }
 0x1a7   :  { %1460 = vmatmul.f32.gmra.mxu1 %v4945_v22  ;;  %v4994_v55 = vperm.slane %v266_v29, 0 }
 0x1a8   :  { %v1505_v34 = vpop.f32.mrf.mxu2  ;;  %v1597_v52 = vpop.f32.mrf.mxu3 }
 0x1a9   :  { %v1506_v43 = vadd.f32 %v1505_v34, %v1414_v21  ;;  %v1324_v2 = vpop.f32.mrf.mxu0 }
 0x1aa   :  { %v1325_v10 = vadd.f32 %v1324_v2, %v4094_v59  ;;  %v5005_v59 = vperm.slane %v266_v29, 1  ;;  %v5008_v2 = vmul.f32 %v4994_v55, %v23_v61  ;;  %v630_v29 = vld [vmem:[%s6236_s2 + $0x2d8] sm:$0xff] }
 0x1ab   :  { %v4987_v60 = vadd.f32 %v1597_v52, %v1506_v43  ;;  %v662_v61 = vld [vmem:[%s6236_s2 + $0x3d8] sm:$0xff]  ;;  %2021 = vmatpush.msrb.mxu0 %v630_v29 }
 0x1ac   :  { %v1416_v49 = vpop.f32.mrf.mxu1  ;;  %1371 = vmatmul.f32.gmra.mxu0 %v4973_v28  ;;  %2113 = vmatpush.msrb.mxu1 %v662_v61 }
 0x1ad   :  { %1555 = vmatmul.f32.gmra.mxu2 %v4979_v8  ;;  %1647 = vmatmul.f32.gmra.mxu3 %v4982_v4  ;;  %v1417_v18 = vadd.f32 %v1416_v49, %v1325_v10  ;;  %v5017_v10 = vmul.f32 %v5005_v59, %v24_v35  ;;  %v726_v49 = vld [vmem:[%s6236_s2 + $0x5d8] sm:$0xff]  ;;  %v6627_v4 = vld [vmem:[#allocation137_spill] sm:$0xff] }
 0x1ae   :  { %2297 = vmatpush.msrb.mxu3 %v726_v49  ;;  %v692_v49 = vld [vmem:[%s6236_s2 + $0x4c8] sm:$0xff]  ;;  %v6630_v8 = vld [vmem:[#allocation33_spill] sm:$0xff] }
 0x1af   :  { %1463 = vmatmul.f32.gmra.mxu1 %v4991_v39  ;;  %2206 = vmatpush.msrb.mxu2 %v692_v49 }
 0x1b0   :  { %v1508_v46 = vpop.f32.mrf.mxu2  ;;  %v1600_v43 = vpop.f32.mrf.mxu3 }
 0x1b1   :  { %v1509_v47 = vadd.f32 %v1508_v46, %v1417_v18  ;;  %v1327_v21 = vpop.f32.mrf.mxu0 }
 0x1b2   :  { %v1328_v52 = vadd.f32 %v1327_v21, %v4130_v7  ;;  %v33_v7 = vld [vmem:[%s6234_s0 + $0x90] sm:$0xff] }
 0x1b3   :  { %v5013_v34 = vadd.f32 %v1600_v43, %v1509_v47  ;;  %v5037_v35 = vmul.f32 %v4994_v55, %v33_v7  ;;  %v724_v7 = vld [vmem:[%s6236_s2 + $0x5c8] sm:$0xff] }
 0x1b4   :  { %v1419_v3 = vpop.f32.mrf.mxu1  ;;  %1667 = vmatmul.f32.vlgmr.msra.gmra.mxu0 %v5008_v2  ;;  %2298 = vmatpush.msrb.mxu3 %v724_v7 }
 0x1b5   :  { %1851 = vmatmul.f32.vlgmr.msra.gmra.mxu2 %v3134_v6  ;;  %1943 = vmatmul.f32.vlgmr.msra.gmra.mxu3 %v3155_v13  ;;  %v1420_v18 = vadd.f32 %v1419_v3, %v1328_v52  ;;  %v34_v6 = vld [vmem:[%s6234_s0 + $0x98] sm:$0xff]  ;;  %v43_v3 = vld [vmem:[%s6234_s0 + $0xe0] sm:$0xff] }
 0x1b6   :  { %v5046_v52 = vmul.f32 %v5005_v59, %v34_v6  ;;  %v44_v6 = vld [vmem:[%s6234_s0 + $0xe8] sm:$0xff] }
 0x1b7   :  { %2824 = vmatmul.msk.f32.vlgmr.msra.gmra.mxu1 %vm839_vm0, %v5017_v10 }
 0x1b8   :  { %v1511_v46 = vpop.f32.mrf.mxu2  ;;  %v1603_v43 = vpop.f32.mrf.mxu3 }
 0x1b9   :  { %v1512_v13 = vadd.f32 %v1511_v46, %v1420_v18  ;;  %v1330_v47 = vpop.f32.mrf.mxu0 }
 0x1ba   :  { %v1331_v29 = vadd.f32 %v1330_v47, %v4172_v42  ;;  %v628_v42 = vld [vmem:[%s6236_s2 + $0x2c8] sm:$0xff] }
 0x1bb   :  { %v5042_v21 = vadd.f32 %v1603_v43, %v1512_v13  ;;  %2022 = vmatpush.msrb.mxu0 %v628_v42  ;;  %v5069_v43 = vmul.f32 %v4994_v55, %v43_v3  ;;  %v53_v3 = vld [vmem:[%s6234_s0 + $0x130] sm:$0xff] }
 0x1bc   :  { %v1422_v61 = vpop.f32.mrf.mxu1  ;;  %1670 = vmatmul.f32.gmra.mxu0 %v5037_v35 }
 0x1bd   :  { %1854 = vmatmul.f32.gmra.mxu2 %v3192_v24  ;;  %1946 = vmatmul.f32.gmra.mxu3 %v3213_v31  ;;  %v1423_v18 = vadd.f32 %v1422_v61, %v1331_v29  ;;  %v660_v24 = vld [vmem:[%s6236_s2 + $0x3c8] sm:$0xff]  ;;  %v5078_v61 = vmul.f32 %v5005_v59, %v44_v6 }
 0x1be   :  { %2114 = vmatpush.msrb.mxu1 %v660_v24 }
 0x1bf   :  { %2825 = vmatmul.msk.f32.gmra.mxu1 %vm839_vm0, %v5046_v52 }
 0x1c0   :  { %v1514_v31 = vpop.f32.mrf.mxu2  ;;  %v1606_v46 = vpop.f32.mrf.mxu3 }
 0x1c1   :  { %v1515_v13 = vadd.f32 %v1514_v31, %v1423_v18  ;;  %v1333_v47 = vpop.f32.mrf.mxu0  ;;  %v5092_v31 = vmul.f32 %v4994_v55, %v53_v3  ;;  %v658_v3 = vld [vmem:[%s6236_s2 + $0x3b8] sm:$0xff] }
 0x1c2   :  { %v1334_v49 = vadd.f32 %v1333_v47, %v4205_v37  ;;  %v690_v37 = vld [vmem:[%s6236_s2 + $0x4b8] sm:$0xff]  ;;  %2115 = vmatpush.msrb.mxu1 %v658_v3  ;;  %v73_v3 = vld [vmem:[%s6234_s0 + $0x1d0] sm:$0xff] }
 0x1c3   :  { %v5074_v29 = vadd.f32 %v1606_v46, %v1515_v13  ;;  %2207 = vmatpush.msrb.mxu2 %v690_v37 }
 0x1c4   :  { %v1425_v42 = vpop.f32.mrf.mxu1  ;;  %1673 = vmatmul.f32.gmra.mxu0 %v5069_v43 }
 0x1c5   :  { %1857 = vmatmul.f32.gmra.mxu2 %v3244_v40  ;;  %1949 = vmatmul.f32.gmra.mxu3 %v3256_v44  ;;  %v1426_v7 = vadd.f32 %v1425_v42, %v1334_v49  ;;  %v54_v40 = vld [vmem:[%s6234_s0 + $0x138] sm:$0xff] }
 0x1c6   :  { %v5101_v47 = vmul.f32 %v5005_v59, %v54_v40  ;;  %v626_v49 = vld [vmem:[%s6236_s2 + $0x2b8] sm:$0xff] }
 0x1c7   :  { %2826 = vmatmul.msk.f32.gmra.mxu1 %vm839_vm0, %v5078_v61  ;;  %v722_v42 = vld [vmem:[%s6236_s2 + $0x5b8] sm:$0xff]  ;;  %2023 = vmatpush.msrb.mxu0 %v626_v49 }
 0x1c8   :  { %v1517_v18 = vpop.f32.mrf.mxu2  ;;  %v1609_v24 = vpop.f32.mrf.mxu3  ;;  %2299 = vmatpush.msrb.mxu3 %v722_v42 }
 0x1c9   :  { %v1518_v44 = vadd.f32 %v1517_v18, %v1426_v7  ;;  %v1336_v46 = vpop.f32.mrf.mxu0 }
 0x1ca   :  { %v1337_v13 = vadd.f32 %v1336_v46, %v4241_v15  ;;  %v63_v15 = vld [vmem:[%s6234_s0 + $0x180] sm:$0xff] }
 0x1cb   :  { %v5097_v6 = vadd.f32 %v1609_v24, %v1518_v44  ;;  %v5121_v40 = vmul.f32 %v4994_v55, %v63_v15  ;;  %v720_v15 = vld [vmem:[%s6236_s2 + $0x5a8] sm:$0xff] }
 0x1cc   :  { %v1428_v7 = vpop.f32.mrf.mxu1  ;;  %1676 = vmatmul.f32.gmra.mxu0 %v5092_v31  ;;  %2300 = vmatpush.msrb.mxu3 %v720_v15 }
 0x1cd   :  { %1860 = vmatmul.f32.gmra.mxu2 %v3281_v51  ;;  %1952 = vmatmul.f32.gmra.mxu3 %v3296_v57  ;;  %v1429_v37 = vadd.f32 %v1428_v7, %v1337_v13  ;;  %v64_v51 = vld [vmem:[%s6234_s0 + $0x188] sm:$0xff] }
 0x1ce   :  { %v5130_v13 = vmul.f32 %v5005_v59, %v64_v51  ;;  %v688_v7 = vld [vmem:[%s6236_s2 + $0x4a8] sm:$0xff] }
 0x1cf   :  { %2827 = vmatmul.msk.f32.gmra.mxu1 %vm839_vm0, %v5101_v47  ;;  %2208 = vmatpush.msrb.mxu2 %v688_v7 }
 0x1d0   :  { %v1520_v18 = vpop.f32.mrf.mxu2  ;;  %v1612_v24 = vpop.f32.mrf.mxu3 }
 0x1d1   :  { %v1521_v57 = vadd.f32 %v1520_v18, %v1429_v37  ;;  %v1339_v44 = vpop.f32.mrf.mxu0  ;;  %v5150_v18 = vmul.f32 %v4994_v55, %v73_v3  ;;  %v83_v3 = vld [vmem:[%s6234_s0 + $0x220] sm:$0xff] }
 0x1d2   :  { %v1340_v49 = vadd.f32 %v1339_v44, %v4280_v9  ;;  %v624_v9 = vld [vmem:[%s6236_s2 + $0x2a8] sm:$0xff] }
 0x1d3   :  { %v5126_v46 = vadd.f32 %v1612_v24, %v1521_v57  ;;  %2024 = vmatpush.msrb.mxu0 %v624_v9  ;;  %v74_v24 = vld [vmem:[%s6234_s0 + $0x1d8] sm:$0xff] }
 0x1d4   :  { %v1431_v42 = vpop.f32.mrf.mxu1  ;;  %1679 = vmatmul.f32.gmra.mxu0 %v5121_v40 }
 0x1d5   :  { %1863 = vmatmul.f32.gmra.mxu2 %v3315_v0  ;;  %1955 = vmatmul.f32.gmra.mxu3 %v3327_v5  ;;  %v1432_v37 = vadd.f32 %v1431_v42, %v1340_v49  ;;  %v5159_v49 = vmul.f32 %v5005_v59, %v74_v24  ;;  %v656_v42 = vld [vmem:[%s6236_s2 + $0x3a8] sm:$0xff] }
 0x1d6   :  { %2116 = vmatpush.msrb.mxu1 %v656_v42  ;;  %v622_v42 = vld [vmem:[%s6236_s2 + $0x298] sm:$0xff] }
 0x1d7   :  { %2828 = vmatmul.msk.f32.gmra.mxu1 %vm839_vm0, %v5130_v13  ;;  %2025 = vmatpush.msrb.mxu0 %v622_v42 }
 0x1d8   :  { %v1523_v0 = vpop.f32.mrf.mxu2  ;;  %v1615_v5 = vpop.f32.mrf.mxu3 }
 0x1d9   :  { %v1524_v51 = vadd.f32 %v1523_v0, %v1432_v37  ;;  %v1342_v57 = vpop.f32.mrf.mxu0  ;;  %v5173_v0 = vmul.f32 %v4994_v55, %v83_v3 }
 0x1da   :  { %v1343_v7 = vadd.f32 %v1342_v57, %v4313_v50 }
 0x1db   :  { %v5155_v44 = vadd.f32 %v1615_v5, %v1524_v51  ;;  %v84_v5 = vld [vmem:[%s6234_s0 + $0x228] sm:$0xff] }
 0x1dc   :  { %v1434_v9 = vpop.f32.mrf.mxu1  ;;  %1682 = vmatmul.f32.gmra.mxu0 %v5150_v18  ;;  %v5182_v57 = vmul.f32 %v5005_v59, %v84_v5 }
 0x1dd   :  { %1866 = vmatmul.f32.gmra.mxu2 %v3352_v16  ;;  %1958 = vmatmul.f32.gmra.mxu3 %v3364_v20  ;;  %v1435_v50 = vadd.f32 %v1434_v9, %v1343_v7  ;;  %v686_v7 = vld [vmem:[%s6236_s2 + $0x498] sm:$0xff] }
 0x1de   :  { %v718_v9 = vld [vmem:[%s6236_s2 + $0x598] sm:$0xff]  ;;  %2209 = vmatpush.msrb.mxu2 %v686_v7 }
 0x1df   :  { %2829 = vmatmul.msk.f32.gmra.mxu1 %vm839_vm0, %v5159_v49  ;;  %2301 = vmatpush.msrb.mxu3 %v718_v9 }
 0x1e0   :  { %v1526_v15 = vpop.f32.mrf.mxu2  ;;  %v1618_v37 = vpop.f32.mrf.mxu3 }
 0x1e1   :  { %v1527_v16 = vadd.f32 %v1526_v15, %v1435_v50  ;;  %v1345_v24 = vpop.f32.mrf.mxu0  ;;  %v654_v50 = vld [vmem:[%s6236_s2 + $0x398] sm:$0xff] }
 0x1e2   :  { %v1346_v51 = vadd.f32 %v1345_v24, %v4352_v14  ;;  %v93_v14 = vld [vmem:[%s6234_s0 + $0x270] sm:$0xff]  ;;  %2117 = vmatpush.msrb.mxu1 %v654_v50  ;;  %v620_v50 = vld [vmem:[%s6236_s2 + $0x288] sm:$0xff] }
 0x1e3   :  { %v5178_v20 = vadd.f32 %v1618_v37, %v1527_v16  ;;  %2026 = vmatpush.msrb.mxu0 %v620_v50 }
 0x1e4   :  { %v1437_v3 = vpop.f32.mrf.mxu1  ;;  %1685 = vmatmul.f32.gmra.mxu0 %v5173_v0 }
 0x1e5   :  { %1869 = vmatmul.f32.gmra.mxu2 %v3389_v30  ;;  %1961 = vmatmul.f32.gmra.mxu3 %v3404_v36  ;;  %v1438_v15 = vadd.f32 %v1437_v3, %v1346_v51  ;;  %v5205_v30 = vmul.f32 %v4994_v55, %v93_v14  ;;  %v94_v36 = vld [vmem:[%s6234_s0 + $0x278] sm:$0xff]  ;;  %v103_v3 = vld [vmem:[%s6234_s0 + $0x2c0] sm:$0xff]  ;;  %v684_v14 = vld [vmem:[%s6236_s2 + $0x488] sm:$0xff] }
 0x1e6   :  { %v5214_v51 = vmul.f32 %v5005_v59, %v94_v36  ;;  %2210 = vmatpush.msrb.mxu2 %v684_v14 }
 0x1e7   :  { %2830 = vmatmul.msk.f32.gmra.mxu1 %vm839_vm0, %v5182_v57 }
 0x1e8   :  { %v1529_v37 = vpop.f32.mrf.mxu2  ;;  %v1621_v5 = vpop.f32.mrf.mxu3 }
 0x1e9   :  { %v1530_v16 = vadd.f32 %v1529_v37, %v1438_v15  ;;  %v1348_v24 = vpop.f32.mrf.mxu0  ;;  %v5234_v37 = vmul.f32 %v4994_v55, %v103_v3  ;;  %v652_v3 = vld [vmem:[%s6236_s2 + $0x388] sm:$0xff] }
 0x1ea   :  { %v1349_v42 = vadd.f32 %v1348_v24, %v4391_v26  ;;  %2118 = vmatpush.msrb.mxu1 %v652_v3  ;;  %v618_v3 = vld [vmem:[%s6236_s2 + $0x278] sm:$0xff] }
 0x1eb   :  { %v5210_v7 = vadd.f32 %v1621_v5, %v1530_v16  ;;  %v104_v5 = vld [vmem:[%s6234_s0 + $0x2c8] sm:$0xff]  ;;  %2027 = vmatpush.msrb.mxu0 %v618_v3 }
 0x1ec   :  { %v1440_v9 = vpop.f32.mrf.mxu1  ;;  %1688 = vmatmul.f32.gmra.mxu0 %v5205_v30 }
 0x1ed   :  { %1872 = vmatmul.f32.gmra.mxu2 %v3420_v41  ;;  %1964 = vmatmul.f32.gmra.mxu3 %v3432_v48  ;;  %v1441_v26 = vadd.f32 %v1440_v9, %v1349_v42  ;;  %v716_v41 = vld [vmem:[%s6236_s2 + $0x588] sm:$0xff]  ;;  %v5243_v9 = vmul.f32 %v5005_v59, %v104_v5 }
 0x1ee   :  { %2302 = vmatpush.msrb.mxu3 %v716_v41 }
 0x1ef   :  { %2831 = vmatmul.msk.f32.gmra.mxu1 %vm839_vm0, %v5214_v51 }
 0x1f0   :  { %v1532_v48 = vpop.f32.mrf.mxu2  ;;  %v1624_v15 = vpop.f32.mrf.mxu3 }
 0x1f1   :  { %v1533_v36 = vadd.f32 %v1532_v48, %v1441_v26  ;;  %v1351_v16 = vpop.f32.mrf.mxu0  ;;  %v113_v26 = vld [vmem:[%s6234_s0 + $0x310] sm:$0xff] }
 0x1f2   :  { %v1352_v42 = vadd.f32 %v1351_v16, %v4421_v56  ;;  %v5257_v48 = vmul.f32 %v4994_v55, %v113_v26 }
 0x1f3   :  { %v5239_v24 = vadd.f32 %v1624_v15, %v1533_v36  ;;  %v114_v15 = vld [vmem:[%s6234_s0 + $0x318] sm:$0xff] }
 0x1f4   :  { %v1443_v14 = vpop.f32.mrf.mxu1  ;;  %1691 = vmatmul.f32.gmra.mxu0 %v5234_v37  ;;  %v5266_v16 = vmul.f32 %v5005_v59, %v114_v15 }
 0x1f5   :  { %1875 = vmatmul.f32.gmra.mxu2 %v3460_v63  ;;  %1967 = vmatmul.f32.gmra.mxu3 %v3472_v11  ;;  %v1444_v56 = vadd.f32 %v1443_v14, %v1352_v42  ;;  %v682_v42 = vld [vmem:[%s6236_s2 + $0x478] sm:$0xff] }
 0x1f6   :  { %6620 = vst [vmem:[#allocation183_spill] sm:$0xff] %v5266_v16  ;;  %v714_v14 = vld [vmem:[%s6236_s2 + $0x578] sm:$0xff]  ;;  %2211 = vmatpush.msrb.mxu2 %v682_v42 }
 0x1f7   :  { %2832 = vmatmul.msk.f32.gmra.mxu1 %vm839_vm0, %v5243_v9  ;;  %2303 = vmatpush.msrb.mxu3 %v714_v14 }
 0x1f8   :  { %v1535_v50 = vpop.f32.mrf.mxu2  ;;  %v1627_v41 = vpop.f32.mrf.mxu3 }
 0x1f9   :  { %v1536_v63 = vadd.f32 %v1535_v50, %v1444_v56  ;;  %v1354_v5 = vpop.f32.mrf.mxu0  ;;  %v650_v56 = vld [vmem:[%s6236_s2 + $0x378] sm:$0xff] }
 0x1fa   :  { %v1355_v36 = vadd.f32 %v1354_v5, %v4463_v19  ;;  %v123_v19 = vld [vmem:[%s6234_s0 + $0x360] sm:$0xff]  ;;  %2119 = vmatpush.msrb.mxu1 %v650_v56 }
 0x1fb   :  { %v5262_v11 = vadd.f32 %v1627_v41, %v1536_v63 }
 0x1fc   :  { %v1446_v26 = vpop.f32.mrf.mxu1  ;;  %1694 = vmatmul.f32.gmra.mxu0 %v5257_v48 }
 0x1fd   :  { %1878 = vmatmul.f32.gmra.mxu2 %v3497_v23  ;;  %1970 = vmatmul.f32.gmra.mxu3 %v3509_v32  ;;  %v1447_v50 = vadd.f32 %v1446_v26, %v1355_v36  ;;  %v5289_v23 = vmul.f32 %v4994_v55, %v123_v19  ;;  %v124_v32 = vld [vmem:[%s6234_s0 + $0x368] sm:$0xff]  ;;  %v133_v26 = vld [vmem:[%s6234_s0 + $0x3b0] sm:$0xff] }
 0x1fe   :  { %v5298_v36 = vmul.f32 %v5005_v59, %v124_v32  ;;  %v680_v19 = vld [vmem:[%s6236_s2 + $0x468] sm:$0xff] }
 0x1ff   :  { %2833 = vmatmul.msk.f32.gmra.mxu1 %vm839_vm0, %v5266_v16  ;;  %6621 = vst [vmem:[#allocation184_spill] sm:$0xff] %v5289_v23  ;;  %2212 = vmatpush.msrb.mxu2 %v680_v19  ;;  %v6647_v16 = vld [vmem:[#allocation49_spill] sm:$0xff] }
 0x200   :  { %v1538_v41 = vpop.f32.mrf.mxu2  ;;  %v1630_v15 = vpop.f32.mrf.mxu3  ;;  %6622 = vst [vmem:[#allocation185_spill] sm:$0xff] %v5298_v36 }
 0x201   :  { %v1539_v63 = vadd.f32 %v1538_v41, %v1447_v50  ;;  %v1357_v5 = vpop.f32.mrf.mxu0  ;;  %v5312_v41 = vmul.f32 %v4994_v55, %v133_v26  ;;  %v648_v26 = vld [vmem:[%s6236_s2 + $0x368] sm:$0xff] }
 0x202   :  { %v1358_v3 = vadd.f32 %v1357_v5, %v4496_v58  ;;  %2120 = vmatpush.msrb.mxu1 %v648_v26  ;;  %v678_v26 = vld [vmem:[%s6236_s2 + $0x458] sm:$0xff] }
 0x203   :  { %v5294_v42 = vadd.f32 %v1630_v15, %v1539_v63  ;;  %6623 = vst [vmem:[#allocation186_spill] sm:$0xff] %v5312_v41  ;;  %2213 = vmatpush.msrb.mxu2 %v678_v26 }
 0x204   :  { %v1449_v14 = vpop.f32.mrf.mxu1  ;;  %1697 = vmatmul.f32.gmra.mxu0 %v5289_v23  ;;  %v6646_v23 = vld [vmem:[#allocation46_spill] sm:$0xff] }
 0x205   :  { %1881 = vmatmul.f32.gmra.mxu2 %v3528_v45  ;;  %1973 = vmatmul.f32.gmra.mxu3 %v3540_v53  ;;  %v1450_v58 = vadd.f32 %v1449_v14, %v1358_v3  ;;  %v134_v45 = vld [vmem:[%s6234_s0 + $0x3b8] sm:$0xff]  ;;  %v616_v3 = vld [vmem:[%s6236_s2 + $0x268] sm:$0xff] }
 0x206   :  { %v5321_v5 = vmul.f32 %v5005_v59, %v134_v45  ;;  %v712_v14 = vld [vmem:[%s6236_s2 + $0x568] sm:$0xff]  ;;  %2028 = vmatpush.msrb.mxu0 %v616_v3 }
 0x207   :  { %2834 = vmatmul.msk.f32.gmra.mxu1 %vm839_vm0, %v5298_v36  ;;  %2304 = vmatpush.msrb.mxu3 %v712_v14  ;;  %v6635_v36 = vld [vmem:[#allocation37_spill] sm:$0xff] }
 0x208   :  { %v1541_v56 = vpop.f32.mrf.mxu2  ;;  %v1633_v50 = vpop.f32.mrf.mxu3  ;;  %6624 = vst [vmem:[#allocation187_spill] sm:$0xff] %v5321_v5 }
 0x209   :  { %v1542_v53 = vadd.f32 %v1541_v56, %v1450_v58  ;;  %v1360_v15 = vpop.f32.mrf.mxu0  ;;  %v143_v58 = vld [vmem:[%s6234_s0 + $0x400] sm:$0xff] }
 0x20a   :  { %v1361_v63 = vadd.f32 %v1360_v15, %v4532_v12  ;;  %v6625_v12 = vld [vmem:[#allocation29_spill] sm:$0xff] }
 0x20b   :  { %v5317_v32 = vadd.f32 %v1633_v50, %v1542_v53  ;;  %v5341_v53 = vmul.f32 %v4994_v55, %v143_v58  ;;  %v6629_v58 = vld [vmem:[#allocation30_spill] sm:$0xff] }
 0x20c   :  { %v1452_v19 = vpop.f32.mrf.mxu1  ;;  %1700 = vmatmul.f32.gmra.mxu0 %v5312_v41 }
 0x20d   :  { %1884 = vmatmul.f32.gmra.mxu2 %v3568_v17  ;;  %1976 = vmatmul.f32.gmra.mxu3 %v6625_v12  ;;  %v1453_v56 = vadd.f32 %v1452_v19, %v1361_v63  ;;  %6626 = vst [vmem:[#allocation29_spill] sm:$0xff] %v5341_v53  ;;  %v144_v17 = vld [vmem:[%s6234_s0 + $0x408] sm:$0xff] }
 0x20e   :  { %v5350_v63 = vmul.f32 %v5005_v59, %v144_v17 }
 0x20f   :  { %2835 = vmatmul.msk.f32.gmra.mxu1 %vm839_vm0, %v5321_v5 }
 0x210   :  { %v1544_v50 = vpop.f32.mrf.mxu2  ;;  %v1636_v45 = vpop.f32.mrf.mxu3  ;;  %6628 = vst [vmem:[#allocation137_spill] sm:$0xff] %v5350_v63 }
 0x211   :  { %v1545_v15 = vadd.f32 %v1544_v50, %v1453_v56  ;;  %v1363_v14 = vpop.f32.mrf.mxu0  ;;  %v153_v56 = vld [vmem:[%s6234_s0 + $0x450] sm:$0xff]  ;;  %v614_v50 = vld [vmem:[%s6236_s2 + $0x258] sm:$0xff] }
 0x212   :  { %v1364_v3 = vadd.f32 %v1363_v14, %v6627_v4  ;;  %v5373_v14 = vmul.f32 %v4994_v55, %v153_v56  ;;  %2029 = vmatpush.msrb.mxu0 %v614_v50  ;;  %v6634_v56 = vld [vmem:[#allocation34_spill] sm:$0xff] }
 0x213   :  { %v5346_v12 = vadd.f32 %v1636_v45, %v1545_v15  ;;  %v710_v45 = vld [vmem:[%s6236_s2 + $0x558] sm:$0xff] }
 0x214   :  { %v1455_v19 = vpop.f32.mrf.mxu1  ;;  %1703 = vmatmul.f32.gmra.mxu0 %v5341_v53  ;;  %6631 = vst [vmem:[#allocation30_spill] sm:$0xff] %v5373_v14  ;;  %2305 = vmatpush.msrb.mxu3 %v710_v45 }
 0x215   :  { %1887 = vmatmul.f32.gmra.mxu2 %v6629_v58  ;;  %1979 = vmatmul.f32.gmra.mxu3 %v6630_v8  ;;  %v1456_v4 = vadd.f32 %v1455_v19, %v1364_v3  ;;  %v646_v8 = vld [vmem:[%s6236_s2 + $0x358] sm:$0xff] }
 0x216   :  { %v154_v3 = vld [vmem:[%s6234_s0 + $0x458] sm:$0xff]  ;;  %2121 = vmatpush.msrb.mxu1 %v646_v8 }
 0x217   :  { %2836 = vmatmul.msk.f32.gmra.mxu1 %vm839_vm0, %v5350_v63  ;;  %v6632_v63 = vld [vmem:[#allocation142_spill] sm:$0xff]  ;;  %v5382_v5 = vmul.f32 %v5005_v59, %v154_v3 }
 0x218   :  { %v1547_v17 = vpop.f32.mrf.mxu2  ;;  %v1639_v15 = vpop.f32.mrf.mxu3 }
 0x219   :  { %v1548_v26 = vadd.f32 %v1547_v17, %v1456_v4  ;;  %v1366_v19 = vpop.f32.mrf.mxu0  ;;  %6633 = vst [vmem:[#allocation33_spill] sm:$0xff] %v5382_v5  ;;  %v163_v4 = vld [vmem:[%s6234_s0 + $0x4a0] sm:$0xff] }
 0x21a   :  { %v1367_v53 = vadd.f32 %v1366_v19, %v6632_v63  ;;  %v676_v63 = vld [vmem:[%s6236_s2 + $0x448] sm:$0xff]  ;;  %v5396_v17 = vmul.f32 %v4994_v55, %v163_v4 }
 0x21b   :  { %v5378_v58 = vadd.f32 %v1639_v15, %v1548_v26  ;;  %2214 = vmatpush.msrb.mxu2 %v676_v63  ;;  %v644_v26 = vld [vmem:[%s6236_s2 + $0x348] sm:$0xff] }
 0x21c   :  { %v1458_v41 = vpop.f32.mrf.mxu1  ;;  %1706 = vmatmul.f32.gmra.mxu0 %v5373_v14  ;;  %6636 = vst [vmem:[#allocation142_spill] sm:$0xff] %v5396_v17  ;;  %2122 = vmatpush.msrb.mxu1 %v644_v26 }
 0x21d   :  { %1890 = vmatmul.f32.gmra.mxu2 %v6634_v56  ;;  %1982 = vmatmul.f32.gmra.mxu3 %v6635_v36  ;;  %v1459_v50 = vadd.f32 %v1458_v41, %v1367_v53  ;;  %v164_v36 = vld [vmem:[%s6234_s0 + $0x4a8] sm:$0xff]  ;;  %v6637_v56 = vld [vmem:[#allocation147_spill] sm:$0xff] }
 0x21e   :  { %v612_v41 = vld [vmem:[%s6236_s2 + $0x248] sm:$0xff] }
 0x21f   :  { %2837 = vmatmul.msk.f32.gmra.mxu1 %vm839_vm0, %v5382_v5  ;;  %v708_v53 = vld [vmem:[%s6236_s2 + $0x548] sm:$0xff]  ;;  %2030 = vmatpush.msrb.mxu0 %v612_v41  ;;  %v6640_v5 = vld [vmem:[#allocation41_spill] sm:$0xff] }
 0x220   :  { %v1550_v45 = vpop.f32.mrf.mxu2  ;;  %v1642_v8 = vpop.f32.mrf.mxu3  ;;  %2306 = vmatpush.msrb.mxu3 %v708_v53  ;;  %v173_v41 = vld [vmem:[%s6234_s0 + $0x4f0] sm:$0xff] }
 0x221   :  { %v1551_v15 = vadd.f32 %v1550_v45, %v1459_v50  ;;  %v1369_v3 = vpop.f32.mrf.mxu0  ;;  %v5414_v50 = vmul.f32 %v5005_v59, %v164_v36  ;;  %v6639_v45 = vld [vmem:[#allocation38_spill] sm:$0xff]  ;;  %v5425_v36 = vmul.f32 %v4994_v55, %v173_v41 }
 0x222   :  { %v1370_v4 = vadd.f32 %v1369_v3, %v6637_v56  ;;  %v174_v3 = vld [vmem:[%s6234_s0 + $0x4f8] sm:$0xff] }
 0x223   :  { %v5410_v19 = vadd.f32 %v1642_v8, %v1551_v15  ;;  %6638 = vst [vmem:[#allocation34_spill] sm:$0xff] %v5414_v50 }
 0x224   :  { %v1461_v63 = vpop.f32.mrf.mxu1  ;;  %1709 = vmatmul.f32.gmra.mxu0 %v5396_v17  ;;  %6641 = vst [vmem:[#allocation37_spill] sm:$0xff] %v5425_v36  ;;  %v6644_v17 = vld [vmem:[#allocation45_spill] sm:$0xff] }
 0x225   :  { %1893 = vmatmul.f32.gmra.mxu2 %v6639_v45  ;;  %1985 = vmatmul.f32.gmra.mxu3 %v6640_v5  ;;  %v1462_v53 = vadd.f32 %v1461_v63, %v1370_v4  ;;  %v674_v5 = vld [vmem:[%s6236_s2 + $0x438] sm:$0xff]  ;;  %v5437_v63 = vmul.f32 %v5005_v59, %v174_v3 }
 0x226   :  { %2215 = vmatpush.msrb.mxu2 %v674_v5 }
 0x227   :  { %2838 = vmatmul.msk.f32.gmra.mxu1 %vm839_vm0, %v5414_v50  ;;  %6642 = vst [vmem:[#allocation147_spill] sm:$0xff] %v5437_v63  ;;  %v6643_v50 = vld [vmem:[#allocation42_spill] sm:$0xff] }
 0x228   :  { %v1553_v8 = vpop.f32.mrf.mxu2  ;;  %v1645_v15 = vpop.f32.mrf.mxu3 }
 0x229   :  { %v1554_v26 = vadd.f32 %v1553_v8, %v1462_v53  ;;  %v1372_v56 = vpop.f32.mrf.mxu0  ;;  %v183_v53 = vld [vmem:[%s6234_s0 + $0x540] sm:$0xff] }
 0x22a   :  { %v1373_v4 = vadd.f32 %v1372_v56, %v4682_v27  ;;  %v610_v27 = vld [vmem:[%s6236_s2 + $0x238] sm:$0xff]  ;;  %v184_v56 = vld [vmem:[%s6234_s0 + $0x548] sm:$0xff] }
 0x22b   :  { %v5433_v45 = vadd.f32 %v1645_v15, %v1554_v26  ;;  %v706_v15 = vld [vmem:[%s6236_s2 + $0x538] sm:$0xff]  ;;  %v5457_v26 = vmul.f32 %v4994_v55, %v183_v53  ;;  %2031 = vmatpush.msrb.mxu0 %v610_v27 }
 0x22c   :  { %v1464_v41 = vpop.f32.mrf.mxu1  ;;  %1712 = vmatmul.f32.gmra.mxu0 %v5425_v36  ;;  %2307 = vmatpush.msrb.mxu3 %v706_v15  ;;  %v5466_v36 = vmul.f32 %v5005_v59, %v184_v56  ;;  %v608_v56 = vld [vmem:[%s6236_s2 + $0x228] sm:$0xff] }
 0x22d   :  { %1896 = vmatmul.f32.gmra.mxu2 %v6643_v50  ;;  %1988 = vmatmul.f32.gmra.mxu3 %v6644_v17  ;;  %v1465_v8 = vadd.f32 %v1464_v41, %v1373_v4  ;;  %v642_v17 = vld [vmem:[%s6236_s2 + $0x338] sm:$0xff] }
 0x22e   :  { %2123 = vmatpush.msrb.mxu1 %v642_v17  ;;  %6645 = vst [vmem:[#allocation38_spill] sm:$0xff] %v5466_v36  ;;  %v672_v17 = vld [vmem:[%s6236_s2 + $0x428] sm:$0xff]  ;;  %2032 = vmatpush.msrb.mxu0 %v608_v56 }
 0x22f   :  { %2839 = vmatmul.msk.f32.gmra.mxu1 %vm839_vm0, %v5437_v63  ;;  %2216 = vmatpush.msrb.mxu2 %v672_v17 }
 0x230   :  { %v1556_v50 = vpop.f32.mrf.mxu2  ;;  %v1648_v3 = vpop.f32.mrf.mxu3 }
 0x231   :  { %v1557_v5 = vadd.f32 %v1556_v50, %v1465_v8  ;;  %v1668_v4 = vpop.f32.mrf.mxu0  ;;  %v193_v8 = vld [vmem:[%s6234_s0 + $0x590] sm:$0xff]  ;;  %v6649_v50 = vld [vmem:[#allocation160_spill] sm:$0xff] }
 0x232   :  { %v1669_v41 = vadd.f32 %v1668_v4, %v4713_v33  ;;  %v5477_v15 = vmul.f32 %v4994_v55, %v193_v8  ;;  %v6651_v8 = vld [vmem:[#allocation50_spill] sm:$0xff] }
 0x233   :  { %v5463_v63 = vadd.f32 %v1648_v3, %v1557_v5  ;;  %v704_v5 = vld [vmem:[%s6236_s2 + $0x528] sm:$0xff] }
 0x234   :  { %v1760_v14 = vpop.f32.mrf.mxu1  ;;  %1715 = vmatmul.f32.gmra.mxu0 %v5457_v26  ;;  %6648 = vst [vmem:[#allocation41_spill] sm:$0xff] %v5477_v15  ;;  %2308 = vmatpush.msrb.mxu3 %v704_v5 }
 0x235   :  { %v1761_v53 = vadd.f32 %v1760_v14, %v1669_v41  ;;  %1899 = vmatmul.f32.gmra.mxu2 %v6646_v23  ;;  %1991 = vmatmul.f32.gmra.mxu3 %v6647_v16  ;;  %v194_v14 = vld [vmem:[%s6234_s0 + $0x598] sm:$0xff] }
 0x236   :  { %v5495_v4 = vmul.f32 %v5005_v59, %v194_v14  ;;  %v640_v14 = vld [vmem:[%s6236_s2 + $0x328] sm:$0xff] }
 0x237   :  { %2755 = vst [vmem:[#allocation2] sm:$0xff] %v1761_v53  ;;  %2840 = vmatmul.msk.f32.gmra.mxu1 %vm839_vm0, %v5466_v36  ;;  %v6755_v36 = vld [vmem:[#allocation161_spill] sm:$0xff] }
 0x238   :  { %v1852_v33 = vpop.f32.mrf.mxu2  ;;  %v1944_v27 = vpop.f32.mrf.mxu3  ;;  %6650 = vst [vmem:[#allocation42_spill] sm:$0xff] %v5495_v4  ;;  %2124 = vmatpush.msrb.mxu1 %v640_v14  ;;  %v213_v14 = vld [vmem:[%s6234_s0 + $0x630] sm:$0xff] }
 0x239   :  { %v5482_v23 = vadd.f32 %v1944_v27, %v1852_v33  ;;  %v1671_v16 = vpop.f32.mrf.mxu0  ;;  %v6652_v33 = vld [vmem:[#allocation53_spill] sm:$0xff]  ;;  %v203_v27 = vld [vmem:[%s6234_s0 + $0x5e0] sm:$0xff] }
 0x23a   :  { %v1672_v3 = vadd.f32 %v1671_v16, %v6649_v50  ;;  %v5509_v50 = vmul.f32 %v4994_v55, %v203_v27  ;;  %v6656_v27 = vld [vmem:[#allocation57_spill] sm:$0xff] }
 0x23c   :  { %v1763_v41 = vpop.f32.mrf.mxu1  ;;  %1718 = vmatmul.f32.gmra.mxu0 %v5477_v15  ;;  %6653 = vst [vmem:[#allocation45_spill] sm:$0xff] %v5509_v50 }
 0x23d   :  { %v1764_v53 = vadd.f32 %v1763_v41, %v1672_v3  ;;  %1902 = vmatmul.f32.gmra.mxu2 %v6651_v8  ;;  %1994 = vmatmul.f32.gmra.mxu3 %v6652_v33  ;;  %v204_v3 = vld [vmem:[%s6234_s0 + $0x5e8] sm:$0xff] }
 0x23f   :  { %2758 = vst [vmem:[#allocation2 + $0x10] sm:$0xff] %v1764_v53  ;;  %2841 = vmatmul.msk.f32.gmra.mxu1 %vm839_vm0, %v5495_v4  ;;  %v5518_v53 = vmul.f32 %v5005_v59, %v204_v3  ;;  %v6655_v4 = vld [vmem:[#allocation54_spill] sm:$0xff] }
 0x240   :  { %v1855_v16 = vpop.f32.mrf.mxu2  ;;  %v1947_v17 = vpop.f32.mrf.mxu3 }
 0x241   :  { %v5514_v56 = vadd.f32 %v1947_v17, %v1855_v16  ;;  %v1674_v5 = vpop.f32.mrf.mxu0  ;;  %6654 = vst [vmem:[#allocation46_spill] sm:$0xff] %v5518_v53  ;;  %v606_v16 = vld [vmem:[%s6236_s2 + $0x218] sm:$0xff] }
 0x242   :  { %v1675_v41 = vadd.f32 %v1674_v5, %v4796_v1  ;;  %v670_v1 = vld [vmem:[%s6236_s2 + $0x418] sm:$0xff]  ;;  %v5538_v5 = vmul.f32 %v4994_v55, %v213_v14  ;;  %2033 = vmatpush.msrb.mxu0 %v606_v16  ;;  %v6660_v16 = vld [vmem:[#allocation61_spill] sm:$0xff] }
 0x243   :  { %2217 = vmatpush.msrb.mxu2 %v670_v1  ;;  %v6659_v1 = vld [vmem:[#allocation58_spill] sm:$0xff] }
 0x244   :  { %v1766_v8 = vpop.f32.mrf.mxu1  ;;  %1721 = vmatmul.f32.gmra.mxu0 %v5509_v50  ;;  %6657 = vst [vmem:[#allocation49_spill] sm:$0xff] %v5538_v5 }
 0x245   :  { %v1767_v33 = vadd.f32 %v1766_v8, %v1675_v41  ;;  %1905 = vmatmul.f32.gmra.mxu2 %v6655_v4  ;;  %1997 = vmatmul.f32.gmra.mxu3 %v6656_v27  ;;  %v702_v4 = vld [vmem:[%s6236_s2 + $0x518] sm:$0xff] }
 0x246   :  { %v214_v41 = vld [vmem:[%s6234_s0 + $0x638] sm:$0xff]  ;;  %2309 = vmatpush.msrb.mxu3 %v702_v4  ;;  %v223_v4 = vld [vmem:[%s6234_s0 + $0x680] sm:$0xff] }
 0x247   :  { %2760 = vst [vmem:[#allocation2 + $0x20] sm:$0xff] %v1767_v33  ;;  %2842 = vmatmul.msk.f32.gmra.mxu1 %vm839_vm0, %v5518_v53  ;;  %v638_v27 = vld [vmem:[%s6236_s2 + $0x318] sm:$0xff]  ;;  %v5550_v14 = vmul.f32 %v5005_v59, %v214_v41 }
 0x248   :  { %v1858_v17 = vpop.f32.mrf.mxu2  ;;  %v1950_v3 = vpop.f32.mrf.mxu3  ;;  %2125 = vmatpush.msrb.mxu1 %v638_v27  ;;  %v604_v27 = vld [vmem:[%s6236_s2 + $0x208] sm:$0xff] }
 0x249   :  { %v5543_v8 = vadd.f32 %v1950_v3, %v1858_v17  ;;  %v1677_v33 = vpop.f32.mrf.mxu0  ;;  %6658 = vst [vmem:[#allocation160_spill] sm:$0xff] %v5550_v14  ;;  %v5561_v3 = vmul.f32 %v4994_v55, %v223_v4  ;;  %2034 = vmatpush.msrb.mxu0 %v604_v27 }
 0x24a   :  { %v1678_v53 = vadd.f32 %v1677_v33, %v4827_v54  ;;  %v668_v33 = vld [vmem:[%s6236_s2 + $0x408] sm:$0xff] }
 0x24b   :  { %6661 = vst [vmem:[#allocation50_spill] sm:$0xff] %v5561_v3  ;;  %2218 = vmatpush.msrb.mxu2 %v668_v33 }
 0x24c   :  { %v1769_v50 = vpop.f32.mrf.mxu1  ;;  %1724 = vmatmul.f32.gmra.mxu0 %v5538_v5 }
 0x24d   :  { %v1770_v15 = vadd.f32 %v1769_v50, %v1678_v53  ;;  %1908 = vmatmul.f32.gmra.mxu2 %v6659_v1  ;;  %2000 = vmatmul.f32.gmra.mxu3 %v6660_v16  ;;  %v224_v50 = vld [vmem:[%s6234_s0 + $0x688] sm:$0xff] }
 0x24e   :  { %v700_v1 = vld [vmem:[%s6236_s2 + $0x508] sm:$0xff]  ;;  %v5579_v16 = vmul.f32 %v5005_v59, %v224_v50 }
 0x24f   :  { %2762 = vst [vmem:[#allocation2 + $0x30] sm:$0xff] %v1770_v15  ;;  %2843 = vmatmul.msk.f32.gmra.mxu1 %vm839_vm0, %v5550_v14  ;;  %2310 = vmatpush.msrb.mxu3 %v700_v1  ;;  %v636_v50 = vld [vmem:[%s6236_s2 + $0x308] sm:$0xff]  ;;  %v234_v1 = vld [vmem:[%s6234_s0 + $0x6d8] sm:$0xff] }
 0x250   :  { %v1861_v54 = vpop.f32.mrf.mxu2  ;;  %v1953_v17 = vpop.f32.mrf.mxu3  ;;  %6662 = vst [vmem:[#allocation53_spill] sm:$0xff] %v5579_v16  ;;  %2126 = vmatpush.msrb.mxu1 %v636_v50  ;;  %v6667_v14 = vld [vmem:[#allocation66_spill] sm:$0xff]  ;;  %v243_v50 = vld [vmem:[%s6234_s0 + $0x720] sm:$0xff] }
 0x251   :  { %v5566_v53 = vadd.f32 %v1953_v17, %v1861_v54  ;;  %v1680_v41 = vpop.f32.mrf.mxu0  ;;  %v6663_v17 = vld [vmem:[#allocation62_spill] sm:$0xff] }
 0x252   :  { %v1681_v15 = vadd.f32 %v1680_v41, %v4867_v38  ;;  %v6664_v38 = vld [vmem:[#allocation65_spill] sm:$0xff] }
 0x253   :  { %v233_v41 = vld [vmem:[%s6234_s0 + $0x6d0] sm:$0xff] }
 0x254   :  { %v1772_v4 = vpop.f32.mrf.mxu1  ;;  %1727 = vmatmul.f32.gmra.mxu0 %v5561_v3 }
 0x255   :  { %v1773_v54 = vadd.f32 %v1772_v4, %v1681_v15  ;;  %1911 = vmatmul.f32.gmra.mxu2 %v6663_v17  ;;  %2003 = vmatmul.f32.gmra.mxu3 %v6664_v38  ;;  %v5593_v15 = vmul.f32 %v4994_v55, %v233_v41  ;;  %v5602_v38 = vmul.f32 %v5005_v59, %v234_v1  ;;  %v6668_v41 = vld [vmem:[#allocation69_spill] sm:$0xff] }
 0x256   :  { %v5622_v1 = vmul.f32 %v4994_v55, %v243_v50 }
 0x257   :  { %2764 = vst [vmem:[#allocation2 + $0x40] sm:$0xff] %v1773_v54  ;;  %2844 = vmatmul.msk.f32.gmra.mxu1 %vm839_vm0, %v5579_v16 }
 0x258   :  { %v1864_v33 = vpop.f32.mrf.mxu2  ;;  %v1956_v27 = vpop.f32.mrf.mxu3  ;;  %6665 = vst [vmem:[#allocation54_spill] sm:$0xff] %v5593_v15 }
 0x259   :  { %v5598_v4 = vadd.f32 %v1956_v27, %v1864_v33  ;;  %v1683_v54 = vpop.f32.mrf.mxu0  ;;  %6666 = vst [vmem:[#allocation57_spill] sm:$0xff] %v5602_v38 }
 0x25a   :  { %v1684_v17 = vadd.f32 %v1683_v54, %v4907_v25  ;;  %v826_v25 = vld [vmem:[%s6236_s2 + $0x8f8] sm:$0xff]  ;;  %6669 = vst [vmem:[#allocation58_spill] sm:$0xff] %v5622_v1 }
 0x25b   :  { %2571 = vmatpush.msra.mxu2 %v826_v25  ;;  %v6671_v25 = vld [vmem:[#allocation70_spill] sm:$0xff] }
 0x25c   :  { %v1775_v16 = vpop.f32.mrf.mxu1  ;;  %1730 = vmatmul.f32.gmra.mxu0 %v5593_v15 }
 0x25d   :  { %v1776_v3 = vadd.f32 %v1775_v16, %v1684_v17  ;;  %1914 = vmatmul.f32.gmra.mxu2 %v6667_v14  ;;  %2006 = vmatmul.f32.gmra.mxu3 %v6668_v41  ;;  %v762_v16 = vld [vmem:[%s6236_s2 + $0x6f8] sm:$0xff] }
 0x25e   :  { %v838_v14 = vld [vmem:[%s6236_s2 + $0x958] sm:$0xff]  ;;  %2387 = vmatpush.msra.mxu0 %v762_v16  ;;  %v6672_v16 = vld [vmem:[#allocation73_spill] sm:$0xff] }
 0x25f   :  { %2766 = vst [vmem:[#allocation2 + $0x50] sm:$0xff] %v1776_v3  ;;  %2845 = vmatmul.msk.f32.gmra.mxu1 %vm839_vm0, %v5602_v38  ;;  %v244_v3 = vld [vmem:[%s6234_s0 + $0x728] sm:$0xff]  ;;  %2673 = vmatpush.msra.mxu3 %v838_v14  ;;  %v794_v41 = vld [vmem:[%s6236_s2 + $0x7f8] sm:$0xff]  ;;  %v253_v14 = vld [vmem:[%s6234_s0 + $0x770] sm:$0xff] }
 0x260   :  { %v1867_v33 = vpop.f32.mrf.mxu2  ;;  %v1959_v27 = vpop.f32.mrf.mxu3  ;;  %2479 = vmatpush.msra.mxu1 %v794_v41  ;;  %v5634_v50 = vmul.f32 %v5005_v59, %v244_v3 }
 0x261   :  { %v5627_v54 = vadd.f32 %v1959_v27, %v1867_v33  ;;  %v1686_v17 = vpop.f32.mrf.mxu0  ;;  %v5645_v27 = vmul.f32 %v4994_v55, %v253_v14  ;;  %v6675_v14 = vld [vmem:[#allocation74_spill] sm:$0xff] }
 0x262   :  { %v1687_v38 = vadd.f32 %v1686_v17, %v4941_v62  ;;  %6670 = vst [vmem:[#allocation61_spill] sm:$0xff] %v5634_v50 }
 0x263   :  { %6673 = vst [vmem:[#allocation62_spill] sm:$0xff] %v5645_v27 }
 0x264   :  { %v1778_v15 = vpop.f32.mrf.mxu1  ;;  %1733 = vmatmul.f32.gmra.mxu0 %v5622_v1 }
 0x265   :  { %v1779_v5 = vadd.f32 %v1778_v15, %v1687_v38  ;;  %1917 = vmatmul.f32.gmra.mxu2 %v6671_v25  ;;  %2009 = vmatmul.f32.gmra.mxu3 %v6672_v16  ;;  %v254_v15 = vld [vmem:[%s6234_s0 + $0x778] sm:$0xff] }
 0x266   :  { %v5657_v41 = vmul.f32 %v5005_v59, %v254_v15 }
 0x267   :  { %2768 = vst [vmem:[#allocation2 + $0x60] sm:$0xff] %v1779_v5  ;;  %2846 = vmatmul.msk.f32.gmra.mxu1 %vm839_vm0, %v5634_v50  ;;  %v824_v5 = vld [vmem:[%s6236_s2 + $0x8e8] sm:$0xff]  ;;  %v6676_v50 = vld [vmem:[#allocation77_spill] sm:$0xff] }
 0x268   :  { %v1870_v62 = vpop.f32.mrf.mxu2  ;;  %v1962_v33 = vpop.f32.mrf.mxu3  ;;  %6674 = vst [vmem:[#allocation65_spill] sm:$0xff] %v5657_v41  ;;  %2572 = vmatpush.msra.mxu2 %v824_v5 }
 0x269   :  { %v5650_v38 = vadd.f32 %v1962_v33, %v1870_v62  ;;  %v1689_v3 = vpop.f32.mrf.mxu0  ;;  %v760_v62 = vld [vmem:[%s6236_s2 + $0x6e8] sm:$0xff] }
 0x26a   :  { %v1690_v17 = vadd.f32 %v1689_v3, %v4987_v60  ;;  %v263_v60 = vld [vmem:[%s6234_s0 + $0x7c0] sm:$0xff]  ;;  %v792_v33 = vld [vmem:[%s6236_s2 + $0x7e8] sm:$0xff]  ;;  %2388 = vmatpush.msra.mxu0 %v760_v62  ;;  %v822_v62 = vld [vmem:[%s6236_s2 + $0x8d8] sm:$0xff] }
 0x26b   :  { %2480 = vmatpush.msra.mxu1 %v792_v33  ;;  %2573 = vmatpush.msra.mxu2 %v822_v62  ;;  %v6684_v62 = vld [vmem:[#allocation6_spill] sm:$0xff] }
 0x26c   :  { %v1781_v25 = vpop.f32.mrf.mxu1  ;;  %1736 = vmatmul.f32.gmra.mxu0 %v5645_v27 }
 0x26d   :  { %v1782_v16 = vadd.f32 %v1781_v25, %v1690_v17  ;;  %1920 = vmatmul.f32.gmra.mxu2 %v6675_v14  ;;  %2012 = vmatmul.f32.gmra.mxu3 %v6676_v50  ;;  %v5674_v50 = vmul.f32 %v4994_v55, %v263_v60  ;;  %v264_v17 = vld [vmem:[%s6234_s0 + $0x7c8] sm:$0xff]  ;;  %v6679_v55 = vld [vmem:[#allocation78_spill] sm:$0xff]  ;;  %v6680_v60 = vld [vmem:[#allocation81_spill] sm:$0xff] }
 0x26e   :  { %v5683_v14 = vmul.f32 %v5005_v59, %v264_v17 }
 0x26f   :  { %2770 = vst [vmem:[#allocation2 + $0x70] sm:$0xff] %v1782_v16  ;;  %2847 = vmatmul.msk.f32.gmra.mxu1 %vm839_vm0, %v5657_v41 }
 0x270   :  { %v1873_v15 = vpop.f32.mrf.mxu2  ;;  %v1965_v3 = vpop.f32.mrf.mxu3  ;;  %6677 = vst [vmem:[#allocation66_spill] sm:$0xff] %v5674_v50 }
 0x271   :  { %v5679_v5 = vadd.f32 %v1965_v3, %v1873_v15  ;;  %v1692_v25 = vpop.f32.mrf.mxu0  ;;  %6678 = vst [vmem:[#allocation69_spill] sm:$0xff] %v5683_v14 }
 0x272   :  { %v1693_v16 = vadd.f32 %v1692_v25, %v5013_v34  ;;  %v6681_v25 = vld [vmem:[#allocation5_spill] sm:$0xff] }
 0x274   :  { %v1784_v41 = vpop.f32.mrf.mxu1  ;;  %1739 = vmatmul.f32.gmra.mxu0 %v5674_v50 }
 0x275   :  { %v1785_v27 = vadd.f32 %v1784_v41, %v1693_v16  ;;  %1923 = vmatmul.f32.gmra.mxu2 %v6679_v55  ;;  %2015 = vmatmul.f32.gmra.mxu3 %v6680_v60  ;;  %v758_v41 = vld [vmem:[%s6236_s2 + $0x6d8] sm:$0xff]  ;;  %v6683_v60 = vld [vmem:[#allocation85_spill] sm:$0xff] }
 0x276   :  { %2389 = vmatpush.msra.mxu0 %v758_v41  ;;  %v6682_v55 = vld [vmem:[#allocation82_spill] sm:$0xff]  ;;  %v836_v41 = vld [vmem:[%s6236_s2 + $0x948] sm:$0xff] }
 0x277   :  { %2772 = vst [vmem:[#allocation2 + $0x80] sm:$0xff] %v1785_v27  ;;  %2848 = vmatmul.msk.f32.gmra.mxu1 %vm839_vm0, %v5683_v14  ;;  %v790_v27 = vld [vmem:[%s6236_s2 + $0x7d8] sm:$0xff]  ;;  %2674 = vmatpush.msra.mxu3 %v836_v41 }
 0x278   :  { %v1876_v34 = vpop.f32.mrf.mxu2  ;;  %v1968_v33 = vpop.f32.mrf.mxu3  ;;  %2481 = vmatpush.msra.mxu1 %v790_v27 }
 0x279   :  { %v5693_v59 = vadd.f32 %v1968_v33, %v1876_v34  ;;  %v1695_v15 = vpop.f32.mrf.mxu0 }
 0x27a   :  { %v1696_v3 = vadd.f32 %v1695_v15, %v5042_v21 }
 0x27c   :  { %v1787_v17 = vpop.f32.mrf.mxu1  ;;  %2035 = vmatmul.f32.vlgmr.msrb.gmra.mxu0 %v6681_v25  ;;  %v6685_v25 = vld [vmem:[#allocation7_spill] sm:$0xff] }
 0x27d   :  { %v1788_v16 = vadd.f32 %v1787_v17, %v1696_v3  ;;  %2219 = vmatmul.f32.vlgmr.msrb.gmra.mxu2 %v6682_v55  ;;  %2311 = vmatmul.f32.vlgmr.msrb.gmra.mxu3 %v6683_v60  ;;  %v820_v3 = vld [vmem:[%s6236_s2 + $0x8c8] sm:$0xff]  ;;  %v6686_v55 = vld [vmem:[#allocation86_spill] sm:$0xff]  ;;  %v6687_v60 = vld [vmem:[#allocation89_spill] sm:$0xff] }
 0x27e   :  { %2574 = vmatpush.msra.mxu2 %v820_v3 }
 0x27f   :  { %2774 = vst [vmem:[#allocation2 + $0x90] sm:$0xff] %v1788_v16  ;;  %2127 = vmatmul.f32.vlgmr.msrb.gmra.mxu1 %v6684_v62  ;;  %v6688_v62 = vld [vmem:[#allocation8_spill] sm:$0xff] }
 0x280   :  { %v1879_v34 = vpop.f32.mrf.mxu2  ;;  %v1971_v33 = vpop.f32.mrf.mxu3 }
 0x281   :  { %v5706_v21 = vadd.f32 %v1971_v33, %v1879_v34  ;;  %v1698_v15 = vpop.f32.mrf.mxu0  ;;  %v788_v34 = vld [vmem:[%s6236_s2 + $0x7c8] sm:$0xff] }
 0x282   :  { %v1699_v27 = vadd.f32 %v1698_v15, %v5074_v29  ;;  %v756_v29 = vld [vmem:[%s6236_s2 + $0x6c8] sm:$0xff]  ;;  %2482 = vmatpush.msra.mxu1 %v788_v34 }
 0x283   :  { %2390 = vmatpush.msra.mxu0 %v756_v29  ;;  %v818_v29 = vld [vmem:[%s6236_s2 + $0x8b8] sm:$0xff] }
 0x284   :  { %v1790_v17 = vpop.f32.mrf.mxu1  ;;  %2038 = vmatmul.f32.gmra.mxu0 %v6685_v25  ;;  %v6689_v25 = vld [vmem:[#allocation9_spill] sm:$0xff]  ;;  %2575 = vmatpush.msra.mxu2 %v818_v29  ;;  %v6696_v29 = vld [vmem:[#allocation12_spill] sm:$0xff] }
 0x285   :  { %v1791_v16 = vadd.f32 %v1790_v17, %v1699_v27  ;;  %2222 = vmatmul.f32.gmra.mxu2 %v6686_v55  ;;  %2314 = vmatmul.f32.gmra.mxu3 %v6687_v60  ;;  %v6690_v55 = vld [vmem:[#allocation90_spill] sm:$0xff]  ;;  %v6691_v60 = vld [vmem:[#allocation93_spill] sm:$0xff] }
 0x287   :  { %2776 = vst [vmem:[#allocation2 + $0xa0] sm:$0xff] %v1791_v16  ;;  %2130 = vmatmul.f32.gmra.mxu1 %v6688_v62  ;;  %v6692_v62 = vld [vmem:[#allocation10_spill] sm:$0xff] }
 0x288   :  { %v1882_v33 = vpop.f32.mrf.mxu2  ;;  %v1974_v15 = vpop.f32.mrf.mxu3 }
 0x289   :  { %v5725_v41 = vadd.f32 %v1974_v15, %v1882_v33  ;;  %v1701_v27 = vpop.f32.mrf.mxu0 }
 0x28a   :  { %v1702_v3 = vadd.f32 %v1701_v27, %v5097_v6  ;;  %v754_v27 = vld [vmem:[%s6236_s2 + $0x6b8] sm:$0xff] }
 0x28b   :  { %2391 = vmatpush.msra.mxu0 %v754_v27 }
 0x28c   :  { %v1793_v17 = vpop.f32.mrf.mxu1  ;;  %2041 = vmatmul.f32.gmra.mxu0 %v6689_v25 }
 0x28d   :  { %v1794_v16 = vadd.f32 %v1793_v17, %v1702_v3  ;;  %2225 = vmatmul.f32.gmra.mxu2 %v6690_v55  ;;  %2317 = vmatmul.f32.gmra.mxu3 %v6691_v60  ;;  %v786_v17 = vld [vmem:[%s6236_s2 + $0x7b8] sm:$0xff] }
 0x28e   :  { %2483 = vmatpush.msra.mxu1 %v786_v17  ;;  %v6694_v60 = vld [vmem:[#allocation94_spill] sm:$0xff]  ;;  %v6697_v17 = vld [vmem:[#allocation13_spill] sm:$0xff] }
 0x28f   :  { %2778 = vst [vmem:[#allocation2 + $0xb0] sm:$0xff] %v1794_v16  ;;  %2133 = vmatmul.f32.gmra.mxu1 %v6692_v62  ;;  %v6693_v16 = vld [vmem:[#allocation11_spill] sm:$0xff]  ;;  %v6695_v62 = vld [vmem:[#allocation97_spill] sm:$0xff] }
 0x290   :  { %v1885_v34 = vpop.f32.mrf.mxu2  ;;  %v1977_v33 = vpop.f32.mrf.mxu3 }
 0x291   :  { %v5735_v15 = vadd.f32 %v1977_v33, %v1885_v34  ;;  %v1704_v6 = vpop.f32.mrf.mxu0 }
 0x292   :  { %v1705_v3 = vadd.f32 %v1704_v6, %v5126_v46 }
 0x294   :  { %v1796_v25 = vpop.f32.mrf.mxu1  ;;  %2044 = vmatmul.f32.gmra.mxu0 %v6693_v16  ;;  %v6698_v16 = vld [vmem:[#allocation98_spill] sm:$0xff] }
 0x295   :  { %v1797_v55 = vadd.f32 %v1796_v25, %v1705_v3  ;;  %2228 = vmatmul.f32.gmra.mxu2 %v6694_v60  ;;  %2320 = vmatmul.f32.gmra.mxu3 %v6695_v62  ;;  %v6699_v3 = vld [vmem:[#allocation101_spill] sm:$0xff]  ;;  %v6700_v25 = vld [vmem:[#allocation14_spill] sm:$0xff]  ;;  %v752_v60 = vld [vmem:[%s6236_s2 + $0x6a8] sm:$0xff] }
 0x296   :  { %2392 = vmatpush.msra.mxu0 %v752_v60 }
 0x297   :  { %2780 = vst [vmem:[#allocation2 + $0xc0] sm:$0xff] %v1797_v55  ;;  %2136 = vmatmul.f32.gmra.mxu1 %v6696_v29  ;;  %v816_v55 = vld [vmem:[%s6236_s2 + $0x8a8] sm:$0xff] }
 0x298   :  { %v1888_v34 = vpop.f32.mrf.mxu2  ;;  %v1980_v33 = vpop.f32.mrf.mxu3  ;;  %2576 = vmatpush.msra.mxu2 %v816_v55 }
 0x299   :  { %v5748_v46 = vadd.f32 %v1980_v33, %v1888_v34  ;;  %v1707_v6 = vpop.f32.mrf.mxu0  ;;  %v834_v33 = vld [vmem:[%s6236_s2 + $0x938] sm:$0xff] }
 0x29a   :  { %v1708_v27 = vadd.f32 %v1707_v6, %v5155_v44  ;;  %2675 = vmatpush.msra.mxu3 %v834_v33  ;;  %v6705_v33 = vld [vmem:[#allocation17_spill] sm:$0xff] }
 0x29c   :  { %v1799_v14 = vpop.f32.mrf.mxu1  ;;  %2047 = vmatmul.f32.gmra.mxu0 %v6697_v17 }
 0x29d   :  { %v1800_v50 = vadd.f32 %v1799_v14, %v1708_v27  ;;  %2231 = vmatmul.f32.gmra.mxu2 %v6698_v16  ;;  %2323 = vmatmul.f32.gmra.mxu3 %v6699_v3  ;;  %v6701_v27 = vld [vmem:[#allocation15_spill] sm:$0xff]  ;;  %v6702_v16 = vld [vmem:[#allocation102_spill] sm:$0xff]  ;;  %v6703_v3 = vld [vmem:[#allocation105_spill] sm:$0xff] }
 0x29f   :  { %2782 = vst [vmem:[#allocation2 + $0xd0] sm:$0xff] %v1800_v50  ;;  %2139 = vmatmul.f32.gmra.mxu1 %v6700_v25  ;;  %v784_v50 = vld [vmem:[%s6236_s2 + $0x7a8] sm:$0xff] }
 0x2a0   :  { %v1891_v44 = vpop.f32.mrf.mxu2  ;;  %v1983_v62 = vpop.f32.mrf.mxu3  ;;  %2484 = vmatpush.msra.mxu1 %v784_v50  ;;  %v6704_v25 = vld [vmem:[#allocation16_spill] sm:$0xff]  ;;  %v750_v50 = vld [vmem:[%s6236_s2 + $0x698] sm:$0xff] }
 0x2a1   :  { %v5761_v14 = vadd.f32 %v1983_v62, %v1891_v44  ;;  %v1710_v29 = vpop.f32.mrf.mxu0  ;;  %v814_v62 = vld [vmem:[%s6236_s2 + $0x898] sm:$0xff]  ;;  %2393 = vmatpush.msra.mxu0 %v750_v50 }
 0x2a2   :  { %v1711_v34 = vadd.f32 %v1710_v29, %v5178_v20  ;;  %2577 = vmatpush.msra.mxu2 %v814_v62 }
 0x2a4   :  { %v1802_v6 = vpop.f32.mrf.mxu1  ;;  %2050 = vmatmul.f32.gmra.mxu0 %v6701_v27  ;;  %v6706_v27 = vld [vmem:[#allocation106_spill] sm:$0xff] }
 0x2a5   :  { %v1803_v17 = vadd.f32 %v1802_v6, %v1711_v34  ;;  %2234 = vmatmul.f32.gmra.mxu2 %v6702_v16  ;;  %2326 = vmatmul.f32.gmra.mxu3 %v6703_v3  ;;  %v6708_v16 = vld [vmem:[#allocation18_spill] sm:$0xff] }
 0x2a7   :  { %2784 = vst [vmem:[#allocation2 + $0xe0] sm:$0xff] %v1803_v17  ;;  %2142 = vmatmul.f32.gmra.mxu1 %v6704_v25  ;;  %v6707_v17 = vld [vmem:[#allocation109_spill] sm:$0xff] }
 0x2a8   :  { %v1894_v55 = vpop.f32.mrf.mxu2  ;;  %v1986_v60 = vpop.f32.mrf.mxu3 }
 0x2a9   :  { %v5774_v20 = vadd.f32 %v1986_v60, %v1894_v55  ;;  %v1713_v44 = vpop.f32.mrf.mxu0 }
 0x2aa   :  { %v1714_v29 = vadd.f32 %v1713_v44, %v5210_v7  ;;  %v782_v7 = vld [vmem:[%s6236_s2 + $0x798] sm:$0xff] }
 0x2ab   :  { %2485 = vmatpush.msra.mxu1 %v782_v7 }
 0x2ac   :  { %v1805_v34 = vpop.f32.mrf.mxu1  ;;  %2053 = vmatmul.f32.gmra.mxu0 %v6705_v33  ;;  %v6711_v33 = vld [vmem:[#allocation113_spill] sm:$0xff] }
 0x2ad   :  { %v1806_v6 = vadd.f32 %v1805_v34, %v1714_v29  ;;  %2237 = vmatmul.f32.gmra.mxu2 %v6706_v27  ;;  %2329 = vmatmul.f32.gmra.mxu3 %v6707_v17  ;;  %v6709_v29 = vld [vmem:[#allocation19_spill] sm:$0xff]  ;;  %v6710_v34 = vld [vmem:[#allocation110_spill] sm:$0xff]  ;;  %v812_v27 = vld [vmem:[%s6236_s2 + $0x888] sm:$0xff] }
 0x2ae   :  { %v748_v17 = vld [vmem:[%s6236_s2 + $0x688] sm:$0xff]  ;;  %2578 = vmatpush.msra.mxu2 %v812_v27 }
 0x2af   :  { %2786 = vst [vmem:[#allocation2 + $0xf0] sm:$0xff] %v1806_v6  ;;  %2145 = vmatmul.f32.gmra.mxu1 %v6708_v16  ;;  %v6712_v6 = vld [vmem:[#allocation20_spill] sm:$0xff]  ;;  %2394 = vmatpush.msra.mxu0 %v748_v17 }
 0x2b0   :  { %v1897_v3 = vpop.f32.mrf.mxu2  ;;  %v1989_v25 = vpop.f32.mrf.mxu3 }
 0x2b1   :  { %v5790_v55 = vadd.f32 %v1989_v25, %v1897_v3  ;;  %v1716_v60 = vpop.f32.mrf.mxu0  ;;  %v780_v25 = vld [vmem:[%s6236_s2 + $0x788] sm:$0xff] }
 0x2b2   :  { %v1717_v44 = vadd.f32 %v1716_v60, %v5239_v24  ;;  %2486 = vmatpush.msra.mxu1 %v780_v25  ;;  %v832_v25 = vld [vmem:[%s6236_s2 + $0x928] sm:$0xff] }
 0x2b3   :  { %2676 = vmatpush.msra.mxu3 %v832_v25 }
 0x2b4   :  { %v1808_v62 = vpop.f32.mrf.mxu1  ;;  %2056 = vmatmul.f32.gmra.mxu0 %v6709_v29 }
 0x2b5   :  { %v1809_v50 = vadd.f32 %v1808_v62, %v1717_v44  ;;  %2240 = vmatmul.f32.gmra.mxu2 %v6710_v34  ;;  %2332 = vmatmul.f32.gmra.mxu3 %v6711_v33  ;;  %v6713_v62 = vld [vmem:[#allocation21_spill] sm:$0xff]  ;;  %v6716_v33 = vld [vmem:[#allocation22_spill] sm:$0xff] }
 0x2b6   :  { %v6715_v34 = vld [vmem:[#allocation117_spill] sm:$0xff] }
 0x2b7   :  { %2788 = vst [vmem:[#allocation2 + $0x100] sm:$0xff] %v1809_v50  ;;  %2148 = vmatmul.f32.gmra.mxu1 %v6712_v6  ;;  %v6714_v50 = vld [vmem:[#allocation114_spill] sm:$0xff] }
 0x2b8   :  { %v1900_v24 = vpop.f32.mrf.mxu2  ;;  %v1992_v16 = vpop.f32.mrf.mxu3 }
 0x2b9   :  { %v5803_v7 = vadd.f32 %v1992_v16, %v1900_v24  ;;  %v1719_v3 = vpop.f32.mrf.mxu0 }
 0x2ba   :  { %v1720_v60 = vadd.f32 %v1719_v3, %v5262_v11  ;;  %v810_v11 = vld [vmem:[%s6236_s2 + $0x878] sm:$0xff] }
 0x2bb   :  { %2579 = vmatpush.msra.mxu2 %v810_v11  ;;  %v746_v3 = vld [vmem:[%s6236_s2 + $0x678] sm:$0xff] }
 0x2bc   :  { %v1811_v44 = vpop.f32.mrf.mxu1  ;;  %2059 = vmatmul.f32.gmra.mxu0 %v6713_v62 }
 0x2bd   :  { %v1812_v29 = vadd.f32 %v1811_v44, %v1720_v60  ;;  %2243 = vmatmul.f32.gmra.mxu2 %v6714_v50  ;;  %2335 = vmatmul.f32.gmra.mxu3 %v6715_v34  ;;  %v6717_v44 = vld [vmem:[#allocation23_spill] sm:$0xff]  ;;  %v6719_v50 = vld [vmem:[#allocation121_spill] sm:$0xff]  ;;  %v778_v34 = vld [vmem:[%s6236_s2 + $0x778] sm:$0xff] }
 0x2be   :  { %2395 = vmatpush.msra.mxu0 %v746_v3  ;;  %2487 = vmatpush.msra.mxu1 %v778_v34  ;;  %v6721_v3 = vld [vmem:[#allocation25_spill] sm:$0xff] }
 0x2bf   :  { %2790 = vst [vmem:[#allocation2 + $0x110] sm:$0xff] %v1812_v29  ;;  %2151 = vmatmul.f32.gmra.mxu1 %v6716_v33  ;;  %v6718_v29 = vld [vmem:[#allocation118_spill] sm:$0xff] }
 0x2c0   :  { %v1903_v6 = vpop.f32.mrf.mxu2  ;;  %v1995_v27 = vpop.f32.mrf.mxu3 }
 0x2c1   :  { %v5813_v17 = vadd.f32 %v1995_v27, %v1903_v6  ;;  %v1722_v24 = vpop.f32.mrf.mxu0 }
 0x2c2   :  { %v1723_v16 = vadd.f32 %v1722_v24, %v5294_v42  ;;  %v6720_v42 = vld [vmem:[#allocation24_spill] sm:$0xff] }
 0x2c4   :  { %v1814_v60 = vpop.f32.mrf.mxu1  ;;  %2062 = vmatmul.f32.gmra.mxu0 %v6717_v44  ;;  %v6723_v44 = vld [vmem:[#allocation125_spill] sm:$0xff] }
 0x2c5   :  { %v1815_v62 = vadd.f32 %v1814_v60, %v1723_v16  ;;  %2246 = vmatmul.f32.gmra.mxu2 %v6718_v29  ;;  %2338 = vmatmul.f32.gmra.mxu3 %v6719_v50  ;;  %v6722_v60 = vld [vmem:[#allocation122_spill] sm:$0xff]  ;;  %v808_v29 = vld [vmem:[%s6236_s2 + $0x868] sm:$0xff] }
 0x2c6   :  { %2580 = vmatpush.msra.mxu2 %v808_v29 }
 0x2c7   :  { %2792 = vst [vmem:[#allocation2 + $0x120] sm:$0xff] %v1815_v62  ;;  %2154 = vmatmul.f32.gmra.mxu1 %v6720_v42  ;;  %v6724_v62 = vld [vmem:[#allocation26_spill] sm:$0xff] }
 0x2c8   :  { %v1906_v33 = vpop.f32.mrf.mxu2  ;;  %v1998_v6 = vpop.f32.mrf.mxu3 }
 0x2c9   :  { %v5832_v27 = vadd.f32 %v1998_v6, %v1906_v33  ;;  %v1725_v24 = vpop.f32.mrf.mxu0  ;;  %v744_v33 = vld [vmem:[%s6236_s2 + $0x668] sm:$0xff] }
 0x2ca   :  { %v1726_v11 = vadd.f32 %v1725_v24, %v5317_v32  ;;  %2396 = vmatpush.msra.mxu0 %v744_v33  ;;  %v776_v24 = vld [vmem:[%s6236_s2 + $0x768] sm:$0xff] }
 0x2cb   :  { %2488 = vmatpush.msra.mxu1 %v776_v24 }
 0x2cc   :  { %v1817_v16 = vpop.f32.mrf.mxu1  ;;  %2065 = vmatmul.f32.gmra.mxu0 %v6721_v3 }
 0x2cd   :  { %v1818_v25 = vadd.f32 %v1817_v16, %v1726_v11  ;;  %2249 = vmatmul.f32.gmra.mxu2 %v6722_v60  ;;  %2341 = vmatmul.f32.gmra.mxu3 %v6723_v44  ;;  %v6725_v16 = vld [vmem:[#allocation27_spill] sm:$0xff]  ;;  %v6727_v60 = vld [vmem:[#allocation129_spill] sm:$0xff]  ;;  %v6728_v44 = vld [vmem:[#allocation28_spill] sm:$0xff] }
 0x2cf   :  { %2794 = vst [vmem:[#allocation2 + $0x130] sm:$0xff] %v1818_v25  ;;  %2157 = vmatmul.f32.gmra.mxu1 %v6724_v62  ;;  %v6726_v25 = vld [vmem:[#allocation126_spill] sm:$0xff] }
 0x2d0   :  { %v1909_v50 = vpop.f32.mrf.mxu2  ;;  %v2001_v42 = vpop.f32.mrf.mxu3 }
 0x2d1   :  { %v5842_v34 = vadd.f32 %v2001_v42, %v1909_v50  ;;  %v1728_v32 = vpop.f32.mrf.mxu0 }
 0x2d2   :  { %v1729_v6 = vadd.f32 %v1728_v32, %v5346_v12  ;;  %v806_v32 = vld [vmem:[%s6236_s2 + $0x858] sm:$0xff] }
 0x2d3   :  { %2581 = vmatpush.msra.mxu2 %v806_v32  ;;  %v6733_v32 = vld [vmem:[#allocation35_spill] sm:$0xff] }
 0x2d4   :  { %v1820_v11 = vpop.f32.mrf.mxu1  ;;  %2068 = vmatmul.f32.gmra.mxu0 %v6725_v16  ;;  %v6731_v16 = vld [vmem:[#allocation133_spill] sm:$0xff] }
 0x2d5   :  { %v1821_v3 = vadd.f32 %v1820_v11, %v1729_v6  ;;  %2252 = vmatmul.f32.gmra.mxu2 %v6726_v25  ;;  %2344 = vmatmul.f32.gmra.mxu3 %v6727_v60  ;;  %v6729_v6 = vld [vmem:[#allocation31_spill] sm:$0xff]  ;;  %v6730_v11 = vld [vmem:[#allocation130_spill] sm:$0xff]  ;;  %v6732_v25 = vld [vmem:[#allocation32_spill] sm:$0xff] }
 0x2d7   :  { %2796 = vst [vmem:[#allocation2 + $0x140] sm:$0xff] %v1821_v3  ;;  %2160 = vmatmul.f32.gmra.mxu1 %v6728_v44  ;;  %v742_v3 = vld [vmem:[%s6236_s2 + $0x658] sm:$0xff] }
 0x2d8   :  { %v1912_v62 = vpop.f32.mrf.mxu2  ;;  %v2004_v29 = vpop.f32.mrf.mxu3  ;;  %2397 = vmatpush.msra.mxu0 %v742_v3 }
 0x2d9   :  { %v5855_v12 = vadd.f32 %v2004_v29, %v1912_v62  ;;  %v1731_v50 = vpop.f32.mrf.mxu0 }
 0x2da   :  { %v1732_v42 = vadd.f32 %v1731_v50, %v5378_v58  ;;  %v774_v58 = vld [vmem:[%s6236_s2 + $0x758] sm:$0xff] }
 0x2db   :  { %2489 = vmatpush.msra.mxu1 %v774_v58 }
 0x2dc   :  { %v1823_v33 = vpop.f32.mrf.mxu1  ;;  %2071 = vmatmul.f32.gmra.mxu0 %v6729_v6  ;;  %v6734_v6 = vld [vmem:[#allocation134_spill] sm:$0xff] }
 0x2dd   :  { %v1824_v24 = vadd.f32 %v1823_v33, %v1732_v42  ;;  %2255 = vmatmul.f32.gmra.mxu2 %v6730_v11  ;;  %2347 = vmatmul.f32.gmra.mxu3 %v6731_v16  ;;  %v6735_v11 = vld [vmem:[#allocation138_spill] sm:$0xff]  ;;  %v6736_v16 = vld [vmem:[#allocation36_spill] sm:$0xff] }
 0x2df   :  { %2798 = vst [vmem:[#allocation2 + $0x150] sm:$0xff] %v1824_v24  ;;  %2163 = vmatmul.f32.gmra.mxu1 %v6732_v25  ;;  %v830_v24 = vld [vmem:[%s6236_s2 + $0x918] sm:$0xff] }
 0x2e0   :  { %v1915_v60 = vpop.f32.mrf.mxu2  ;;  %v2007_v44 = vpop.f32.mrf.mxu3  ;;  %2677 = vmatpush.msra.mxu3 %v830_v24  ;;  %v6740_v24 = vld [vmem:[#allocation40_spill] sm:$0xff] }
 0x2e1   :  { %v5871_v62 = vadd.f32 %v2007_v44, %v1915_v60  ;;  %v1734_v29 = vpop.f32.mrf.mxu0  ;;  %v740_v44 = vld [vmem:[%s6236_s2 + $0x648] sm:$0xff] }
 0x2e2   :  { %v1735_v50 = vadd.f32 %v1734_v29, %v5410_v19  ;;  %v804_v19 = vld [vmem:[%s6236_s2 + $0x848] sm:$0xff]  ;;  %2398 = vmatpush.msra.mxu0 %v740_v44 }
 0x2e3   :  { %2582 = vmatpush.msra.mxu2 %v804_v19 }
 0x2e4   :  { %v1826_v42 = vpop.f32.mrf.mxu1  ;;  %2074 = vmatmul.f32.gmra.mxu0 %v6733_v32  ;;  %v6737_v32 = vld [vmem:[#allocation39_spill] sm:$0xff] }
 0x2e5   :  { %v1827_v33 = vadd.f32 %v1826_v42, %v1735_v50  ;;  %2258 = vmatmul.f32.gmra.mxu2 %v6734_v6  ;;  %2350 = vmatmul.f32.gmra.mxu3 %v6735_v11  ;;  %v772_v50 = vld [vmem:[%s6236_s2 + $0x748] sm:$0xff]  ;;  %v6738_v6 = vld [vmem:[#allocation139_spill] sm:$0xff] }
 0x2e6   :  { %2490 = vmatpush.msra.mxu1 %v772_v50  ;;  %v6739_v11 = vld [vmem:[#allocation143_spill] sm:$0xff] }
 0x2e7   :  { %2800 = vst [vmem:[#allocation2 + $0x160] sm:$0xff] %v1827_v33  ;;  %2166 = vmatmul.f32.gmra.mxu1 %v6736_v16 }
 0x2e8   :  { %v1918_v3 = vpop.f32.mrf.mxu2  ;;  %v2010_v58 = vpop.f32.mrf.mxu3 }
 0x2e9   :  { %v5884_v25 = vadd.f32 %v2010_v58, %v1918_v3  ;;  %v1737_v60 = vpop.f32.mrf.mxu0 }
 0x2ea   :  { %v1738_v29 = vadd.f32 %v1737_v60, %v5433_v45  ;;  %v802_v60 = vld [vmem:[%s6236_s2 + $0x838] sm:$0xff] }
 0x2eb   :  { %2583 = vmatpush.msra.mxu2 %v802_v60  ;;  %v6745_v60 = vld [vmem:[#allocation47_spill] sm:$0xff] }
 0x2ec   :  { %v1829_v42 = vpop.f32.mrf.mxu1  ;;  %2077 = vmatmul.f32.gmra.mxu0 %v6737_v32  ;;  %v6743_v32 = vld [vmem:[#allocation148_spill] sm:$0xff] }
 0x2ed   :  { %v1830_v33 = vadd.f32 %v1829_v42, %v1738_v29  ;;  %2261 = vmatmul.f32.gmra.mxu2 %v6738_v6  ;;  %2353 = vmatmul.f32.gmra.mxu3 %v6739_v11  ;;  %v6741_v29 = vld [vmem:[#allocation43_spill] sm:$0xff]  ;;  %v6742_v42 = vld [vmem:[#allocation144_spill] sm:$0xff]  ;;  %v770_v6 = vld [vmem:[%s6236_s2 + $0x738] sm:$0xff] }
 0x2ee   :  { %2491 = vmatpush.msra.mxu1 %v770_v6  ;;  %v800_v6 = vld [vmem:[%s6236_s2 + $0x828] sm:$0xff] }
 0x2ef   :  { %2802 = vst [vmem:[#allocation2 + $0x170] sm:$0xff] %v1830_v33  ;;  %2169 = vmatmul.f32.gmra.mxu1 %v6740_v24  ;;  %v738_v33 = vld [vmem:[%s6236_s2 + $0x638] sm:$0xff]  ;;  %2584 = vmatpush.msra.mxu2 %v800_v6 }
 0x2f0   :  { %v1921_v16 = vpop.f32.mrf.mxu2  ;;  %v2013_v19 = vpop.f32.mrf.mxu3  ;;  %2399 = vmatpush.msra.mxu0 %v738_v33 }
 0x2f1   :  { %v5897_v45 = vadd.f32 %v2013_v19, %v1921_v16  ;;  %v1740_v3 = vpop.f32.mrf.mxu0 }
 0x2f2   :  { %v1741_v58 = vadd.f32 %v1740_v3, %v5463_v63  ;;  %v6744_v63 = vld [vmem:[#allocation44_spill] sm:$0xff] }
 0x2f4   :  { %v1832_v44 = vpop.f32.mrf.mxu1  ;;  %2080 = vmatmul.f32.gmra.mxu0 %v6741_v29  ;;  %v6747_v29 = vld [vmem:[#allocation152_spill] sm:$0xff] }
 0x2f5   :  { %v1833_v50 = vadd.f32 %v1832_v44, %v1741_v58  ;;  %2264 = vmatmul.f32.gmra.mxu2 %v6742_v42  ;;  %2356 = vmatmul.f32.gmra.mxu3 %v6743_v32  ;;  %v6746_v44 = vld [vmem:[#allocation149_spill] sm:$0xff]  ;;  %v6748_v42 = vld [vmem:[#allocation48_spill] sm:$0xff] }
 0x2f7   :  { %2804 = vst [vmem:[#allocation2 + $0x180] sm:$0xff] %v1833_v50  ;;  %2172 = vmatmul.f32.gmra.mxu1 %v6744_v63 }
 0x2f8   :  { %v1924_v11 = vpop.f32.mrf.mxu2  ;;  %v2016_v24 = vpop.f32.mrf.mxu3 }
 0x2f9   :  { %v5913_v16 = vadd.f32 %v2016_v24, %v1924_v11  ;;  %v2036_v19 = vpop.f32.mrf.mxu0  ;;  %v736_v24 = vld [vmem:[%s6236_s2 + $0x628] sm:$0xff] }
 0x2fa   :  { %v2037_v3 = vadd.f32 %v2036_v19, %v5482_v23  ;;  %2400 = vmatpush.msra.mxu0 %v736_v24  ;;  %v734_v24 = vld [vmem:[%s6236_s2 + $0x618] sm:$0xff] }
 0x2fc   :  { %v2128_v58 = vpop.f32.mrf.mxu1  ;;  %2083 = vmatmul.f32.gmra.mxu0 %v6745_v60  ;;  %v6751_v60 = vld [vmem:[#allocation156_spill] sm:$0xff] }
 0x2fd   :  { %2267 = vmatmul.f32.gmra.mxu2 %v6746_v44  ;;  %2359 = vmatmul.f32.gmra.mxu3 %v6747_v29  ;;  %v2129_v50 = vadd.f32 %v2128_v58, %v2037_v3  ;;  %v6749_v3 = vld [vmem:[#allocation51_spill] sm:$0xff]  ;;  %v6750_v58 = vld [vmem:[#allocation153_spill] sm:$0xff]  ;;  %v768_v44 = vld [vmem:[%s6236_s2 + $0x728] sm:$0xff] }
 0x2fe   :  { %2492 = vmatpush.msra.mxu1 %v768_v44  ;;  %v6752_v29 = vld [vmem:[#allocation52_spill] sm:$0xff]  ;;  %2401 = vmatpush.msra.mxu0 %v734_v24 }
 0x2ff   :  { %2175 = vmatmul.f32.gmra.mxu1 %v6748_v42 }
 0x300   :  { %v2220_v32 = vpop.f32.mrf.mxu2  ;;  %v2312_v33 = vpop.f32.mrf.mxu3 }
 0x301   :  { %v2221_v63 = vadd.f32 %v2220_v32, %v2129_v50  ;;  %v2039_v1 = vpop.f32.mrf.mxu0 }
 0x302   :  { %v2040_v23 = vadd.f32 %v2039_v1, %v5514_v56  ;;  %v828_v56 = vld [vmem:[%s6236_s2 + $0x908] sm:$0xff] }
 0x303   :  { %v5924_v11 = vadd.f32 %v2312_v33, %v2221_v63  ;;  %2678 = vmatpush.msra.mxu3 %v828_v56 }
 0x304   :  { %v2131_v19 = vpop.f32.mrf.mxu1  ;;  %2086 = vmatmul.f32.gmra.mxu0 %v6749_v3 }
 0x305   :  { %2270 = vmatmul.f32.gmra.mxu2 %v6750_v58  ;;  %2362 = vmatmul.f32.gmra.mxu3 %v6751_v60  ;;  %v2132_v1 = vadd.f32 %v2131_v19, %v2040_v23  ;;  %v6753_v58 = vld [vmem:[#allocation55_spill] sm:$0xff]  ;;  %v6754_v60 = vld [vmem:[#allocation157_spill] sm:$0xff]  ;;  %v798_v23 = vld [vmem:[%s6236_s2 + $0x818] sm:$0xff] }
 0x306   :  { %2585 = vmatpush.msra.mxu2 %v798_v23  ;;  %v6756_v19 = vld [vmem:[#allocation56_spill] sm:$0xff] }
 0x307   :  { %2178 = vmatmul.f32.gmra.mxu1 %v6752_v29 }
 0x308   :  { %v2223_v50 = vpop.f32.mrf.mxu2  ;;  %v2315_v42 = vpop.f32.mrf.mxu3 }
 0x309   :  { %v2224_v32 = vadd.f32 %v2223_v50, %v2132_v1  ;;  %v2042_v33 = vpop.f32.mrf.mxu0 }
 0x30a   :  { %v2043_v63 = vadd.f32 %v2042_v33, %v5543_v8  ;;  %v6757_v33 = vld [vmem:[#allocation59_spill] sm:$0xff] }
 0x30b   :  { %v5940_v6 = vadd.f32 %v2315_v42, %v2224_v32 }
 0x30c   :  { %v2134_v3 = vpop.f32.mrf.mxu1  ;;  %2089 = vmatmul.f32.gmra.mxu0 %v6753_v58  ;;  %v6758_v58 = vld [vmem:[#allocation162_spill] sm:$0xff] }
 0x30d   :  { %2273 = vmatmul.f32.gmra.mxu2 %v6754_v60  ;;  %2365 = vmatmul.f32.gmra.mxu3 %v6755_v36  ;;  %v2135_v8 = vadd.f32 %v2134_v3, %v2043_v63  ;;  %v766_v36 = vld [vmem:[%s6236_s2 + $0x718] sm:$0xff]  ;;  %v6759_v63 = vld [vmem:[#allocation165_spill] sm:$0xff]  ;;  %v6760_v60 = vld [vmem:[#allocation60_spill] sm:$0xff] }
 0x30e   :  { %2493 = vmatpush.msra.mxu1 %v766_v36  ;;  %v6761_v36 = vld [vmem:[#allocation63_spill] sm:$0xff] }
 0x30f   :  { %2181 = vmatmul.f32.gmra.mxu1 %v6756_v19 }
 0x310   :  { %v2226_v44 = vpop.f32.mrf.mxu2  ;;  %v2318_v56 = vpop.f32.mrf.mxu3 }
 0x311   :  { %v2227_v1 = vadd.f32 %v2226_v44, %v2135_v8  ;;  %v2045_v29 = vpop.f32.mrf.mxu0 }
 0x312   :  { %v2046_v50 = vadd.f32 %v2045_v29, %v5566_v53  ;;  %v796_v53 = vld [vmem:[%s6236_s2 + $0x808] sm:$0xff] }
 0x313   :  { %v5956_v42 = vadd.f32 %v2318_v56, %v2227_v1  ;;  %2586 = vmatpush.msra.mxu2 %v796_v53  ;;  %v732_v1 = vld [vmem:[%s6236_s2 + $0x608] sm:$0xff]  ;;  %v6765_v53 = vld [vmem:[#allocation67_spill] sm:$0xff] }
 0x314   :  { %v2137_v32 = vpop.f32.mrf.mxu1  ;;  %2092 = vmatmul.f32.gmra.mxu0 %v6757_v33  ;;  %v764_v33 = vld [vmem:[%s6236_s2 + $0x708] sm:$0xff]  ;;  %s2904_s2 = smov [#allocation2]  }
 0x315   :  { %2276 = vmatmul.f32.gmra.mxu2 %v6758_v58  ;;  %2368 = vmatmul.f32.gmra.mxu3 %v6759_v63  ;;  %v2138_v3 = vadd.f32 %v2137_v32, %v2046_v50  ;;  %v6762_v50 = vld [vmem:[#allocation166_spill] sm:$0xff]  ;;  %v6763_v32 = vld [vmem:[#allocation169_spill] sm:$0xff]  ;;  %v6764_v58 = vld [vmem:[#allocation64_spill] sm:$0xff]  ;;  %s2810_s22 = sshll.u32 %s2904_s2, 4  ;;  %s2811_s22 = int_to_ptr.vmem [resolvable:$true] %s2810_s22 }
 0x316   :  { %2402 = vmatpush.msra.mxu0 %v732_v1  ;;  %2494 = vmatpush.msra.mxu1 %v764_v33 }
 0x317   :  { %2184 = vmatmul.f32.gmra.mxu1 %v6760_v60 }
 0x318   :  { %v2229_v23 = vpop.f32.mrf.mxu2  ;;  %v2321_v24 = vpop.f32.mrf.mxu3 }
 0x319   :  { %v2230_v8 = vadd.f32 %v2229_v23, %v2138_v3  ;;  %v2048_v19 = vpop.f32.mrf.mxu0 }
 0x31a   :  { %v2049_v44 = vadd.f32 %v2048_v19, %v5598_v4 }
 0x31b   :  { %v5966_v56 = vadd.f32 %v2321_v24, %v2230_v8 }
 0x31c   :  { %v2140_v29 = vpop.f32.mrf.mxu1  ;;  %2095 = vmatmul.f32.gmra.mxu0 %v6761_v36  ;;  %v6766_v36 = vld [vmem:[#allocation170_spill] sm:$0xff] }
 0x31d   :  { %2279 = vmatmul.f32.gmra.mxu2 %v6762_v50  ;;  %2371 = vmatmul.f32.gmra.mxu3 %v6763_v32  ;;  %v2141_v4 = vadd.f32 %v2140_v29, %v2049_v44  ;;  %v6767_v50 = vld [vmem:[#allocation173_spill] sm:$0xff]  ;;  %v6768_v32 = vld [vmem:[#allocation68_spill] sm:$0xff] }
 0x31f   :  { %2187 = vmatmul.f32.gmra.mxu1 %v6764_v58 }
 0x320   :  { %v2232_v63 = vpop.f32.mrf.mxu2  ;;  %v2324_v3 = vpop.f32.mrf.mxu3 }
 0x321   :  { %v2233_v60 = vadd.f32 %v2232_v63, %v2141_v4  ;;  %v2051_v23 = vpop.f32.mrf.mxu0 }
 0x322   :  { %v2052_v24 = vadd.f32 %v2051_v23, %v5627_v54  ;;  %v6771_v23 = vld [vmem:[#allocation177_spill] sm:$0xff] }
 0x323   :  { %v5979_v8 = vadd.f32 %v2324_v3, %v2233_v60  ;;  %v6769_v3 = vld [vmem:[#allocation71_spill] sm:$0xff]  ;;  %v6770_v60 = vld [vmem:[#allocation174_spill] sm:$0xff] }
 0x324   :  { %v2143_v19 = vpop.f32.mrf.mxu1  ;;  %2098 = vmatmul.f32.gmra.mxu0 %v6765_v53 }
 0x325   :  { %2282 = vmatmul.f32.gmra.mxu2 %v6766_v36  ;;  %2374 = vmatmul.f32.gmra.mxu3 %v6767_v50  ;;  %v2144_v1 = vadd.f32 %v2143_v19, %v2052_v24  ;;  %v6772_v36 = vld [vmem:[#allocation72_spill] sm:$0xff] }
 0x327   :  { %2190 = vmatmul.f32.gmra.mxu1 %v6768_v32 }
 0x328   :  { %v2235_v44 = vpop.f32.mrf.mxu2  ;;  %v2327_v29 = vpop.f32.mrf.mxu3 }
 0x329   :  { %v2236_v33 = vadd.f32 %v2235_v44, %v2144_v1  ;;  %v2054_v58 = vpop.f32.mrf.mxu0 }
 0x32a   :  { %v2055_v4 = vadd.f32 %v2054_v58, %v5650_v38 }
 0x32b   :  { %v5986_v63 = vadd.f32 %v2327_v29, %v2236_v33  ;;  %v6773_v29 = vld [vmem:[#allocation75_spill] sm:$0xff]  ;;  %v6774_v33 = vld [vmem:[#allocation178_spill] sm:$0xff] }
 0x32c   :  { %v2146_v54 = vpop.f32.mrf.mxu1  ;;  %2101 = vmatmul.f32.gmra.mxu0 %v6769_v3  ;;  %v6775_v3 = vld [vmem:[#allocation76_spill] sm:$0xff] }
 0x32d   :  { %2285 = vmatmul.f32.gmra.mxu2 %v6770_v60  ;;  %2377 = vmatmul.f32.gmra.mxu3 %v6771_v23  ;;  %v2147_v53 = vadd.f32 %v2146_v54, %v2055_v4 }
 0x32f   :  { %2193 = vmatmul.f32.gmra.mxu1 %v6772_v36 }
 0x330   :  { %v2238_v24 = vpop.f32.mrf.mxu2  ;;  %v2330_v19 = vpop.f32.mrf.mxu3 }
 0x331   :  { %v2239_v50 = vadd.f32 %v2238_v24, %v2147_v53  ;;  %v2057_v32 = vpop.f32.mrf.mxu0  ;;  %v6776_v24 = vld [vmem:[#allocation79_spill] sm:$0xff] }
 0x332   :  { %v2058_v1 = vadd.f32 %v2057_v32, %v5679_v5 }
 0x333   :  { %v5993_v44 = vadd.f32 %v2330_v19, %v2239_v50 }
 0x334   :  { %v2149_v38 = vpop.f32.mrf.mxu1  ;;  %2104 = vmatmul.f32.gmra.mxu0 %v6773_v29 }
 0x335   :  { %2288 = vmatmul.f32.gmra.mxu2 %v6774_v33  ;;  %2380 = vmatmul.f32.gmra.mxu3 %v4945_v22  ;;  %v2150_v58 = vadd.f32 %v2149_v38, %v2058_v1  ;;  %v6777_v22 = vld [vmem:[#allocation80_spill] sm:$0xff] }
 0x337   :  { %2196 = vmatmul.f32.gmra.mxu1 %v6775_v3 }
 0x338   :  { %v2241_v4 = vpop.f32.mrf.mxu2  ;;  %v2333_v54 = vpop.f32.mrf.mxu3 }
 0x339   :  { %v2242_v60 = vadd.f32 %v2241_v4, %v2150_v58  ;;  %v2060_v23 = vpop.f32.mrf.mxu0  ;;  %v6778_v58 = vld [vmem:[#allocation83_spill] sm:$0xff] }
 0x33a   :  { %v2061_v53 = vadd.f32 %v2060_v23, %v5693_v59 }
 0x33b   :  { %v6000_v36 = vadd.f32 %v2333_v54, %v2242_v60 }
 0x33c   :  { %v2152_v5 = vpop.f32.mrf.mxu1  ;;  %2107 = vmatmul.f32.gmra.mxu0 %v6776_v24 }
 0x33d   :  { %2291 = vmatmul.f32.gmra.mxu2 %v4973_v28  ;;  %2383 = vmatmul.f32.gmra.mxu3 %v4991_v39  ;;  %v2153_v19 = vadd.f32 %v2152_v5, %v2061_v53  ;;  %v6779_v39 = vld [vmem:[#allocation84_spill] sm:$0xff]  ;;  %v6780_v5 = vld [vmem:[#allocation87_spill] sm:$0xff] }
 0x33f   :  { %2199 = vmatmul.f32.gmra.mxu1 %v6777_v22 }
 0x340   :  { %v2244_v50 = vpop.f32.mrf.mxu2  ;;  %v2336_v32 = vpop.f32.mrf.mxu3 }
 0x341   :  { %v2245_v1 = vadd.f32 %v2244_v50, %v2153_v19  ;;  %v2063_v38 = vpop.f32.mrf.mxu0 }
 0x342   :  { %v2064_v29 = vadd.f32 %v2063_v38, %v5706_v21  ;;  %v6782_v38 = vld [vmem:[#allocation91_spill] sm:$0xff] }
 0x343   :  { %v6007_v33 = vadd.f32 %v2336_v32, %v2245_v1 }
 0x344   :  { %v2155_v59 = vpop.f32.mrf.mxu1  ;;  %2403 = vmatmul.f32.vlgmr.msra.gmra.mxu0 %v6778_v58 }
 0x345   :  { %2587 = vmatmul.f32.vlgmr.msra.gmra.mxu2 %v5008_v2  ;;  %2849 = vmatmul.msk.f32.vlgmr.msra.gmra.mxu3 %vm839_vm0, %v5017_v10  ;;  %v2156_v28 = vadd.f32 %v2155_v59, %v2064_v29  ;;  %v6781_v10 = vld [vmem:[#allocation88_spill] sm:$0xff] }
 0x347   :  { %2495 = vmatmul.f32.vlgmr.msra.gmra.mxu1 %v6779_v39 }
 0x348   :  { %v2247_v3 = vpop.f32.mrf.mxu2  ;;  %v2339_v4 = vpop.f32.mrf.mxu3 }
 0x349   :  { %v2248_v54 = vadd.f32 %v2247_v3, %v2156_v28  ;;  %v2066_v60 = vpop.f32.mrf.mxu0 }
 0x34a   :  { %v2067_v23 = vadd.f32 %v2066_v60, %v5725_v41 }
 0x34b   :  { %v6015_v21 = vadd.f32 %v2339_v4, %v2248_v54  ;;  %v6784_v4 = vld [vmem:[#allocation95_spill] sm:$0xff] }
 0x34c   :  { %v2158_v53 = vpop.f32.mrf.mxu1  ;;  %2406 = vmatmul.f32.gmra.mxu0 %v6780_v5 }
 0x34d   :  { %2590 = vmatmul.f32.gmra.mxu2 %v5037_v35  ;;  %2850 = vmatmul.msk.f32.gmra.mxu3 %vm839_vm0, %v5046_v52  ;;  %v2159_v2 = vadd.f32 %v2158_v53, %v2067_v23  ;;  %v6783_v52 = vld [vmem:[#allocation92_spill] sm:$0xff] }
 0x34f   :  { %2498 = vmatmul.f32.gmra.mxu1 %v6781_v10  ;;  %v6786_v10 = vld [vmem:[#allocation99_spill] sm:$0xff] }
 0x350   :  { %v2250_v24 = vpop.f32.mrf.mxu2  ;;  %v2342_v19 = vpop.f32.mrf.mxu3 }
 0x351   :  { %v2251_v22 = vadd.f32 %v2250_v24, %v2159_v2  ;;  %v2069_v50 = vpop.f32.mrf.mxu0 }
 0x352   :  { %v2070_v32 = vadd.f32 %v2069_v50, %v5735_v15 }
 0x353   :  { %v6023_v41 = vadd.f32 %v2342_v19, %v2251_v22 }
 0x354   :  { %v2161_v1 = vpop.f32.mrf.mxu1  ;;  %2409 = vmatmul.f32.gmra.mxu0 %v6782_v38  ;;  %v6788_v38 = vld [vmem:[#allocation103_spill] sm:$0xff] }
 0x355   :  { %2593 = vmatmul.f32.gmra.mxu2 %v5069_v43  ;;  %2851 = vmatmul.msk.f32.gmra.mxu3 %vm839_vm0, %v5078_v61  ;;  %v2162_v35 = vadd.f32 %v2161_v1, %v2070_v32  ;;  %v6785_v61 = vld [vmem:[#allocation96_spill] sm:$0xff] }
 0x357   :  { %2501 = vmatmul.f32.gmra.mxu1 %v6783_v52 }
 0x358   :  { %v2253_v29 = vpop.f32.mrf.mxu2  ;;  %v2345_v59 = vpop.f32.mrf.mxu3 }
 0x359   :  { %v2254_v58 = vadd.f32 %v2253_v29, %v2162_v35  ;;  %v2072_v28 = vpop.f32.mrf.mxu0 }
 0x35a   :  { %v2073_v39 = vadd.f32 %v2072_v28, %v5748_v46 }
 0x35b   :  { %v6031_v15 = vadd.f32 %v2345_v59, %v2254_v58 }
 0x35c   :  { %v2164_v3 = vpop.f32.mrf.mxu1  ;;  %2412 = vmatmul.f32.gmra.mxu0 %v6784_v4 }
 0x35d   :  { %2596 = vmatmul.f32.gmra.mxu2 %v5092_v31  ;;  %2852 = vmatmul.msk.f32.gmra.mxu3 %vm839_vm0, %v5101_v47  ;;  %v2165_v43 = vadd.f32 %v2164_v3, %v2073_v39  ;;  %v6787_v47 = vld [vmem:[#allocation100_spill] sm:$0xff]  ;;  %v6790_v39 = vld [vmem:[#allocation107_spill] sm:$0xff] }
 0x35f   :  { %2504 = vmatmul.f32.gmra.mxu1 %v6785_v61 }
 0x360   :  { %v2256_v54 = vpop.f32.mrf.mxu2  ;;  %v2348_v60 = vpop.f32.mrf.mxu3 }
 0x361   :  { %v2257_v23 = vadd.f32 %v2256_v54, %v2165_v43  ;;  %v2075_v53 = vpop.f32.mrf.mxu0 }
 0x362   :  { %v2076_v5 = vadd.f32 %v2075_v53, %v5761_v14 }
 0x363   :  { %v6039_v46 = vadd.f32 %v2348_v60, %v2257_v23  ;;  %v6792_v23 = vld [vmem:[#allocation111_spill] sm:$0xff] }
 0x364   :  { %v2167_v2 = vpop.f32.mrf.mxu1  ;;  %2415 = vmatmul.f32.gmra.mxu0 %v6786_v10 }
 0x365   :  { %2599 = vmatmul.f32.gmra.mxu2 %v5121_v40  ;;  %2853 = vmatmul.msk.f32.gmra.mxu3 %vm839_vm0, %v5130_v13  ;;  %v2168_v31 = vadd.f32 %v2167_v2, %v2076_v5  ;;  %v6789_v13 = vld [vmem:[#allocation104_spill] sm:$0xff] }
 0x367   :  { %2507 = vmatmul.f32.gmra.mxu1 %v6787_v47 }
 0x368   :  { %v2259_v24 = vpop.f32.mrf.mxu2  ;;  %v2351_v19 = vpop.f32.mrf.mxu3 }
 0x369   :  { %v2260_v22 = vadd.f32 %v2259_v24, %v2168_v31  ;;  %v2078_v50 = vpop.f32.mrf.mxu0  ;;  %v6794_v24 = vld [vmem:[#allocation115_spill] sm:$0xff] }
 0x36a   :  { %v2079_v32 = vadd.f32 %v2078_v50, %v5774_v20 }
 0x36b   :  { %v6047_v14 = vadd.f32 %v2351_v19, %v2260_v22 }
 0x36c   :  { %v2170_v1 = vpop.f32.mrf.mxu1  ;;  %2418 = vmatmul.f32.gmra.mxu0 %v6788_v38 }
 0x36d   :  { %2602 = vmatmul.f32.gmra.mxu2 %v5150_v18  ;;  %2854 = vmatmul.msk.f32.gmra.mxu3 %vm839_vm0, %v5159_v49  ;;  %v2171_v40 = vadd.f32 %v2170_v1, %v2079_v32  ;;  %v6791_v49 = vld [vmem:[#allocation108_spill] sm:$0xff] }
 0x36f   :  { %2510 = vmatmul.f32.gmra.mxu1 %v6789_v13  ;;  %v6798_v13 = vld [vmem:[#allocation120_spill] sm:$0xff] }
 0x370   :  { %v2262_v35 = vpop.f32.mrf.mxu2  ;;  %v2354_v52 = vpop.f32.mrf.mxu3 }
 0x371   :  { %v2263_v29 = vadd.f32 %v2262_v35, %v2171_v40  ;;  %v2081_v59 = vpop.f32.mrf.mxu0  ;;  %v6796_v40 = vld [vmem:[#allocation119_spill] sm:$0xff] }
 0x372   :  { %v2082_v58 = vadd.f32 %v2081_v59, %v5790_v55 }
 0x373   :  { %v6055_v20 = vadd.f32 %v2354_v52, %v2263_v29 }
 0x374   :  { %v2173_v28 = vpop.f32.mrf.mxu1  ;;  %2421 = vmatmul.f32.gmra.mxu0 %v6790_v39  ;;  %v6799_v39 = vld [vmem:[#allocation123_spill] sm:$0xff] }
 0x375   :  { %2605 = vmatmul.f32.gmra.mxu2 %v5173_v0  ;;  %2855 = vmatmul.msk.f32.gmra.mxu3 %vm839_vm0, %v5182_v57  ;;  %v2174_v18 = vadd.f32 %v2173_v28, %v2082_v58  ;;  %v6793_v57 = vld [vmem:[#allocation112_spill] sm:$0xff] }
 0x377   :  { %2513 = vmatmul.f32.gmra.mxu1 %v6791_v49 }
 0x378   :  { %v2265_v3 = vpop.f32.mrf.mxu2  ;;  %v2357_v4 = vpop.f32.mrf.mxu3 }
 0x379   :  { %v2266_v43 = vadd.f32 %v2265_v3, %v2174_v18  ;;  %v2084_v61 = vpop.f32.mrf.mxu0  ;;  %v6800_v18 = vld [vmem:[#allocation184_spill] sm:$0xff] }
 0x37a   :  { %v2085_v54 = vadd.f32 %v2084_v61, %v5803_v7  ;;  %v6802_v3 = vld [vmem:[#allocation124_spill] sm:$0xff] }
 0x37b   :  { %v6063_v55 = vadd.f32 %v2357_v4, %v2266_v43 }
 0x37c   :  { %v2176_v60 = vpop.f32.mrf.mxu1  ;;  %2424 = vmatmul.f32.gmra.mxu0 %v6792_v23 }
 0x37d   :  { %2608 = vmatmul.f32.gmra.mxu2 %v5205_v30  ;;  %2856 = vmatmul.msk.f32.gmra.mxu3 %vm839_vm0, %v5214_v51  ;;  %v2177_v0 = vadd.f32 %v2176_v60, %v2085_v54  ;;  %v6795_v51 = vld [vmem:[#allocation116_spill] sm:$0xff] }
 0x37f   :  { %2516 = vmatmul.f32.gmra.mxu1 %v6793_v57  ;;  %v6804_v57 = vld [vmem:[#allocation186_spill] sm:$0xff] }
 0x380   :  { %v2268_v53 = vpop.f32.mrf.mxu2  ;;  %v2360_v5 = vpop.f32.mrf.mxu3 }
 0x381   :  { %v2269_v2 = vadd.f32 %v2268_v53, %v2177_v0  ;;  %v2087_v10 = vpop.f32.mrf.mxu0  ;;  %v6803_v0 = vld [vmem:[#allocation127_spill] sm:$0xff] }
 0x382   :  { %v2088_v31 = vadd.f32 %v2087_v10, %v5813_v17  ;;  %v6805_v53 = vld [vmem:[#allocation187_spill] sm:$0xff] }
 0x383   :  { %v6071_v7 = vadd.f32 %v2360_v5, %v2269_v2  ;;  %v6806_v2 = vld [vmem:[#allocation128_spill] sm:$0xff] }
 0x384   :  { %v2179_v47 = vpop.f32.mrf.mxu1  ;;  %2427 = vmatmul.f32.gmra.mxu0 %v6794_v24 }
 0x385   :  { %2611 = vmatmul.f32.gmra.mxu2 %v5234_v37  ;;  %2857 = vmatmul.msk.f32.gmra.mxu3 %vm839_vm0, %v5243_v9  ;;  %v2180_v30 = vadd.f32 %v2179_v47, %v2088_v31  ;;  %v6797_v37 = vld [vmem:[#allocation183_spill] sm:$0xff] }
 0x387   :  { %2519 = vmatmul.f32.gmra.mxu1 %v6795_v51 }
 0x388   :  { %v2271_v19 = vpop.f32.mrf.mxu2  ;;  %v2363_v22 = vpop.f32.mrf.mxu3 }
 0x389   :  { %v2272_v50 = vadd.f32 %v2271_v19, %v2180_v30  ;;  %v2090_v32 = vpop.f32.mrf.mxu0  ;;  %v6807_v19 = vld [vmem:[#allocation131_spill] sm:$0xff] }
 0x38a   :  { %v2091_v1 = vadd.f32 %v2090_v32, %v5832_v27 }
 0x38b   :  { %v6079_v17 = vadd.f32 %v2363_v22, %v2272_v50  ;;  %v6808_v22 = vld [vmem:[#allocation29_spill] sm:$0xff] }
 0x38c   :  { %v2182_v38 = vpop.f32.mrf.mxu1  ;;  %2430 = vmatmul.f32.gmra.mxu0 %v6796_v40  ;;  %v6809_v50 = vld [vmem:[#allocation137_spill] sm:$0xff] }
 0x38d   :  { %2614 = vmatmul.f32.gmra.mxu2 %v5257_v48  ;;  %2858 = vmatmul.msk.f32.gmra.mxu3 %vm839_vm0, %v6797_v37  ;;  %v2183_v9 = vadd.f32 %v2182_v38, %v2091_v1  ;;  %v6801_v48 = vld [vmem:[#allocation185_spill] sm:$0xff]  ;;  %v6810_v1 = vld [vmem:[#allocation132_spill] sm:$0xff] }
 0x38f   :  { %2522 = vmatmul.f32.gmra.mxu1 %v6798_v13 }
 0x390   :  { %v2274_v35 = vpop.f32.mrf.mxu2  ;;  %v2366_v52 = vpop.f32.mrf.mxu3 }
 0x391   :  { %v2275_v29 = vadd.f32 %v2274_v35, %v2183_v9  ;;  %v2093_v59 = vpop.f32.mrf.mxu0 }
 0x392   :  { %v2094_v58 = vadd.f32 %v2093_v59, %v5842_v34  ;;  %v6813_v59 = vld [vmem:[#allocation33_spill] sm:$0xff] }
 0x393   :  { %v6087_v27 = vadd.f32 %v2366_v52, %v2275_v29  ;;  %v6811_v52 = vld [vmem:[#allocation135_spill] sm:$0xff]  ;;  %v6812_v29 = vld [vmem:[#allocation30_spill] sm:$0xff] }
 0x394   :  { %v2185_v28 = vpop.f32.mrf.mxu1  ;;  %2433 = vmatmul.f32.gmra.mxu0 %v6799_v39 }
 0x395   :  { %2617 = vmatmul.f32.gmra.mxu2 %v6800_v18  ;;  %2859 = vmatmul.msk.f32.gmra.mxu3 %vm839_vm0, %v6801_v48  ;;  %v2186_v49 = vadd.f32 %v2185_v28, %v2094_v58  ;;  %v6814_v28 = vld [vmem:[#allocation136_spill] sm:$0xff] }
 0x397   :  { %2525 = vmatmul.f32.gmra.mxu1 %v6802_v3 }
 0x398   :  { %v2277_v4 = vpop.f32.mrf.mxu2  ;;  %v2369_v43 = vpop.f32.mrf.mxu3 }
 0x399   :  { %v2278_v61 = vadd.f32 %v2277_v4, %v2186_v49  ;;  %v2096_v54 = vpop.f32.mrf.mxu0 }
 0x39a   :  { %v2097_v60 = vadd.f32 %v2096_v54, %v5855_v12  ;;  %v6817_v54 = vld [vmem:[#allocation34_spill] sm:$0xff] }
 0x39b   :  { %v6095_v34 = vadd.f32 %v2369_v43, %v2278_v61  ;;  %v6815_v43 = vld [vmem:[#allocation140_spill] sm:$0xff]  ;;  %v6816_v61 = vld [vmem:[#allocation142_spill] sm:$0xff] }
 0x39c   :  { %v2188_v23 = vpop.f32.mrf.mxu1  ;;  %2436 = vmatmul.f32.gmra.mxu0 %v6803_v0 }
 0x39d   :  { %2620 = vmatmul.f32.gmra.mxu2 %v6804_v57  ;;  %2860 = vmatmul.msk.f32.gmra.mxu3 %vm839_vm0, %v6805_v53  ;;  %v2189_v5 = vadd.f32 %v2188_v23, %v2097_v60  ;;  %v6818_v23 = vld [vmem:[#allocation141_spill] sm:$0xff] }
 0x39f   :  { %2528 = vmatmul.f32.gmra.mxu1 %v6806_v2 }
 0x3a0   :  { %v2280_v10 = vpop.f32.mrf.mxu2  ;;  %v2372_v31 = vpop.f32.mrf.mxu3 }
 0x3a1   :  { %v2281_v47 = vadd.f32 %v2280_v10, %v2189_v5  ;;  %v2099_v24 = vpop.f32.mrf.mxu0 }
 0x3a2   :  { %v2100_v30 = vadd.f32 %v2099_v24, %v5871_v62  ;;  %v6821_v24 = vld [vmem:[#allocation147_spill] sm:$0xff] }
 0x3a3   :  { %v6103_v12 = vadd.f32 %v2372_v31, %v2281_v47  ;;  %v6819_v31 = vld [vmem:[#allocation145_spill] sm:$0xff] }
 0x3a4   :  { %v2191_v51 = vpop.f32.mrf.mxu1  ;;  %2439 = vmatmul.f32.gmra.mxu0 %v6807_v19  ;;  %v6820_v47 = vld [vmem:[#allocation37_spill] sm:$0xff] }
 0x3a5   :  { %2623 = vmatmul.f32.gmra.mxu2 %v6808_v22  ;;  %2861 = vmatmul.msk.f32.gmra.mxu3 %vm839_vm0, %v6809_v50  ;;  %v2192_v32 = vadd.f32 %v2191_v51, %v2100_v30  ;;  %v6822_v51 = vld [vmem:[#allocation146_spill] sm:$0xff] }
 0x3a7   :  { %2531 = vmatmul.f32.gmra.mxu1 %v6810_v1 }
 0x3a8   :  { %v2283_v38 = vpop.f32.mrf.mxu2  ;;  %v2375_v40 = vpop.f32.mrf.mxu3 }
 0x3a9   :  { %v2284_v37 = vadd.f32 %v2283_v38, %v2192_v32  ;;  %v2102_v9 = vpop.f32.mrf.mxu0 }
 0x3aa   :  { %v2103_v13 = vadd.f32 %v2102_v9, %v5884_v25 }
 0x3ab   :  { %v6111_v62 = vadd.f32 %v2375_v40, %v2284_v37  ;;  %v6823_v40 = vld [vmem:[#allocation150_spill] sm:$0xff] }
 0x3ac   :  { %v2194_v35 = vpop.f32.mrf.mxu1  ;;  %2442 = vmatmul.f32.gmra.mxu0 %v6811_v52  ;;  %v6824_v37 = vld [vmem:[#allocation38_spill] sm:$0xff] }
 0x3ad   :  { %2626 = vmatmul.f32.gmra.mxu2 %v6812_v29  ;;  %2862 = vmatmul.msk.f32.gmra.mxu3 %vm839_vm0, %v6813_v59  ;;  %v2195_v58 = vadd.f32 %v2194_v35, %v2103_v13  ;;  %v6825_v13 = vld [vmem:[#allocation151_spill] sm:$0xff] }
 0x3af   :  { %2534 = vmatmul.f32.gmra.mxu1 %v6814_v28 }
 0x3b0   :  { %v2286_v39 = vpop.f32.mrf.mxu2  ;;  %v2378_v18 = vpop.f32.mrf.mxu3 }
 0x3b1   :  { %v2287_v48 = vadd.f32 %v2286_v39, %v2195_v58  ;;  %v2105_v49 = vpop.f32.mrf.mxu0  ;;  %v6826_v39 = vld [vmem:[#allocation154_spill] sm:$0xff] }
 0x3b2   :  { %v2106_v3 = vadd.f32 %v2105_v49, %v5897_v45  ;;  %v6829_v49 = vld [vmem:[#allocation155_spill] sm:$0xff] }
 0x3b3   :  { %v6119_v25 = vadd.f32 %v2378_v18, %v2287_v48  ;;  %v6828_v18 = vld [vmem:[#allocation42_spill] sm:$0xff] }
 0x3b4   :  { %v2197_v4 = vpop.f32.mrf.mxu1  ;;  %2445 = vmatmul.f32.gmra.mxu0 %v6815_v43 }
 0x3b5   :  { %2629 = vmatmul.f32.gmra.mxu2 %v6816_v61  ;;  %2863 = vmatmul.msk.f32.gmra.mxu3 %vm839_vm0, %v6817_v54  ;;  %v2198_v60 = vadd.f32 %v2197_v4, %v2106_v3 }
 0x3b7   :  { %2537 = vmatmul.f32.gmra.mxu1 %v6818_v23  ;;  %v6830_v23 = vld [vmem:[#allocation158_spill] sm:$0xff] }
 0x3b8   :  { %v2289_v0 = vpop.f32.mrf.mxu2  ;;  %v2381_v57 = vpop.f32.mrf.mxu3 }
 0x3b9   :  { %v2290_v53 = vadd.f32 %v2289_v0, %v2198_v60  ;;  %v2108_v5 = vpop.f32.mrf.mxu0  ;;  %v6831_v0 = vld [vmem:[#allocation45_spill] sm:$0xff] }
 0x3ba   :  { %v2109_v2 = vadd.f32 %v2108_v5, %v5913_v16  ;;  %v6833_v5 = vld [vmem:[#allocation159_spill] sm:$0xff] }
 0x3bb   :  { %v6127_v45 = vadd.f32 %v2381_v57, %v2290_v53  ;;  %v6832_v57 = vld [vmem:[#allocation46_spill] sm:$0xff] }
 0x3bc   :  { %v2200_v10 = vpop.f32.mrf.mxu1  ;;  %2448 = vmatmul.f32.gmra.mxu0 %v6819_v31 }
 0x3bd   :  { %2632 = vmatmul.f32.gmra.mxu2 %v6820_v47  ;;  %2864 = vmatmul.msk.f32.gmra.mxu3 %vm839_vm0, %v6821_v24  ;;  %v2201_v30 = vadd.f32 %v2200_v10, %v2109_v2 }
 0x3bf   :  { %2540 = vmatmul.f32.gmra.mxu1 %v6822_v51  ;;  %v6834_v51 = vld [vmem:[#allocation163_spill] sm:$0xff] }
 0x3c0   :  { %v2292_v19 = vpop.f32.mrf.mxu2  ;;  %v2384_v22 = vpop.f32.mrf.mxu3 }
 0x3c1   :  { %v2293_v50 = vadd.f32 %v2292_v19, %v2201_v30  ;;  %v2404_v32 = vpop.f32.mrf.mxu0  ;;  %v6835_v19 = vld [vmem:[#allocation49_spill] sm:$0xff] }
 0x3c2   :  { %v2405_v16 = vadd.f32 %v2404_v32, %v5924_v11  ;;  %v6837_v32 = vld [vmem:[#allocation164_spill] sm:$0xff] }
 0x3c3   :  { %v6134_v1 = vadd.f32 %v2384_v22, %v2293_v50  ;;  %v6836_v22 = vld [vmem:[#allocation160_spill] sm:$0xff] }
 0x3c4   :  { %v2496_v38 = vpop.f32.mrf.mxu1  ;;  %2451 = vmatmul.f32.gmra.mxu0 %v6823_v40 }
 0x3c5   :  { %2635 = vmatmul.f32.gmra.mxu2 %v5457_v26  ;;  %2865 = vmatmul.msk.f32.gmra.mxu3 %vm839_vm0, %v6824_v37  ;;  %v2497_v9 = vadd.f32 %v2496_v38, %v2405_v16  ;;  %v6827_v26 = vld [vmem:[#allocation41_spill] sm:$0xff] }
 0x3c7   :  { %2543 = vmatmul.f32.gmra.mxu1 %v6825_v13 }
 0x3c8   :  { %v2588_v35 = vpop.f32.mrf.mxu2  ;;  %v2680_v52 = vpop.f32.mrf.mxu3 }
 0x3c9   :  { %v2589_v29 = vadd.f32 %v2588_v35, %v2497_v9  ;;  %v2407_v59 = vpop.f32.mrf.mxu0  ;;  %v6838_v35 = vld [vmem:[#allocation167_spill] sm:$0xff] }
 0x3ca   :  { %v2408_v58 = vadd.f32 %v2407_v59, %v5940_v6 }
 0x3cb   :  { %v2681_v28 = vadd.f32 %v2680_v52, %v2589_v29  ;;  %v6839_v52 = vld [vmem:[#allocation50_spill] sm:$0xff]  ;;  %v6840_v29 = vld [vmem:[#allocation53_spill] sm:$0xff] }
 0x3cc   :  { %v2499_v11 = vpop.f32.mrf.mxu1  ;;  %2454 = vmatmul.f32.gmra.mxu0 %v6826_v39 }
 0x3cd   :  { %2757 = vst.msk [vmem:[#allocation2 + $0x8] sm:$0xff] %vm2756_vm1, %v2681_v28  ;;  %2638 = vmatmul.f32.gmra.mxu2 %v6827_v26  ;;  %2866 = vmatmul.msk.f32.gmra.mxu3 %vm839_vm0, %v6828_v18  ;;  %v2500_v48 = vadd.f32 %v2499_v11, %v2408_v58  ;;  %v6841_v58 = vld [vmem:[#allocation168_spill] sm:$0xff] }
 0x3cf   :  { %2546 = vmatmul.f32.gmra.mxu1 %v6829_v49  ;;  %v6842_v49 = vld [vmem:[#allocation171_spill] sm:$0xff] }
 0x3d0   :  { %v2591_v3 = vpop.f32.mrf.mxu2  ;;  %v2683_v4 = vpop.f32.mrf.mxu3 }
 0x3d1   :  { %v2592_v43 = vadd.f32 %v2591_v3, %v2500_v48  ;;  %v2410_v61 = vpop.f32.mrf.mxu0  ;;  %v6843_v3 = vld [vmem:[#allocation54_spill] sm:$0xff] }
 0x3d2   :  { %v2411_v6 = vadd.f32 %v2410_v61, %v5956_v42  ;;  %v6845_v61 = vld [vmem:[#allocation172_spill] sm:$0xff] }
 0x3d3   :  { %v2684_v54 = vadd.f32 %v2683_v4, %v2592_v43  ;;  %v6844_v4 = vld [vmem:[#allocation57_spill] sm:$0xff] }
 0x3d4   :  { %v2502_v60 = vpop.f32.mrf.mxu1  ;;  %2457 = vmatmul.f32.gmra.mxu0 %v6830_v23 }
 0x3d5   :  { %2759 = vst.msk [vmem:[#allocation2 + $0x18] sm:$0xff] %vm2756_vm1, %v2684_v54  ;;  %2641 = vmatmul.f32.gmra.mxu2 %v6831_v0  ;;  %2867 = vmatmul.msk.f32.gmra.mxu3 %vm839_vm0, %v6832_v57  ;;  %v2503_v53 = vadd.f32 %v2502_v60, %v2411_v6 }
 0x3d7   :  { %2549 = vmatmul.f32.gmra.mxu1 %v6833_v5  ;;  %v6847_v5 = vld [vmem:[#allocation58_spill] sm:$0xff] }
 0x3d8   :  { %v2594_v2 = vpop.f32.mrf.mxu2  ;;  %v2686_v10 = vpop.f32.mrf.mxu3 }
 0x3d9   :  { %v2595_v31 = vadd.f32 %v2594_v2, %v2503_v53  ;;  %v2413_v47 = vpop.f32.mrf.mxu0  ;;  %v6846_v53 = vld [vmem:[#allocation175_spill] sm:$0xff]  ;;  %v6848_v2 = vld [vmem:[#allocation61_spill] sm:$0xff] }
 0x3da   :  { %v2414_v42 = vadd.f32 %v2413_v47, %v5966_v56 }
 0x3db   :  { %v2687_v24 = vadd.f32 %v2686_v10, %v2595_v31  ;;  %v6849_v31 = vld [vmem:[#allocation176_spill] sm:$0xff] }
 0x3dc   :  { %v2505_v30 = vpop.f32.mrf.mxu1  ;;  %2460 = vmatmul.f32.gmra.mxu0 %v6834_v51 }
 0x3dd   :  { %2761 = vst.msk [vmem:[#allocation2 + $0x28] sm:$0xff] %vm2756_vm1, %v2687_v24  ;;  %2644 = vmatmul.f32.gmra.mxu2 %v6835_v19  ;;  %2868 = vmatmul.msk.f32.gmra.mxu3 %vm839_vm0, %v6836_v22  ;;  %v2506_v50 = vadd.f32 %v2505_v30, %v2414_v42  ;;  %v6850_v22 = vld [vmem:[#allocation179_spill] sm:$0xff] }
 0x3df   :  { %2552 = vmatmul.f32.gmra.mxu1 %v6837_v32  ;;  %v6852_v32 = vld [vmem:[#allocation65_spill] sm:$0xff] }
 0x3e0   :  { %v2597_v16 = vpop.f32.mrf.mxu2  ;;  %v2689_v38 = vpop.f32.mrf.mxu3 }
 0x3e1   :  { %v2598_v40 = vadd.f32 %v2597_v16, %v2506_v50  ;;  %v2416_v37 = vpop.f32.mrf.mxu0  ;;  %v6851_v50 = vld [vmem:[#allocation62_spill] sm:$0xff] }
 0x3e2   :  { %v2417_v56 = vadd.f32 %v2416_v37, %v5979_v8 }
 0x3e3   :  { %v2690_v9 = vadd.f32 %v2689_v38, %v2598_v40  ;;  %v6853_v38 = vld [vmem:[#allocation180_spill] sm:$0xff] }
 0x3e4   :  { %v2508_v13 = vpop.f32.mrf.mxu1  ;;  %2463 = vmatmul.f32.gmra.mxu0 %v6838_v35 }
 0x3e5   :  { %2763 = vst.msk [vmem:[#allocation2 + $0x38] sm:$0xff] %vm2756_vm1, %v2690_v9  ;;  %2647 = vmatmul.f32.gmra.mxu2 %v6839_v52  ;;  %2869 = vmatmul.msk.f32.gmra.mxu3 %vm839_vm0, %v6840_v29  ;;  %v2509_v59 = vadd.f32 %v2508_v13, %v2417_v56  ;;  %v6854_v52 = vld [vmem:[#allocation181_spill] sm:$0xff]  ;;  %v6855_v29 = vld [vmem:[#allocation66_spill] sm:$0xff] }
 0x3e7   :  { %2555 = vmatmul.f32.gmra.mxu1 %v6841_v58 }
 0x3e8   :  { %v2600_v28 = vpop.f32.mrf.mxu2  ;;  %v2692_v11 = vpop.f32.mrf.mxu3 }
 0x3e9   :  { %v2601_v39 = vadd.f32 %v2600_v28, %v2509_v59  ;;  %v2419_v26 = vpop.f32.mrf.mxu0  ;;  %v6856_v59 = vld [vmem:[#allocation69_spill] sm:$0xff]  ;;  %v6857_v28 = vld [vmem:[#allocation182_spill] sm:$0xff] }
 0x3ea   :  { %v2420_v8 = vadd.f32 %v2419_v26, %v5986_v63 }
 0x3eb   :  { %v2693_v18 = vadd.f32 %v2692_v11, %v2601_v39 }
 0x3ec   :  { %v2511_v48 = vpop.f32.mrf.mxu1  ;;  %2466 = vmatmul.f32.gmra.mxu0 %v6842_v49 }
 0x3ed   :  { %2765 = vst.msk [vmem:[#allocation2 + $0x48] sm:$0xff] %vm2756_vm1, %v2693_v18  ;;  %2650 = vmatmul.f32.gmra.mxu2 %v6843_v3  ;;  %2870 = vmatmul.msk.f32.gmra.mxu3 %vm839_vm0, %v6844_v4  ;;  %v2512_v43 = vadd.f32 %v2511_v48, %v2420_v8 }
 0x3ef   :  { %2558 = vmatmul.f32.gmra.mxu1 %v6845_v61 }
 0x3f0   :  { %v2603_v6 = vpop.f32.mrf.mxu2  ;;  %v2695_v54 = vpop.f32.mrf.mxu3 }
 0x3f1   :  { %v2604_v60 = vadd.f32 %v2603_v6, %v2512_v43  ;;  %v2422_v23 = vpop.f32.mrf.mxu0 }
 0x3f2   :  { %v2423_v63 = vadd.f32 %v2422_v23, %v5993_v44 }
 0x3f3   :  { %v2696_v0 = vadd.f32 %v2695_v54, %v2604_v60 }
 0x3f4   :  { %v2514_v57 = vpop.f32.mrf.mxu1  ;;  %2469 = vmatmul.f32.gmra.mxu0 %v6846_v53 }
 0x3f5   :  { %2767 = vst.msk [vmem:[#allocation2 + $0x58] sm:$0xff] %vm2756_vm1, %v2696_v0  ;;  %2653 = vmatmul.f32.gmra.mxu2 %v6847_v5  ;;  %2871 = vmatmul.msk.f32.gmra.mxu3 %vm839_vm0, %v6848_v2  ;;  %v2515_v10 = vadd.f32 %v2514_v57, %v2423_v63 }
 0x3f7   :  { %2561 = vmatmul.f32.gmra.mxu1 %v6849_v31 }
 0x3f8   :  { %v2606_v47 = vpop.f32.mrf.mxu2  ;;  %v2698_v42 = vpop.f32.mrf.mxu3 }
 0x3f9   :  { %v2607_v24 = vadd.f32 %v2606_v47, %v2515_v10  ;;  %v2425_v30 = vpop.f32.mrf.mxu0 }
 0x3fa   :  { %v2426_v44 = vadd.f32 %v2425_v30, %v6000_v36 }
 0x3fb   :  { %v2699_v51 = vadd.f32 %v2698_v42, %v2607_v24 }
 0x3fc   :  { %v2517_v19 = vpop.f32.mrf.mxu1  ;;  %2472 = vmatmul.f32.gmra.mxu0 %v6850_v22 }
 0x3fd   :  { %2769 = vst.msk [vmem:[#allocation2 + $0x68] sm:$0xff] %vm2756_vm1, %v2699_v51  ;;  %2656 = vmatmul.f32.gmra.mxu2 %v6851_v50  ;;  %2872 = vmatmul.msk.f32.gmra.mxu3 %vm839_vm0, %v6852_v32  ;;  %v2518_v16 = vadd.f32 %v2517_v19, %v2426_v44 }
 0x3ff   :  { %2564 = vmatmul.f32.gmra.mxu1 %v6853_v38 }
 0x400   :  { %v2609_v40 = vpop.f32.mrf.mxu2  ;;  %v2701_v37 = vpop.f32.mrf.mxu3 }
 0x401   :  { %v2610_v56 = vadd.f32 %v2609_v40, %v2518_v16  ;;  %v2428_v9 = vpop.f32.mrf.mxu0 }
 0x402   :  { %v2429_v36 = vadd.f32 %v2428_v9, %v6007_v33 }
 0x403   :  { %v2702_v13 = vadd.f32 %v2701_v37, %v2610_v56 }
 0x404   :  { %v2520_v35 = vpop.f32.mrf.mxu1  ;;  %2475 = vmatmul.f32.gmra.mxu0 %v6854_v52 }
 0x405   :  { %2771 = vst.msk [vmem:[#allocation2 + $0x78] sm:$0xff] %vm2756_vm1, %v2702_v13  ;;  %2659 = vmatmul.f32.gmra.mxu2 %v6855_v29  ;;  %2873 = vmatmul.msk.f32.gmra.mxu3 %vm839_vm0, %v6856_v59  ;;  %v2521_v58 = vadd.f32 %v2520_v35, %v2429_v36 }
 0x407   :  { %2567 = vmatmul.f32.gmra.mxu1 %v6857_v28 }
 0x408   :  { %v2612_v11 = vpop.f32.mrf.mxu2  ;;  %v2704_v39 = vpop.f32.mrf.mxu3 }
 0x409   :  { %v2613_v26 = vadd.f32 %v2612_v11, %v2521_v58  ;;  %v2431_v8 = vpop.f32.mrf.mxu0 }
 0x40a   :  { %v2432_v33 = vadd.f32 %v2431_v8, %v6015_v21 }
 0x40b   :  { %v2705_v18 = vadd.f32 %v2704_v39, %v2613_v26 }
 0x40c   :  { %v2523_v48 = vpop.f32.mrf.mxu1 }
 0x40d   :  { %2773 = vst.msk [vmem:[#allocation2 + $0x88] sm:$0xff] %vm2756_vm1, %v2705_v18  ;;  %v2524_v49 = vadd.f32 %v2523_v48, %v2432_v33 }
 0x410   :  { %v2615_v3 = vpop.f32.mrf.mxu2  ;;  %v2707_v4 = vpop.f32.mrf.mxu3 }
 0x411   :  { %v2616_v43 = vadd.f32 %v2615_v3, %v2524_v49  ;;  %v2434_v61 = vpop.f32.mrf.mxu0 }
 0x412   :  { %v2435_v6 = vadd.f32 %v2434_v61, %v6023_v41 }
 0x413   :  { %v2708_v54 = vadd.f32 %v2707_v4, %v2616_v43 }
 0x414   :  { %v2526_v60 = vpop.f32.mrf.mxu1 }
 0x415   :  { %2775 = vst.msk [vmem:[#allocation2 + $0x98] sm:$0xff] %vm2756_vm1, %v2708_v54  ;;  %v2527_v23 = vadd.f32 %v2526_v60, %v2435_v6 }
 0x418   :  { %v2618_v63 = vpop.f32.mrf.mxu2  ;;  %v2710_v0 = vpop.f32.mrf.mxu3 }
 0x419   :  { %v2619_v57 = vadd.f32 %v2618_v63, %v2527_v23  ;;  %v2437_v21 = vpop.f32.mrf.mxu0 }
 0x41a   :  { %v2438_v53 = vadd.f32 %v2437_v21, %v6031_v15 }
 0x41b   :  { %v2711_v5 = vadd.f32 %v2710_v0, %v2619_v57 }
 0x41c   :  { %v2529_v2 = vpop.f32.mrf.mxu1 }
 0x41d   :  { %2777 = vst.msk [vmem:[#allocation2 + $0xa8] sm:$0xff] %vm2756_vm1, %v2711_v5  ;;  %v2530_v10 = vadd.f32 %v2529_v2, %v2438_v53 }
 0x420   :  { %v2621_v31 = vpop.f32.mrf.mxu2  ;;  %v2713_v47 = vpop.f32.mrf.mxu3 }
 0x421   :  { %v2622_v42 = vadd.f32 %v2621_v31, %v2530_v10  ;;  %v2440_v41 = vpop.f32.mrf.mxu0 }
 0x422   :  { %v2441_v24 = vadd.f32 %v2440_v41, %v6039_v46 }
 0x423   :  { %v2714_v30 = vadd.f32 %v2713_v47, %v2622_v42 }
 0x424   :  { %v2532_v44 = vpop.f32.mrf.mxu1 }
 0x425   :  { %2779 = vst.msk [vmem:[#allocation2 + $0xb8] sm:$0xff] %vm2756_vm1, %v2714_v30  ;;  %v2533_v51 = vadd.f32 %v2532_v44, %v2441_v24 }
 0x428   :  { %v2624_v19 = vpop.f32.mrf.mxu2  ;;  %v2716_v22 = vpop.f32.mrf.mxu3 }
 0x429   :  { %v2625_v50 = vadd.f32 %v2624_v19, %v2533_v51  ;;  %v2443_v15 = vpop.f32.mrf.mxu0 }
 0x42a   :  { %v2444_v32 = vadd.f32 %v2443_v15, %v6047_v14 }
 0x42b   :  { %v2717_v16 = vadd.f32 %v2716_v22, %v2625_v50 }
 0x42c   :  { %v2535_v38 = vpop.f32.mrf.mxu1 }
 0x42d   :  { %2781 = vst.msk [vmem:[#allocation2 + $0xc8] sm:$0xff] %vm2756_vm1, %v2717_v16  ;;  %v2536_v40 = vadd.f32 %v2535_v38, %v2444_v32 }
 0x430   :  { %v2627_v37 = vpop.f32.mrf.mxu2  ;;  %v2719_v56 = vpop.f32.mrf.mxu3 }
 0x431   :  { %v2628_v9 = vadd.f32 %v2627_v37, %v2536_v40  ;;  %v2446_v46 = vpop.f32.mrf.mxu0 }
 0x432   :  { %v2447_v36 = vadd.f32 %v2446_v46, %v6055_v20 }
 0x433   :  { %v2720_v13 = vadd.f32 %v2719_v56, %v2628_v9 }
 0x434   :  { %v2538_v35 = vpop.f32.mrf.mxu1 }
 0x435   :  { %2783 = vst.msk [vmem:[#allocation2 + $0xd8] sm:$0xff] %vm2756_vm1, %v2720_v13  ;;  %v2539_v52 = vadd.f32 %v2538_v35, %v2447_v36 }
 0x438   :  { %v2630_v29 = vpop.f32.mrf.mxu2  ;;  %v2722_v59 = vpop.f32.mrf.mxu3 }
 0x439   :  { %v2631_v58 = vadd.f32 %v2630_v29, %v2539_v52  ;;  %v2449_v14 = vpop.f32.mrf.mxu0 }
 0x43a   :  { %v2450_v28 = vadd.f32 %v2449_v14, %v6063_v55 }
 0x43b   :  { %v2723_v11 = vadd.f32 %v2722_v59, %v2631_v58 }
 0x43c   :  { %v2541_v39 = vpop.f32.mrf.mxu1 }
 0x43d   :  { %2785 = vst.msk [vmem:[#allocation2 + $0xe8] sm:$0xff] %vm2756_vm1, %v2723_v11  ;;  %v2542_v26 = vadd.f32 %v2541_v39, %v2450_v28 }
 0x440   :  { %v2633_v8 = vpop.f32.mrf.mxu2  ;;  %v2725_v33 = vpop.f32.mrf.mxu3 }
 0x441   :  { %v2634_v18 = vadd.f32 %v2633_v8, %v2542_v26  ;;  %v2452_v20 = vpop.f32.mrf.mxu0 }
 0x442   :  { %v2453_v48 = vadd.f32 %v2452_v20, %v6071_v7 }
 0x443   :  { %v2726_v49 = vadd.f32 %v2725_v33, %v2634_v18 }
 0x444   :  { %v2544_v3 = vpop.f32.mrf.mxu1 }
 0x445   :  { %2787 = vst.msk [vmem:[#allocation2 + $0xf8] sm:$0xff] %vm2756_vm1, %v2726_v49  ;;  %v2545_v4 = vadd.f32 %v2544_v3, %v2453_v48 }
 0x448   :  { %v2636_v43 = vpop.f32.mrf.mxu2  ;;  %v2728_v61 = vpop.f32.mrf.mxu3 }
 0x449   :  { %v2637_v6 = vadd.f32 %v2636_v43, %v2545_v4  ;;  %v2455_v55 = vpop.f32.mrf.mxu0 }
 0x44a   :  { %v2456_v54 = vadd.f32 %v2455_v55, %v6079_v17 }
 0x44b   :  { %v2729_v60 = vadd.f32 %v2728_v61, %v2637_v6 }
 0x44c   :  { %v2547_v23 = vpop.f32.mrf.mxu1 }
 0x44d   :  { %2789 = vst.msk [vmem:[#allocation2 + $0x108] sm:$0xff] %vm2756_vm1, %v2729_v60  ;;  %v2548_v63 = vadd.f32 %v2547_v23, %v2456_v54 }
 0x450   :  { %v2639_v0 = vpop.f32.mrf.mxu2  ;;  %v2731_v57 = vpop.f32.mrf.mxu3 }
 0x451   :  { %v2640_v21 = vadd.f32 %v2639_v0, %v2548_v63  ;;  %v2458_v7 = vpop.f32.mrf.mxu0 }
 0x452   :  { %v2459_v53 = vadd.f32 %v2458_v7, %v6087_v27 }
 0x453   :  { %v2732_v5 = vadd.f32 %v2731_v57, %v2640_v21 }
 0x454   :  { %v2550_v2 = vpop.f32.mrf.mxu1 }
 0x455   :  { %2791 = vst.msk [vmem:[#allocation2 + $0x118] sm:$0xff] %vm2756_vm1, %v2732_v5  ;;  %v2551_v10 = vadd.f32 %v2550_v2, %v2459_v53 }
 0x458   :  { %v2642_v31 = vpop.f32.mrf.mxu2  ;;  %v2734_v47 = vpop.f32.mrf.mxu3 }
 0x459   :  { %v2643_v42 = vadd.f32 %v2642_v31, %v2551_v10  ;;  %v2461_v17 = vpop.f32.mrf.mxu0 }
 0x45a   :  { %v2462_v41 = vadd.f32 %v2461_v17, %v6095_v34 }
 0x45b   :  { %v2735_v24 = vadd.f32 %v2734_v47, %v2643_v42 }
 0x45c   :  { %v2553_v30 = vpop.f32.mrf.mxu1 }
 0x45d   :  { %2793 = vst.msk [vmem:[#allocation2 + $0x128] sm:$0xff] %vm2756_vm1, %v2735_v24  ;;  %v2554_v44 = vadd.f32 %v2553_v30, %v2462_v41 }
 0x460   :  { %v2645_v51 = vpop.f32.mrf.mxu2  ;;  %v2737_v19 = vpop.f32.mrf.mxu3 }
 0x461   :  { %v2646_v22 = vadd.f32 %v2645_v51, %v2554_v44  ;;  %v2464_v27 = vpop.f32.mrf.mxu0 }
 0x462   :  { %v2465_v50 = vadd.f32 %v2464_v27, %v6103_v12 }
 0x463   :  { %v2738_v15 = vadd.f32 %v2737_v19, %v2646_v22 }
 0x464   :  { %v2556_v32 = vpop.f32.mrf.mxu1 }
 0x465   :  { %2795 = vst.msk [vmem:[#allocation2 + $0x138] sm:$0xff] %vm2756_vm1, %v2738_v15  ;;  %v2557_v16 = vadd.f32 %v2556_v32, %v2465_v50 }
 0x468   :  { %v2648_v38 = vpop.f32.mrf.mxu2  ;;  %v2740_v40 = vpop.f32.mrf.mxu3 }
 0x469   :  { %v2649_v37 = vadd.f32 %v2648_v38, %v2557_v16  ;;  %v2467_v34 = vpop.f32.mrf.mxu0 }
 0x46a   :  { %v2468_v56 = vadd.f32 %v2467_v34, %v6111_v62 }
 0x46b   :  { %v2741_v9 = vadd.f32 %v2740_v40, %v2649_v37 }
 0x46c   :  { %v2559_v46 = vpop.f32.mrf.mxu1 }
 0x46d   :  { %2797 = vst.msk [vmem:[#allocation2 + $0x148] sm:$0xff] %vm2756_vm1, %v2741_v9  ;;  %v2560_v36 = vadd.f32 %v2559_v46, %v2468_v56 }
 0x470   :  { %v2651_v13 = vpop.f32.mrf.mxu2  ;;  %v2743_v35 = vpop.f32.mrf.mxu3 }
 0x471   :  { %v2652_v52 = vadd.f32 %v2651_v13, %v2560_v36  ;;  %v2470_v12 = vpop.f32.mrf.mxu0 }
 0x472   :  { %v2471_v29 = vadd.f32 %v2470_v12, %v6119_v25 }
 0x473   :  { %v2744_v59 = vadd.f32 %v2743_v35, %v2652_v52 }
 0x474   :  { %v2562_v58 = vpop.f32.mrf.mxu1 }
 0x475   :  { %2799 = vst.msk [vmem:[#allocation2 + $0x158] sm:$0xff] %vm2756_vm1, %v2744_v59  ;;  %v2563_v14 = vadd.f32 %v2562_v58, %v2471_v29 }
 0x478   :  { %v2654_v28 = vpop.f32.mrf.mxu2  ;;  %v2746_v11 = vpop.f32.mrf.mxu3 }
 0x479   :  { %v2655_v39 = vadd.f32 %v2654_v28, %v2563_v14  ;;  %v2473_v62 = vpop.f32.mrf.mxu0 }
 0x47a   :  { %v2474_v26 = vadd.f32 %v2473_v62, %v6127_v45 }
 0x47b   :  { %v2747_v8 = vadd.f32 %v2746_v11, %v2655_v39 }
 0x47c   :  { %v2565_v33 = vpop.f32.mrf.mxu1 }
 0x47d   :  { %2801 = vst.msk [vmem:[#allocation2 + $0x168] sm:$0xff] %vm2756_vm1, %v2747_v8  ;;  %v2566_v18 = vadd.f32 %v2565_v33, %v2474_v26 }
 0x480   :  { %v2657_v20 = vpop.f32.mrf.mxu2  ;;  %v2749_v48 = vpop.f32.mrf.mxu3 }
 0x481   :  { %v2658_v49 = vadd.f32 %v2657_v20, %v2566_v18  ;;  %v2476_v25 = vpop.f32.mrf.mxu0 }
 0x482   :  { %v2477_v3 = vadd.f32 %v2476_v25, %v6134_v1 }
 0x483   :  { %v2750_v4 = vadd.f32 %v2749_v48, %v2658_v49 }
 0x484   :  { %v2568_v43 = vpop.f32.mrf.mxu1 }
 0x485   :  { %2803 = vst.msk [vmem:[#allocation2 + $0x178] sm:$0xff] %vm2756_vm1, %v2750_v4  ;;  %v2569_v61 = vadd.f32 %v2568_v43, %v2477_v3 }
 0x488   :  { %v2660_v45 = vpop.f32.mrf.mxu2  ;;  %v2752_v6 = vpop.f32.mrf.mxu3 }
 0x489   :  { %v2661_v55 = vadd.f32 %v2660_v45, %v2569_v61 }
 0x48b   :  { %v2753_v54 = vadd.f32 %v2752_v6, %v2661_v55 }
 0x48d   :  { %2805 = vst.msk [vmem:[#allocation2 + $0x188] sm:$0xff] %vm2756_vm1, %v2753_v54 }
 0x48e   :  { %2818 = dma.vmem_to_hbm [thread:$0]  %s2811_s22, 6400, %s2813_s25, [#allocation3], %s2905_s26, %s2905_s26, %s2906_s27  }
 0x48f   :  { %2902 = dma.done.wait [#allocation3], 6400  }
 0x490   :  { %2903 = vsyncadd [#allocation3], 4294960896 }
 0x491   :  { %2823 = vsyncpa [#allocation3], 1 }

</bundles_post_ra>
